<compile_context>
chip_gen: v7x
topology: tpu7x:2x2x1
jax: 0.10.0
libtpu: 0.0.40
codegen_flags: <defaults>
</compile_context>

<pallas_src>
import jax
import jax.numpy as jnp
from jax.experimental import pallas as pl
from jax.experimental.pallas import tpu as pltpu

NUM_LAYERS = 4
HIDDEN = 20      # forced to 20 by Conv1d(in_channels=20) in the torch module
OUT_CH = 4
KSIZE = 3
GATES = 4 * HIDDEN


def _param_offsets(input_size):
    """Row offsets of each slab in the packed (rows, 4H) parameter array.

    Every slab starts at a multiple of 8 rows and spans a multiple of 8 rows
    (zero-padded), so all in-kernel ref slices are sublane-tile aligned.
    """
    f_pad = ((input_size + 7) // 8) * 8
    o_wih0 = 0                                   # (F, 4H)   layer-0 input weights
    o_whh0 = f_pad                               # (20, 4H)  layer-0 recurrent weights (padded to 24 rows)
    o_wcat = o_whh0 + 24                         # 3 x (40, 4H) stacked [W_ih; W_hh] for layers 1..3
    o_b = o_wcat + (NUM_LAYERS - 1) * 2 * HIDDEN  # (4, 4H) biases, one row per layer (padded to 8 rows)
    o_wc = o_b + 8                               # (20, K*OUT) conv taps in lanes 0:12 (padded to 24 rows)
    o_bc = o_wc + 24                             # (1, OUT) conv bias in lanes 0:4 (padded to 8 rows)
    total = o_bc + 8
    return o_wih0, o_whh0, o_wcat, o_b, o_wc, o_bc, total


def pack_params(params, input_size):
    """Pack the logical parameter tuple into one sublane-aligned (rows, 4H) f32 array."""
    wih0, wih, whh, b, wc, bc = params
    H = HIDDEN
    o_wih0, o_whh0, o_wcat, o_b, o_wc, o_bc, total = _param_offsets(input_size)
    P = jnp.zeros((total, GATES), jnp.float32)
    P = P.at[o_wih0:o_wih0 + input_size, :].set(wih0)
    P = P.at[o_whh0:o_whh0 + H, :].set(whh[0])
    for l in range(1, NUM_LAYERS):
        base = o_wcat + (l - 1) * 2 * H
        P = P.at[base:base + H, :].set(wih[l - 1])        # input path
        P = P.at[base + H:base + 2 * H, :].set(whh[l])    # recurrent path
    P = P.at[o_b:o_b + NUM_LAYERS, :].set(b.reshape(NUM_LAYERS, GATES))
    wc_cat = jnp.concatenate([wc[k] for k in range(KSIZE)], axis=1)   # (H, K*OUT)
    P = P.at[o_wc:o_wc + H, :KSIZE * OUT_CH].set(wc_cat)
    P = P.at[o_bc:o_bc + 1, :OUT_CH].set(bc)
    return P


def _lstm_conv_kernel(x_ref, p_ref, out_ref, xproj_ref, y_ref):
    T, B, F = x_ref.shape
    H = HIDDEN
    L = B - (KSIZE - 1)
    f_pad = ((F + 7) // 8) * 8
    o_wih0, o_whh0, o_wcat, o_b, o_wc, o_bc, _ = _param_offsets(F)

    # --- Biases (tiny slab, loaded once; b[0] is folded into the projection). ---
    b_slab = p_ref[o_b:o_b + 8, :]                       # (8, 4H) f32, rows 0..3 used
    b0 = b_slab[0:1, :]
    bias = [b_slab[l:l + 1, :] for l in range(1, NUM_LAYERS)]

    # --- Layer-0 input projection for ALL time steps in one MXU matmul, spill to VMEM. ---
    wih0_bf = p_ref[o_wih0:o_wih0 + f_pad, :][:F, :].astype(jnp.bfloat16)      # (F, 4H)
    x_all = x_ref[...].reshape(T * B, F).astype(jnp.bfloat16)                  # (T*B, F)
    xproj_ref[...] = (jnp.dot(x_all, wih0_bf, preferred_element_type=jnp.float32)
                      + b0)                                                     # + b[0] folded once

    # --- Recurrence weights, loaded once and kept as bf16 (single-pass MXU). ---
    whh0_bf = p_ref[o_whh0:o_whh0 + 24, :][:H, :].astype(jnp.bfloat16)         # (H, 4H)
    wcat_bf = [p_ref[o_wcat + (l - 1) * 2 * H:o_wcat + l * 2 * H, :].astype(jnp.bfloat16)
               for l in range(1, NUM_LAYERS)]                                   # (2H, 4H) each

    def gates(z, c_prev):
        # PyTorch gate order along the 4H axis: [i | f | g | o].
        sz = jax.nn.sigmoid(z)                   # one EUP pass over all 80 lanes
        i = sz[:, 0:H]
        f = sz[:, H:2 * H]
        o = sz[:, 3 * H:4 * H]
        g = jnp.tanh(z[:, 2 * H:3 * H])
        c = f * c_prev + i * g
        h = o * jnp.tanh(c)
        return h, c

    # --- Register-carried recurrent state for all 4 layers (f32). ---
    h = [jnp.zeros((B, H), jnp.float32) for _ in range(NUM_LAYERS)]
    c = [jnp.zeros((B, H), jnp.float32) for _ in range(NUM_LAYERS)]

    for t in range(T):                           # T is small & static: full unroll
        # Layer 0: input path + b[0] precomputed; only the recurrent dot remains.
        z0 = (xproj_ref[t * B:(t + 1) * B, :]
              + jnp.dot(h[0].astype(jnp.bfloat16), whh0_bf,
                        preferred_element_type=jnp.float32))
        h[0], c[0] = gates(z0, c[0])
        inp = h[0]
        # Layers 1..3: ONE fused dot per layer ([inp | h] @ [W_ih; W_hh]).
        for l in range(1, NUM_LAYERS):
            lhs = jnp.concatenate([inp, h[l]], axis=1).astype(jnp.bfloat16)    # (B, 2H)
            z = (jnp.dot(lhs, wcat_bf[l - 1], preferred_element_type=jnp.float32)
                 + bias[l - 1])
            h[l], c[l] = gates(z, c[l])
            inp = h[l]
        # Eager store of the top-layer output keeps the live vreg set small.
        y_ref[t * B:(t + 1) * B, :] = inp

    # --- Conv1d over the batch axis: ONE matmul over all taps & timesteps. ---
    wc_bf = p_ref[o_wc:o_wc + 24, :][:H, :KSIZE * OUT_CH].astype(jnp.bfloat16)  # (H, K*OUT)
    bc = p_ref[o_bc:o_bc + 8, :][0:1, :OUT_CH]                                  # (1, OUT)
    y_all = y_ref[...].astype(jnp.bfloat16)                                     # (T*B, H)
    taps = jnp.dot(y_all, wc_bf, preferred_element_type=jnp.float32)            # (T*B, K*OUT)
    taps = taps.reshape(T, B, KSIZE * OUT_CH)
    acc = jnp.broadcast_to(bc, (T, L, OUT_CH))
    for k in range(KSIZE):
        acc = acc + taps[:, k:k + L, k * OUT_CH:(k + 1) * OUT_CH]

    # Single writeback of the whole output slab.
    out_ref[...] = acc.astype(out_ref.dtype)


def lstm_conv_forward(x, params):
    T, B, F = x.shape
    assert B >= KSIZE, f"Conv1d over the batch axis needs batch >= {KSIZE}, got {B}"
    L = B - (KSIZE - 1)
    # Pack all parameters into a single sublane-aligned operand (in production,
    # pack once at load time and reuse; it is a cheap one-time host/XLA op).
    packed = pack_params(params, F)
    vmem = pl.BlockSpec(memory_space=pltpu.MemorySpace.VMEM)
    return pl.pallas_call(
        _lstm_conv_kernel,
        out_shape=jax.ShapeDtypeStruct((T, L, OUT_CH), jnp.float32),
        in_specs=[vmem, vmem],
        out_specs=vmem,
        scratch_shapes=[
            pltpu.VMEM((T * B, GATES), jnp.float32),   # layer-0 projection spill
            pltpu.VMEM((T * B, HIDDEN), jnp.float32),  # per-step top-layer outputs
        ],
    )(x, packed)


def init_params(key, input_size):
    """Deterministic synthetic parameters (PyTorch-style uniform init), fused-gate layout.

    Gate order along the 4H axis is PyTorch's: [i | f | g | o].
    NOTE: when loading real PyTorch weights, transpose weight_ih/weight_hh to
    (in, 4H)/(H, 4H) and fold b = b_ih + b_hh explicitly.
    """
    H = HIDDEN
    k_rnn = 1.0 / float(jnp.sqrt(H))
    k_conv = 1.0 / float(jnp.sqrt(H * KSIZE))
    ks = jax.random.split(key, 6)
    wih0 = jax.random.uniform(ks[0], (input_size, 4 * H), jnp.float32, -k_rnn, k_rnn)
    wih = jax.random.uniform(ks[1], (NUM_LAYERS - 1, H, 4 * H), jnp.float32, -k_rnn, k_rnn)
    whh = jax.random.uniform(ks[2], (NUM_LAYERS, H, 4 * H), jnp.float32, -k_rnn, k_rnn)
    b = jax.random.uniform(ks[3], (NUM_LAYERS, 1, 4 * H), jnp.float32, -2 * k_rnn, 2 * k_rnn)
    wc = jax.random.uniform(ks[4], (KSIZE, H, OUT_CH), jnp.float32, -k_conv, k_conv)
    bc = jax.random.uniform(ks[5], (1, OUT_CH), jnp.float32, -k_conv, k_conv)
    return wih0, wih, whh, b, wc, bc


def reference_forward(x, params):
    """Pure-JAX f32 reference mirroring torch semantics (for correctness check)."""
    wih0, wih, whh, b, wc, bc = params
    T, B, _ = x.shape
    H = HIDDEN

    def run_layer(inputs, w_ih, w_hh, bias):
        def step(carry, x_t):
            h, c = carry
            z = x_t @ w_ih + h @ w_hh + bias
            i = jax.nn.sigmoid(z[:, 0:H])
            f = jax.nn.sigmoid(z[:, H:2 * H])
            g = jnp.tanh(z[:, 2 * H:3 * H])
            o = jax.nn.sigmoid(z[:, 3 * H:4 * H])
            c = f * c + i * g
            h = o * jnp.tanh(c)
            return (h, c), h

        init = (jnp.zeros((B, H), jnp.float32), jnp.zeros((B, H), jnp.float32))
        _, ys = jax.lax.scan(step, init, inputs)
        return ys

    y = run_layer(x, wih0, whh[0], b[0])
    for l in range(1, NUM_LAYERS):
        y = run_layer(y, wih[l - 1], whh[l], b[l])

    L = B - (KSIZE - 1)
    out = jnp.broadcast_to(bc, (T, L, OUT_CH))
    for k in range(KSIZE):
        out = out + jnp.einsum('tbh,ho->tbo', y[:, k:k + L, :], wc[k])
    return out


if __name__ == "__main__":
    key = jax.random.PRNGKey(0)
    kx, kp = jax.random.split(key)
    T, B, F = 8, 16, 4              # seq=8, batch=16, input_size=4, hidden=20
    x = jax.random.normal(kx, (T, B, F), jnp.float32)
    params = init_params(kp, F)

    out = lstm_conv_forward(x, params)
    out = jax.block_until_ready(out)

    ref = reference_forward(x, params)
    assert out.shape == (T, B - (KSIZE - 1), OUT_CH), out.shape
    max_err = float(jnp.max(jnp.abs(out - ref)))
    # bf16 MXU operands (f32 accumulation) vs the all-f32 reference => relaxed tolerance.
    assert max_err < 5e-2, f"mismatch vs reference: {max_err}"
    print("KERNEL_OK")
</pallas_src>

<mosaic_0001>
module attributes {stable_mosaic.version = 11 : i64} {
  func.func @_lstm_conv_kernel(%arg0: memref<8x16x4xf32, #tpu.memory_space<vmem>>, %arg1: memref<192x80xf32, #tpu.memory_space<vmem>>, %arg2: memref<8x14x4xf32, #tpu.memory_space<vmem>>, %arg3: memref<128x80xf32, #tpu.memory_space<vmem>>, %arg4: memref<128x20xf32, #tpu.memory_space<vmem>>) attributes {dimension_semantics = [], scalar_prefetch = 0 : i64, scratch_operands = 2 : i64, tpu.core_type = #tpu.core_type<tc>} {
    %c152 = arith.constant 152 : index
    %c0 = arith.constant 0 : index
    %0 = vector.load %arg1[%c152, %c0] : memref<192x80xf32, #tpu.memory_space<vmem>>, vector<8x80xf32>
    %1 = vector.extract_strided_slice %0 {offsets = [0, 0], sizes = [1, 80], strides = [1, 1]} : vector<8x80xf32> to vector<1x80xf32>
    %2 = vector.extract_strided_slice %0 {offsets = [1, 0], sizes = [1, 80], strides = [1, 1]} : vector<8x80xf32> to vector<1x80xf32>
    %3 = vector.extract_strided_slice %0 {offsets = [2, 0], sizes = [1, 80], strides = [1, 1]} : vector<8x80xf32> to vector<1x80xf32>
    %4 = vector.extract_strided_slice %0 {offsets = [3, 0], sizes = [1, 80], strides = [1, 1]} : vector<8x80xf32> to vector<1x80xf32>
    %c0_0 = arith.constant 0 : index
    %c0_1 = arith.constant 0 : index
    %5 = vector.load %arg1[%c0_0, %c0_1] : memref<192x80xf32, #tpu.memory_space<vmem>>, vector<8x80xf32>
    %6 = vector.extract_strided_slice %5 {offsets = [0, 0], sizes = [4, 80], strides = [1, 1]} : vector<8x80xf32> to vector<4x80xf32>
    %7 = arith.truncf %6 : vector<4x80xf32> to vector<4x80xbf16>
    %c0_2 = arith.constant 0 : index
    %c0_3 = arith.constant 0 : index
    %c0_4 = arith.constant 0 : index
    %8 = vector.load %arg0[%c0_2, %c0_3, %c0_4] : memref<8x16x4xf32, #tpu.memory_space<vmem>>, vector<8x16x4xf32>
    %9 = vector.shape_cast %8 : vector<8x16x4xf32> to vector<128x4xf32>
    %10 = arith.truncf %9 : vector<128x4xf32> to vector<128x4xbf16>
    %cst = arith.constant dense<0.000000e+00> : vector<128x80xf32>
    %11 = tpu.matmul %10, %7, %cst {dimension_numbers = #tpu.dot_dimension_numbers<[1], [0], [0], [1], [0, 0, 1, 1], [], []>} : vector<128x4xbf16>, vector<4x80xbf16>, vector<128x80xf32> -> vector<128x80xf32>
    %12 = vector.broadcast %1 : vector<1x80xf32> to vector<128x80xf32>
    %13 = arith.addf %11, %12 : vector<128x80xf32>
    %c0_5 = arith.constant 0 : index
    %c0_6 = arith.constant 0 : index
    %14 = vector.load %arg3[%c0_5, %c0_6] : memref<128x80xf32, #tpu.memory_space<vmem>>, vector<128x80xf32>
    tpu.vector_store %arg3[%c0_5, %c0_6], %13 {strides = array<i32>} : memref<128x80xf32, #tpu.memory_space<vmem>>, vector<128x80xf32>,
    %c8 = arith.constant 8 : index
    %c0_7 = arith.constant 0 : index
    %15 = vector.load %arg1[%c8, %c0_7] : memref<192x80xf32, #tpu.memory_space<vmem>>, vector<24x80xf32>
    %16 = vector.extract_strided_slice %15 {offsets = [0, 0], sizes = [20, 80], strides = [1, 1]} : vector<24x80xf32> to vector<20x80xf32>
    %17 = arith.truncf %16 : vector<20x80xf32> to vector<20x80xbf16>
    %c32 = arith.constant 32 : index
    %c0_8 = arith.constant 0 : index
    %18 = vector.load %arg1[%c32, %c0_8] : memref<192x80xf32, #tpu.memory_space<vmem>>, vector<40x80xf32>
    %19 = arith.truncf %18 : vector<40x80xf32> to vector<40x80xbf16>
    %c72 = arith.constant 72 : index
    %c0_9 = arith.constant 0 : index
    %20 = vector.load %arg1[%c72, %c0_9] : memref<192x80xf32, #tpu.memory_space<vmem>>, vector<40x80xf32>
    %21 = arith.truncf %20 : vector<40x80xf32> to vector<40x80xbf16>
    %c112 = arith.constant 112 : index
    %c0_10 = arith.constant 0 : index
    %22 = vector.load %arg1[%c112, %c0_10] : memref<192x80xf32, #tpu.memory_space<vmem>>, vector<40x80xf32>
    %23 = arith.truncf %22 : vector<40x80xf32> to vector<40x80xbf16>
    %cst_11 = arith.constant 0.000000e+00 : f32
    %24 = vector.broadcast %cst_11 : f32 to vector<16x20xf32>
    %cst_12 = arith.constant 0.000000e+00 : f32
    %25 = vector.broadcast %cst_12 : f32 to vector<16x20xf32>
    %cst_13 = arith.constant 0.000000e+00 : f32
    %26 = vector.broadcast %cst_13 : f32 to vector<16x20xf32>
    %cst_14 = arith.constant 0.000000e+00 : f32
    %27 = vector.broadcast %cst_14 : f32 to vector<16x20xf32>
    %cst_15 = arith.constant 0.000000e+00 : f32
    %28 = vector.broadcast %cst_15 : f32 to vector<16x20xf32>
    %cst_16 = arith.constant 0.000000e+00 : f32
    %29 = vector.broadcast %cst_16 : f32 to vector<16x20xf32>
    %cst_17 = arith.constant 0.000000e+00 : f32
    %30 = vector.broadcast %cst_17 : f32 to vector<16x20xf32>
    %cst_18 = arith.constant 0.000000e+00 : f32
    %31 = vector.broadcast %cst_18 : f32 to vector<16x20xf32>
    %c0_19 = arith.constant 0 : index
    %c0_20 = arith.constant 0 : index
    %32 = vector.load %arg3[%c0_19, %c0_20] : memref<128x80xf32, #tpu.memory_space<vmem>>, vector<16x80xf32>
    %33 = arith.truncf %24 : vector<16x20xf32> to vector<16x20xbf16>
    %cst_21 = arith.constant dense<0.000000e+00> : vector<16x80xf32>
    %34 = tpu.matmul %33, %17, %cst_21 {dimension_numbers = #tpu.dot_dimension_numbers<[1], [0], [0], [1], [0, 0, 1, 1], [], []>} : vector<16x20xbf16>, vector<20x80xbf16>, vector<16x80xf32> -> vector<16x80xf32>
    %35 = arith.addf %32, %34 : vector<16x80xf32>
    %36 = arith.negf %35 : vector<16x80xf32>
    %37 = math.exp %36 : vector<16x80xf32>
    %cst_22 = arith.constant 1.000000e+00 : f32
    %38 = vector.broadcast %cst_22 : f32 to vector<16x80xf32>
    %39 = arith.addf %38, %37 : vector<16x80xf32>
    %40 = arith.divf %38, %39 : vector<16x80xf32>
    %41 = vector.extract_strided_slice %40 {offsets = [0, 0], sizes = [16, 20], strides = [1, 1]} : vector<16x80xf32> to vector<16x20xf32>
    %42 = vector.extract_strided_slice %40 {offsets = [0, 20], sizes = [16, 20], strides = [1, 1]} : vector<16x80xf32> to vector<16x20xf32>
    %43 = vector.extract_strided_slice %40 {offsets = [0, 60], sizes = [16, 20], strides = [1, 1]} : vector<16x80xf32> to vector<16x20xf32>
    %44 = vector.extract_strided_slice %35 {offsets = [0, 40], sizes = [16, 20], strides = [1, 1]} : vector<16x80xf32> to vector<16x20xf32>
    %45 = math.tanh %44 : vector<16x20xf32>
    %46 = arith.mulf %42, %28 : vector<16x20xf32>
    %47 = arith.mulf %41, %45 : vector<16x20xf32>
    %48 = arith.addf %46, %47 : vector<16x20xf32>
    %49 = math.tanh %48 : vector<16x20xf32>
    %50 = arith.mulf %43, %49 : vector<16x20xf32>
    %51 = tpu.concatenate %50, %25 in 1 : vector<16x20xf32>, vector<16x20xf32> -> vector<16x40xf32>
    %52 = arith.truncf %51 : vector<16x40xf32> to vector<16x40xbf16>
    %cst_23 = arith.constant dense<0.000000e+00> : vector<16x80xf32>
    %53 = tpu.matmul %52, %19, %cst_23 {dimension_numbers = #tpu.dot_dimension_numbers<[1], [0], [0], [1], [0, 0, 1, 1], [], []>} : vector<16x40xbf16>, vector<40x80xbf16>, vector<16x80xf32> -> vector<16x80xf32>
    %54 = vector.broadcast %2 : vector<1x80xf32> to vector<16x80xf32>
    %55 = arith.addf %53, %54 : vector<16x80xf32>
    %56 = arith.negf %55 : vector<16x80xf32>
    %57 = math.exp %56 : vector<16x80xf32>
    %cst_24 = arith.constant 1.000000e+00 : f32
    %58 = vector.broadcast %cst_24 : f32 to vector<16x80xf32>
    %59 = arith.addf %58, %57 : vector<16x80xf32>
    %60 = arith.divf %58, %59 : vector<16x80xf32>
    %61 = vector.extract_strided_slice %60 {offsets = [0, 0], sizes = [16, 20], strides = [1, 1]} : vector<16x80xf32> to vector<16x20xf32>
    %62 = vector.extract_strided_slice %60 {offsets = [0, 20], sizes = [16, 20], strides = [1, 1]} : vector<16x80xf32> to vector<16x20xf32>
    %63 = vector.extract_strided_slice %60 {offsets = [0, 60], sizes = [16, 20], strides = [1, 1]} : vector<16x80xf32> to vector<16x20xf32>
    %64 = vector.extract_strided_slice %55 {offsets = [0, 40], sizes = [16, 20], strides = [1, 1]} : vector<16x80xf32> to vector<16x20xf32>
    %65 = math.tanh %64 : vector<16x20xf32>
    %66 = arith.mulf %62, %29 : vector<16x20xf32>
    %67 = arith.mulf %61, %65 : vector<16x20xf32>
    %68 = arith.addf %66, %67 : vector<16x20xf32>
    %69 = math.tanh %68 : vector<16x20xf32>
    %70 = arith.mulf %63, %69 : vector<16x20xf32>
    %71 = tpu.concatenate %70, %26 in 1 : vector<16x20xf32>, vector<16x20xf32> -> vector<16x40xf32>
    %72 = arith.truncf %71 : vector<16x40xf32> to vector<16x40xbf16>
    %cst_25 = arith.constant dense<0.000000e+00> : vector<16x80xf32>
    %73 = tpu.matmul %72, %21, %cst_25 {dimension_numbers = #tpu.dot_dimension_numbers<[1], [0], [0], [1], [0, 0, 1, 1], [], []>} : vector<16x40xbf16>, vector<40x80xbf16>, vector<16x80xf32> -> vector<16x80xf32>
    %74 = vector.broadcast %3 : vector<1x80xf32> to vector<16x80xf32>
    %75 = arith.addf %73, %74 : vector<16x80xf32>
    %76 = arith.negf %75 : vector<16x80xf32>
    %77 = math.exp %76 : vector<16x80xf32>
    %cst_26 = arith.constant 1.000000e+00 : f32
    %78 = vector.broadcast %cst_26 : f32 to vector<16x80xf32>
    %79 = arith.addf %78, %77 : vector<16x80xf32>
    %80 = arith.divf %78, %79 : vector<16x80xf32>
    %81 = vector.extract_strided_slice %80 {offsets = [0, 0], sizes = [16, 20], strides = [1, 1]} : vector<16x80xf32> to vector<16x20xf32>
    %82 = vector.extract_strided_slice %80 {offsets = [0, 20], sizes = [16, 20], strides = [1, 1]} : vector<16x80xf32> to vector<16x20xf32>
    %83 = vector.extract_strided_slice %80 {offsets = [0, 60], sizes = [16, 20], strides = [1, 1]} : vector<16x80xf32> to vector<16x20xf32>
    %84 = vector.extract_strided_slice %75 {offsets = [0, 40], sizes = [16, 20], strides = [1, 1]} : vector<16x80xf32> to vector<16x20xf32>
    %85 = math.tanh %84 : vector<16x20xf32>
    %86 = arith.mulf %82, %30 : vector<16x20xf32>
    %87 = arith.mulf %81, %85 : vector<16x20xf32>
    %88 = arith.addf %86, %87 : vector<16x20xf32>
    %89 = math.tanh %88 : vector<16x20xf32>
    %90 = arith.mulf %83, %89 : vector<16x20xf32>
    %91 = tpu.concatenate %90, %27 in 1 : vector<16x20xf32>, vector<16x20xf32> -> vector<16x40xf32>
    %92 = arith.truncf %91 : vector<16x40xf32> to vector<16x40xbf16>
    %cst_27 = arith.constant dense<0.000000e+00> : vector<16x80xf32>
    %93 = tpu.matmul %92, %23, %cst_27 {dimension_numbers = #tpu.dot_dimension_numbers<[1], [0], [0], [1], [0, 0, 1, 1], [], []>} : vector<16x40xbf16>, vector<40x80xbf16>, vector<16x80xf32> -> vector<16x80xf32>
    %94 = vector.broadcast %4 : vector<1x80xf32> to vector<16x80xf32>
    %95 = arith.addf %93, %94 : vector<16x80xf32>
    %96 = arith.negf %95 : vector<16x80xf32>
    %97 = math.exp %96 : vector<16x80xf32>
    %cst_28 = arith.constant 1.000000e+00 : f32
    %98 = vector.broadcast %cst_28 : f32 to vector<16x80xf32>
    %99 = arith.addf %98, %97 : vector<16x80xf32>
    %100 = arith.divf %98, %99 : vector<16x80xf32>
    %101 = vector.extract_strided_slice %100 {offsets = [0, 0], sizes = [16, 20], strides = [1, 1]} : vector<16x80xf32> to vector<16x20xf32>
    %102 = vector.extract_strided_slice %100 {offsets = [0, 20], sizes = [16, 20], strides = [1, 1]} : vector<16x80xf32> to vector<16x20xf32>
    %103 = vector.extract_strided_slice %100 {offsets = [0, 60], sizes = [16, 20], strides = [1, 1]} : vector<16x80xf32> to vector<16x20xf32>
    %104 = vector.extract_strided_slice %95 {offsets = [0, 40], sizes = [16, 20], strides = [1, 1]} : vector<16x80xf32> to vector<16x20xf32>
    %105 = math.tanh %104 : vector<16x20xf32>
    %106 = arith.mulf %102, %31 : vector<16x20xf32>
    %107 = arith.mulf %101, %105 : vector<16x20xf32>
    %108 = arith.addf %106, %107 : vector<16x20xf32>
    %109 = math.tanh %108 : vector<16x20xf32>
    %110 = arith.mulf %103, %109 : vector<16x20xf32>
    %c0_29 = arith.constant 0 : index
    %c0_30 = arith.constant 0 : index
    %111 = vector.load %arg4[%c0_29, %c0_30] : memref<128x20xf32, #tpu.memory_space<vmem>>, vector<16x20xf32>
    tpu.vector_store %arg4[%c0_29, %c0_30], %110 {strides = array<i32>} : memref<128x20xf32, #tpu.memory_space<vmem>>, vector<16x20xf32>,
    %c16 = arith.constant 16 : index
    %c0_31 = arith.constant 0 : index
    %112 = vector.load %arg3[%c16, %c0_31] : memref<128x80xf32, #tpu.memory_space<vmem>>, vector<16x80xf32>
    %113 = arith.truncf %50 : vector<16x20xf32> to vector<16x20xbf16>
    %cst_32 = arith.constant dense<0.000000e+00> : vector<16x80xf32>
    %114 = tpu.matmul %113, %17, %cst_32 {dimension_numbers = #tpu.dot_dimension_numbers<[1], [0], [0], [1], [0, 0, 1, 1], [], []>} : vector<16x20xbf16>, vector<20x80xbf16>, vector<16x80xf32> -> vector<16x80xf32>
    %115 = arith.addf %112, %114 : vector<16x80xf32>
    %116 = arith.negf %115 : vector<16x80xf32>
    %117 = math.exp %116 : vector<16x80xf32>
    %cst_33 = arith.constant 1.000000e+00 : f32
    %118 = vector.broadcast %cst_33 : f32 to vector<16x80xf32>
    %119 = arith.addf %118, %117 : vector<16x80xf32>
    %120 = arith.divf %118, %119 : vector<16x80xf32>
    %121 = vector.extract_strided_slice %120 {offsets = [0, 0], sizes = [16, 20], strides = [1, 1]} : vector<16x80xf32> to vector<16x20xf32>
    %122 = vector.extract_strided_slice %120 {offsets = [0, 20], sizes = [16, 20], strides = [1, 1]} : vector<16x80xf32> to vector<16x20xf32>
    %123 = vector.extract_strided_slice %120 {offsets = [0, 60], sizes = [16, 20], strides = [1, 1]} : vector<16x80xf32> to vector<16x20xf32>
    %124 = vector.extract_strided_slice %115 {offsets = [0, 40], sizes = [16, 20], strides = [1, 1]} : vector<16x80xf32> to vector<16x20xf32>
    %125 = math.tanh %124 : vector<16x20xf32>
    %126 = arith.mulf %122, %48 : vector<16x20xf32>
    %127 = arith.mulf %121, %125 : vector<16x20xf32>
    %128 = arith.addf %126, %127 : vector<16x20xf32>
    %129 = math.tanh %128 : vector<16x20xf32>
    %130 = arith.mulf %123, %129 : vector<16x20xf32>
    %131 = tpu.concatenate %130, %70 in 1 : vector<16x20xf32>, vector<16x20xf32> -> vector<16x40xf32>
    %132 = arith.truncf %131 : vector<16x40xf32> to vector<16x40xbf16>
    %cst_34 = arith.constant dense<0.000000e+00> : vector<16x80xf32>
    %133 = tpu.matmul %132, %19, %cst_34 {dimension_numbers = #tpu.dot_dimension_numbers<[1], [0], [0], [1], [0, 0, 1, 1], [], []>} : vector<16x40xbf16>, vector<40x80xbf16>, vector<16x80xf32> -> vector<16x80xf32>
    %134 = vector.broadcast %2 : vector<1x80xf32> to vector<16x80xf32>
    %135 = arith.addf %133, %134 : vector<16x80xf32>
    %136 = arith.negf %135 : vector<16x80xf32>
    %137 = math.exp %136 : vector<16x80xf32>
    %cst_35 = arith.constant 1.000000e+00 : f32
    %138 = vector.broadcast %cst_35 : f32 to vector<16x80xf32>
    %139 = arith.addf %138, %137 : vector<16x80xf32>
    %140 = arith.divf %138, %139 : vector<16x80xf32>
    %141 = vector.extract_strided_slice %140 {offsets = [0, 0], sizes = [16, 20], strides = [1, 1]} : vector<16x80xf32> to vector<16x20xf32>
    %142 = vector.extract_strided_slice %140 {offsets = [0, 20], sizes = [16, 20], strides = [1, 1]} : vector<16x80xf32> to vector<16x20xf32>
    %143 = vector.extract_strided_slice %140 {offsets = [0, 60], sizes = [16, 20], strides = [1, 1]} : vector<16x80xf32> to vector<16x20xf32>
    %144 = vector.extract_strided_slice %135 {offsets = [0, 40], sizes = [16, 20], strides = [1, 1]} : vector<16x80xf32> to vector<16x20xf32>
    %145 = math.tanh %144 : vector<16x20xf32>
    %146 = arith.mulf %142, %68 : vector<16x20xf32>
    %147 = arith.mulf %141, %145 : vector<16x20xf32>
    %148 = arith.addf %146, %147 : vector<16x20xf32>
    %149 = math.tanh %148 : vector<16x20xf32>
    %150 = arith.mulf %143, %149 : vector<16x20xf32>
    %151 = tpu.concatenate %150, %90 in 1 : vector<16x20xf32>, vector<16x20xf32> -> vector<16x40xf32>
    %152 = arith.truncf %151 : vector<16x40xf32> to vector<16x40xbf16>
    %cst_36 = arith.constant dense<0.000000e+00> : vector<16x80xf32>
    %153 = tpu.matmul %152, %21, %cst_36 {dimension_numbers = #tpu.dot_dimension_numbers<[1], [0], [0], [1], [0, 0, 1, 1], [], []>} : vector<16x40xbf16>, vector<40x80xbf16>, vector<16x80xf32> -> vector<16x80xf32>
    %154 = vector.broadcast %3 : vector<1x80xf32> to vector<16x80xf32>
    %155 = arith.addf %153, %154 : vector<16x80xf32>
    %156 = arith.negf %155 : vector<16x80xf32>
    %157 = math.exp %156 : vector<16x80xf32>
    %cst_37 = arith.constant 1.000000e+00 : f32
    %158 = vector.broadcast %cst_37 : f32 to vector<16x80xf32>
    %159 = arith.addf %158, %157 : vector<16x80xf32>
    %160 = arith.divf %158, %159 : vector<16x80xf32>
    %161 = vector.extract_strided_slice %160 {offsets = [0, 0], sizes = [16, 20], strides = [1, 1]} : vector<16x80xf32> to vector<16x20xf32>
    %162 = vector.extract_strided_slice %160 {offsets = [0, 20], sizes = [16, 20], strides = [1, 1]} : vector<16x80xf32> to vector<16x20xf32>
    %163 = vector.extract_strided_slice %160 {offsets = [0, 60], sizes = [16, 20], strides = [1, 1]} : vector<16x80xf32> to vector<16x20xf32>
    %164 = vector.extract_strided_slice %155 {offsets = [0, 40], sizes = [16, 20], strides = [1, 1]} : vector<16x80xf32> to vector<16x20xf32>
    %165 = math.tanh %164 : vector<16x20xf32>
    %166 = arith.mulf %162, %88 : vector<16x20xf32>
    %167 = arith.mulf %161, %165 : vector<16x20xf32>
    %168 = arith.addf %166, %167 : vector<16x20xf32>
    %169 = math.tanh %168 : vector<16x20xf32>
    %170 = arith.mulf %163, %169 : vector<16x20xf32>
    %171 = tpu.concatenate %170, %110 in 1 : vector<16x20xf32>, vector<16x20xf32> -> vector<16x40xf32>
    %172 = arith.truncf %171 : vector<16x40xf32> to vector<16x40xbf16>
    %cst_38 = arith.constant dense<0.000000e+00> : vector<16x80xf32>
    %173 = tpu.matmul %172, %23, %cst_38 {dimension_numbers = #tpu.dot_dimension_numbers<[1], [0], [0], [1], [0, 0, 1, 1], [], []>} : vector<16x40xbf16>, vector<40x80xbf16>, vector<16x80xf32> -> vector<16x80xf32>
    %174 = vector.broadcast %4 : vector<1x80xf32> to vector<16x80xf32>
    %175 = arith.addf %173, %174 : vector<16x80xf32>
    %176 = arith.negf %175 : vector<16x80xf32>
    %177 = math.exp %176 : vector<16x80xf32>
    %cst_39 = arith.constant 1.000000e+00 : f32
    %178 = vector.broadcast %cst_39 : f32 to vector<16x80xf32>
    %179 = arith.addf %178, %177 : vector<16x80xf32>
    %180 = arith.divf %178, %179 : vector<16x80xf32>
    %181 = vector.extract_strided_slice %180 {offsets = [0, 0], sizes = [16, 20], strides = [1, 1]} : vector<16x80xf32> to vector<16x20xf32>
    %182 = vector.extract_strided_slice %180 {offsets = [0, 20], sizes = [16, 20], strides = [1, 1]} : vector<16x80xf32> to vector<16x20xf32>
    %183 = vector.extract_strided_slice %180 {offsets = [0, 60], sizes = [16, 20], strides = [1, 1]} : vector<16x80xf32> to vector<16x20xf32>
    %184 = vector.extract_strided_slice %175 {offsets = [0, 40], sizes = [16, 20], strides = [1, 1]} : vector<16x80xf32> to vector<16x20xf32>
    %185 = math.tanh %184 : vector<16x20xf32>
    %186 = arith.mulf %182, %108 : vector<16x20xf32>
    %187 = arith.mulf %181, %185 : vector<16x20xf32>
    %188 = arith.addf %186, %187 : vector<16x20xf32>
    %189 = math.tanh %188 : vector<16x20xf32>
    %190 = arith.mulf %183, %189 : vector<16x20xf32>
    %c16_40 = arith.constant 16 : index
    %c0_41 = arith.constant 0 : index
    %191 = vector.load %arg4[%c16_40, %c0_41] : memref<128x20xf32, #tpu.memory_space<vmem>>, vector<16x20xf32>
    tpu.vector_store %arg4[%c16_40, %c0_41], %190 {strides = array<i32>} : memref<128x20xf32, #tpu.memory_space<vmem>>, vector<16x20xf32>,
    %c32_42 = arith.constant 32 : index
    %c0_43 = arith.constant 0 : index
    %192 = vector.load %arg3[%c32_42, %c0_43] : memref<128x80xf32, #tpu.memory_space<vmem>>, vector<16x80xf32>
    %193 = arith.truncf %130 : vector<16x20xf32> to vector<16x20xbf16>
    %cst_44 = arith.constant dense<0.000000e+00> : vector<16x80xf32>
    %194 = tpu.matmul %193, %17, %cst_44 {dimension_numbers = #tpu.dot_dimension_numbers<[1], [0], [0], [1], [0, 0, 1, 1], [], []>} : vector<16x20xbf16>, vector<20x80xbf16>, vector<16x80xf32> -> vector<16x80xf32>
    %195 = arith.addf %192, %194 : vector<16x80xf32>
    %196 = arith.negf %195 : vector<16x80xf32>
    %197 = math.exp %196 : vector<16x80xf32>
    %cst_45 = arith.constant 1.000000e+00 : f32
    %198 = vector.broadcast %cst_45 : f32 to vector<16x80xf32>
    %199 = arith.addf %198, %197 : vector<16x80xf32>
    %200 = arith.divf %198, %199 : vector<16x80xf32>
    %201 = vector.extract_strided_slice %200 {offsets = [0, 0], sizes = [16, 20], strides = [1, 1]} : vector<16x80xf32> to vector<16x20xf32>
    %202 = vector.extract_strided_slice %200 {offsets = [0, 20], sizes = [16, 20], strides = [1, 1]} : vector<16x80xf32> to vector<16x20xf32>
    %203 = vector.extract_strided_slice %200 {offsets = [0, 60], sizes = [16, 20], strides = [1, 1]} : vector<16x80xf32> to vector<16x20xf32>
    %204 = vector.extract_strided_slice %195 {offsets = [0, 40], sizes = [16, 20], strides = [1, 1]} : vector<16x80xf32> to vector<16x20xf32>
    %205 = math.tanh %204 : vector<16x20xf32>
    %206 = arith.mulf %202, %128 : vector<16x20xf32>
    %207 = arith.mulf %201, %205 : vector<16x20xf32>
    %208 = arith.addf %206, %207 : vector<16x20xf32>
    %209 = math.tanh %208 : vector<16x20xf32>
    %210 = arith.mulf %203, %209 : vector<16x20xf32>
    %211 = tpu.concatenate %210, %150 in 1 : vector<16x20xf32>, vector<16x20xf32> -> vector<16x40xf32>
    %212 = arith.truncf %211 : vector<16x40xf32> to vector<16x40xbf16>
    %cst_46 = arith.constant dense<0.000000e+00> : vector<16x80xf32>
    %213 = tpu.matmul %212, %19, %cst_46 {dimension_numbers = #tpu.dot_dimension_numbers<[1], [0], [0], [1], [0, 0, 1, 1], [], []>} : vector<16x40xbf16>, vector<40x80xbf16>, vector<16x80xf32> -> vector<16x80xf32>
    %214 = vector.broadcast %2 : vector<1x80xf32> to vector<16x80xf32>
    %215 = arith.addf %213, %214 : vector<16x80xf32>
    %216 = arith.negf %215 : vector<16x80xf32>
    %217 = math.exp %216 : vector<16x80xf32>
    %cst_47 = arith.constant 1.000000e+00 : f32
    %218 = vector.broadcast %cst_47 : f32 to vector<16x80xf32>
    %219 = arith.addf %218, %217 : vector<16x80xf32>
    %220 = arith.divf %218, %219 : vector<16x80xf32>
    %221 = vector.extract_strided_slice %220 {offsets = [0, 0], sizes = [16, 20], strides = [1, 1]} : vector<16x80xf32> to vector<16x20xf32>
    %222 = vector.extract_strided_slice %220 {offsets = [0, 20], sizes = [16, 20], strides = [1, 1]} : vector<16x80xf32> to vector<16x20xf32>
    %223 = vector.extract_strided_slice %220 {offsets = [0, 60], sizes = [16, 20], strides = [1, 1]} : vector<16x80xf32> to vector<16x20xf32>
    %224 = vector.extract_strided_slice %215 {offsets = [0, 40], sizes = [16, 20], strides = [1, 1]} : vector<16x80xf32> to vector<16x20xf32>
    %225 = math.tanh %224 : vector<16x20xf32>
    %226 = arith.mulf %222, %148 : vector<16x20xf32>
    %227 = arith.mulf %221, %225 : vector<16x20xf32>
    %228 = arith.addf %226, %227 : vector<16x20xf32>
    %229 = math.tanh %228 : vector<16x20xf32>
    %230 = arith.mulf %223, %229 : vector<16x20xf32>
    %231 = tpu.concatenate %230, %170 in 1 : vector<16x20xf32>, vector<16x20xf32> -> vector<16x40xf32>
    %232 = arith.truncf %231 : vector<16x40xf32> to vector<16x40xbf16>
    %cst_48 = arith.constant dense<0.000000e+00> : vector<16x80xf32>
    %233 = tpu.matmul %232, %21, %cst_48 {dimension_numbers = #tpu.dot_dimension_numbers<[1], [0], [0], [1], [0, 0, 1, 1], [], []>} : vector<16x40xbf16>, vector<40x80xbf16>, vector<16x80xf32> -> vector<16x80xf32>
    %234 = vector.broadcast %3 : vector<1x80xf32> to vector<16x80xf32>
    %235 = arith.addf %233, %234 : vector<16x80xf32>
    %236 = arith.negf %235 : vector<16x80xf32>
    %237 = math.exp %236 : vector<16x80xf32>
    %cst_49 = arith.constant 1.000000e+00 : f32
    %238 = vector.broadcast %cst_49 : f32 to vector<16x80xf32>
    %239 = arith.addf %238, %237 : vector<16x80xf32>
    %240 = arith.divf %238, %239 : vector<16x80xf32>
    %241 = vector.extract_strided_slice %240 {offsets = [0, 0], sizes = [16, 20], strides = [1, 1]} : vector<16x80xf32> to vector<16x20xf32>
    %242 = vector.extract_strided_slice %240 {offsets = [0, 20], sizes = [16, 20], strides = [1, 1]} : vector<16x80xf32> to vector<16x20xf32>
    %243 = vector.extract_strided_slice %240 {offsets = [0, 60], sizes = [16, 20], strides = [1, 1]} : vector<16x80xf32> to vector<16x20xf32>
    %244 = vector.extract_strided_slice %235 {offsets = [0, 40], sizes = [16, 20], strides = [1, 1]} : vector<16x80xf32> to vector<16x20xf32>
    %245 = math.tanh %244 : vector<16x20xf32>
    %246 = arith.mulf %242, %168 : vector<16x20xf32>
    %247 = arith.mulf %241, %245 : vector<16x20xf32>
    %248 = arith.addf %246, %247 : vector<16x20xf32>
    %249 = math.tanh %248 : vector<16x20xf32>
    %250 = arith.mulf %243, %249 : vector<16x20xf32>
    %251 = tpu.concatenate %250, %190 in 1 : vector<16x20xf32>, vector<16x20xf32> -> vector<16x40xf32>
    %252 = arith.truncf %251 : vector<16x40xf32> to vector<16x40xbf16>
    %cst_50 = arith.constant dense<0.000000e+00> : vector<16x80xf32>
    %253 = tpu.matmul %252, %23, %cst_50 {dimension_numbers = #tpu.dot_dimension_numbers<[1], [0], [0], [1], [0, 0, 1, 1], [], []>} : vector<16x40xbf16>, vector<40x80xbf16>, vector<16x80xf32> -> vector<16x80xf32>
    %254 = vector.broadcast %4 : vector<1x80xf32> to vector<16x80xf32>
    %255 = arith.addf %253, %254 : vector<16x80xf32>
    %256 = arith.negf %255 : vector<16x80xf32>
    %257 = math.exp %256 : vector<16x80xf32>
    %cst_51 = arith.constant 1.000000e+00 : f32
    %258 = vector.broadcast %cst_51 : f32 to vector<16x80xf32>
    %259 = arith.addf %258, %257 : vector<16x80xf32>
    %260 = arith.divf %258, %259 : vector<16x80xf32>
    %261 = vector.extract_strided_slice %260 {offsets = [0, 0], sizes = [16, 20], strides = [1, 1]} : vector<16x80xf32> to vector<16x20xf32>
    %262 = vector.extract_strided_slice %260 {offsets = [0, 20], sizes = [16, 20], strides = [1, 1]} : vector<16x80xf32> to vector<16x20xf32>
    %263 = vector.extract_strided_slice %260 {offsets = [0, 60], sizes = [16, 20], strides = [1, 1]} : vector<16x80xf32> to vector<16x20xf32>
    %264 = vector.extract_strided_slice %255 {offsets = [0, 40], sizes = [16, 20], strides = [1, 1]} : vector<16x80xf32> to vector<16x20xf32>
    %265 = math.tanh %264 : vector<16x20xf32>
    %266 = arith.mulf %262, %188 : vector<16x20xf32>
    %267 = arith.mulf %261, %265 : vector<16x20xf32>
    %268 = arith.addf %266, %267 : vector<16x20xf32>
    %269 = math.tanh %268 : vector<16x20xf32>
    %270 = arith.mulf %263, %269 : vector<16x20xf32>
    %c32_52 = arith.constant 32 : index
    %c0_53 = arith.constant 0 : index
    %271 = vector.load %arg4[%c32_52, %c0_53] : memref<128x20xf32, #tpu.memory_space<vmem>>, vector<16x20xf32>
    tpu.vector_store %arg4[%c32_52, %c0_53], %270 {strides = array<i32>} : memref<128x20xf32, #tpu.memory_space<vmem>>, vector<16x20xf32>,
    %c48 = arith.constant 48 : index
    %c0_54 = arith.constant 0 : index
    %272 = vector.load %arg3[%c48, %c0_54] : memref<128x80xf32, #tpu.memory_space<vmem>>, vector<16x80xf32>
    %273 = arith.truncf %210 : vector<16x20xf32> to vector<16x20xbf16>
    %cst_55 = arith.constant dense<0.000000e+00> : vector<16x80xf32>
    %274 = tpu.matmul %273, %17, %cst_55 {dimension_numbers = #tpu.dot_dimension_numbers<[1], [0], [0], [1], [0, 0, 1, 1], [], []>} : vector<16x20xbf16>, vector<20x80xbf16>, vector<16x80xf32> -> vector<16x80xf32>
    %275 = arith.addf %272, %274 : vector<16x80xf32>
    %276 = arith.negf %275 : vector<16x80xf32>
    %277 = math.exp %276 : vector<16x80xf32>
    %cst_56 = arith.constant 1.000000e+00 : f32
    %278 = vector.broadcast %cst_56 : f32 to vector<16x80xf32>
    %279 = arith.addf %278, %277 : vector<16x80xf32>
    %280 = arith.divf %278, %279 : vector<16x80xf32>
    %281 = vector.extract_strided_slice %280 {offsets = [0, 0], sizes = [16, 20], strides = [1, 1]} : vector<16x80xf32> to vector<16x20xf32>
    %282 = vector.extract_strided_slice %280 {offsets = [0, 20], sizes = [16, 20], strides = [1, 1]} : vector<16x80xf32> to vector<16x20xf32>
    %283 = vector.extract_strided_slice %280 {offsets = [0, 60], sizes = [16, 20], strides = [1, 1]} : vector<16x80xf32> to vector<16x20xf32>
    %284 = vector.extract_strided_slice %275 {offsets = [0, 40], sizes = [16, 20], strides = [1, 1]} : vector<16x80xf32> to vector<16x20xf32>
    %285 = math.tanh %284 : vector<16x20xf32>
    %286 = arith.mulf %282, %208 : vector<16x20xf32>
    %287 = arith.mulf %281, %285 : vector<16x20xf32>
    %288 = arith.addf %286, %287 : vector<16x20xf32>
    %289 = math.tanh %288 : vector<16x20xf32>
    %290 = arith.mulf %283, %289 : vector<16x20xf32>
    %291 = tpu.concatenate %290, %230 in 1 : vector<16x20xf32>, vector<16x20xf32> -> vector<16x40xf32>
    %292 = arith.truncf %291 : vector<16x40xf32> to vector<16x40xbf16>
    %cst_57 = arith.constant dense<0.000000e+00> : vector<16x80xf32>
    %293 = tpu.matmul %292, %19, %cst_57 {dimension_numbers = #tpu.dot_dimension_numbers<[1], [0], [0], [1], [0, 0, 1, 1], [], []>} : vector<16x40xbf16>, vector<40x80xbf16>, vector<16x80xf32> -> vector<16x80xf32>
    %294 = vector.broadcast %2 : vector<1x80xf32> to vector<16x80xf32>
    %295 = arith.addf %293, %294 : vector<16x80xf32>
    %296 = arith.negf %295 : vector<16x80xf32>
    %297 = math.exp %296 : vector<16x80xf32>
    %cst_58 = arith.constant 1.000000e+00 : f32
    %298 = vector.broadcast %cst_58 : f32 to vector<16x80xf32>
    %299 = arith.addf %298, %297 : vector<16x80xf32>
    %300 = arith.divf %298, %299 : vector<16x80xf32>
    %301 = vector.extract_strided_slice %300 {offsets = [0, 0], sizes = [16, 20], strides = [1, 1]} : vector<16x80xf32> to vector<16x20xf32>
    %302 = vector.extract_strided_slice %300 {offsets = [0, 20], sizes = [16, 20], strides = [1, 1]} : vector<16x80xf32> to vector<16x20xf32>
    %303 = vector.extract_strided_slice %300 {offsets = [0, 60], sizes = [16, 20], strides = [1, 1]} : vector<16x80xf32> to vector<16x20xf32>
    %304 = vector.extract_strided_slice %295 {offsets = [0, 40], sizes = [16, 20], strides = [1, 1]} : vector<16x80xf32> to vector<16x20xf32>
    %305 = math.tanh %304 : vector<16x20xf32>
    %306 = arith.mulf %302, %228 : vector<16x20xf32>
    %307 = arith.mulf %301, %305 : vector<16x20xf32>
    %308 = arith.addf %306, %307 : vector<16x20xf32>
    %309 = math.tanh %308 : vector<16x20xf32>
    %310 = arith.mulf %303, %309 : vector<16x20xf32>
    %311 = tpu.concatenate %310, %250 in 1 : vector<16x20xf32>, vector<16x20xf32> -> vector<16x40xf32>
    %312 = arith.truncf %311 : vector<16x40xf32> to vector<16x40xbf16>
    %cst_59 = arith.constant dense<0.000000e+00> : vector<16x80xf32>
    %313 = tpu.matmul %312, %21, %cst_59 {dimension_numbers = #tpu.dot_dimension_numbers<[1], [0], [0], [1], [0, 0, 1, 1], [], []>} : vector<16x40xbf16>, vector<40x80xbf16>, vector<16x80xf32> -> vector<16x80xf32>
    %314 = vector.broadcast %3 : vector<1x80xf32> to vector<16x80xf32>
    %315 = arith.addf %313, %314 : vector<16x80xf32>
    %316 = arith.negf %315 : vector<16x80xf32>
    %317 = math.exp %316 : vector<16x80xf32>
    %cst_60 = arith.constant 1.000000e+00 : f32
    %318 = vector.broadcast %cst_60 : f32 to vector<16x80xf32>
    %319 = arith.addf %318, %317 : vector<16x80xf32>
    %320 = arith.divf %318, %319 : vector<16x80xf32>
    %321 = vector.extract_strided_slice %320 {offsets = [0, 0], sizes = [16, 20], strides = [1, 1]} : vector<16x80xf32> to vector<16x20xf32>
    %322 = vector.extract_strided_slice %320 {offsets = [0, 20], sizes = [16, 20], strides = [1, 1]} : vector<16x80xf32> to vector<16x20xf32>
    %323 = vector.extract_strided_slice %320 {offsets = [0, 60], sizes = [16, 20], strides = [1, 1]} : vector<16x80xf32> to vector<16x20xf32>
    %324 = vector.extract_strided_slice %315 {offsets = [0, 40], sizes = [16, 20], strides = [1, 1]} : vector<16x80xf32> to vector<16x20xf32>
    %325 = math.tanh %324 : vector<16x20xf32>
    %326 = arith.mulf %322, %248 : vector<16x20xf32>
    %327 = arith.mulf %321, %325 : vector<16x20xf32>
    %328 = arith.addf %326, %327 : vector<16x20xf32>
    %329 = math.tanh %328 : vector<16x20xf32>
    %330 = arith.mulf %323, %329 : vector<16x20xf32>
    %331 = tpu.concatenate %330, %270 in 1 : vector<16x20xf32>, vector<16x20xf32> -> vector<16x40xf32>
    %332 = arith.truncf %331 : vector<16x40xf32> to vector<16x40xbf16>
    %cst_61 = arith.constant dense<0.000000e+00> : vector<16x80xf32>
    %333 = tpu.matmul %332, %23, %cst_61 {dimension_numbers = #tpu.dot_dimension_numbers<[1], [0], [0], [1], [0, 0, 1, 1], [], []>} : vector<16x40xbf16>, vector<40x80xbf16>, vector<16x80xf32> -> vector<16x80xf32>
    %334 = vector.broadcast %4 : vector<1x80xf32> to vector<16x80xf32>
    %335 = arith.addf %333, %334 : vector<16x80xf32>
    %336 = arith.negf %335 : vector<16x80xf32>
    %337 = math.exp %336 : vector<16x80xf32>
    %cst_62 = arith.constant 1.000000e+00 : f32
    %338 = vector.broadcast %cst_62 : f32 to vector<16x80xf32>
    %339 = arith.addf %338, %337 : vector<16x80xf32>
    %340 = arith.divf %338, %339 : vector<16x80xf32>
    %341 = vector.extract_strided_slice %340 {offsets = [0, 0], sizes = [16, 20], strides = [1, 1]} : vector<16x80xf32> to vector<16x20xf32>
    %342 = vector.extract_strided_slice %340 {offsets = [0, 20], sizes = [16, 20], strides = [1, 1]} : vector<16x80xf32> to vector<16x20xf32>
    %343 = vector.extract_strided_slice %340 {offsets = [0, 60], sizes = [16, 20], strides = [1, 1]} : vector<16x80xf32> to vector<16x20xf32>
    %344 = vector.extract_strided_slice %335 {offsets = [0, 40], sizes = [16, 20], strides = [1, 1]} : vector<16x80xf32> to vector<16x20xf32>
    %345 = math.tanh %344 : vector<16x20xf32>
    %346 = arith.mulf %342, %268 : vector<16x20xf32>
    %347 = arith.mulf %341, %345 : vector<16x20xf32>
    %348 = arith.addf %346, %347 : vector<16x20xf32>
    %349 = math.tanh %348 : vector<16x20xf32>
    %350 = arith.mulf %343, %349 : vector<16x20xf32>
    %c48_63 = arith.constant 48 : index
    %c0_64 = arith.constant 0 : index
    %351 = vector.load %arg4[%c48_63, %c0_64] : memref<128x20xf32, #tpu.memory_space<vmem>>, vector<16x20xf32>
    tpu.vector_store %arg4[%c48_63, %c0_64], %350 {strides = array<i32>} : memref<128x20xf32, #tpu.memory_space<vmem>>, vector<16x20xf32>,
    %c64 = arith.constant 64 : index
    %c0_65 = arith.constant 0 : index
    %352 = vector.load %arg3[%c64, %c0_65] : memref<128x80xf32, #tpu.memory_space<vmem>>, vector<16x80xf32>
    %353 = arith.truncf %290 : vector<16x20xf32> to vector<16x20xbf16>
    %cst_66 = arith.constant dense<0.000000e+00> : vector<16x80xf32>
    %354 = tpu.matmul %353, %17, %cst_66 {dimension_numbers = #tpu.dot_dimension_numbers<[1], [0], [0], [1], [0, 0, 1, 1], [], []>} : vector<16x20xbf16>, vector<20x80xbf16>, vector<16x80xf32> -> vector<16x80xf32>
    %355 = arith.addf %352, %354 : vector<16x80xf32>
    %356 = arith.negf %355 : vector<16x80xf32>
    %357 = math.exp %356 : vector<16x80xf32>
    %cst_67 = arith.constant 1.000000e+00 : f32
    %358 = vector.broadcast %cst_67 : f32 to vector<16x80xf32>
    %359 = arith.addf %358, %357 : vector<16x80xf32>
    %360 = arith.divf %358, %359 : vector<16x80xf32>
    %361 = vector.extract_strided_slice %360 {offsets = [0, 0], sizes = [16, 20], strides = [1, 1]} : vector<16x80xf32> to vector<16x20xf32>
    %362 = vector.extract_strided_slice %360 {offsets = [0, 20], sizes = [16, 20], strides = [1, 1]} : vector<16x80xf32> to vector<16x20xf32>
    %363 = vector.extract_strided_slice %360 {offsets = [0, 60], sizes = [16, 20], strides = [1, 1]} : vector<16x80xf32> to vector<16x20xf32>
    %364 = vector.extract_strided_slice %355 {offsets = [0, 40], sizes = [16, 20], strides = [1, 1]} : vector<16x80xf32> to vector<16x20xf32>
    %365 = math.tanh %364 : vector<16x20xf32>
    %366 = arith.mulf %362, %288 : vector<16x20xf32>
    %367 = arith.mulf %361, %365 : vector<16x20xf32>
    %368 = arith.addf %366, %367 : vector<16x20xf32>
    %369 = math.tanh %368 : vector<16x20xf32>
    %370 = arith.mulf %363, %369 : vector<16x20xf32>
    %371 = tpu.concatenate %370, %310 in 1 : vector<16x20xf32>, vector<16x20xf32> -> vector<16x40xf32>
    %372 = arith.truncf %371 : vector<16x40xf32> to vector<16x40xbf16>
    %cst_68 = arith.constant dense<0.000000e+00> : vector<16x80xf32>
    %373 = tpu.matmul %372, %19, %cst_68 {dimension_numbers = #tpu.dot_dimension_numbers<[1], [0], [0], [1], [0, 0, 1, 1], [], []>} : vector<16x40xbf16>, vector<40x80xbf16>, vector<16x80xf32> -> vector<16x80xf32>
    %374 = vector.broadcast %2 : vector<1x80xf32> to vector<16x80xf32>
    %375 = arith.addf %373, %374 : vector<16x80xf32>
    %376 = arith.negf %375 : vector<16x80xf32>
    %377 = math.exp %376 : vector<16x80xf32>
    %cst_69 = arith.constant 1.000000e+00 : f32
    %378 = vector.broadcast %cst_69 : f32 to vector<16x80xf32>
    %379 = arith.addf %378, %377 : vector<16x80xf32>
    %380 = arith.divf %378, %379 : vector<16x80xf32>
    %381 = vector.extract_strided_slice %380 {offsets = [0, 0], sizes = [16, 20], strides = [1, 1]} : vector<16x80xf32> to vector<16x20xf32>
    %382 = vector.extract_strided_slice %380 {offsets = [0, 20], sizes = [16, 20], strides = [1, 1]} : vector<16x80xf32> to vector<16x20xf32>
    %383 = vector.extract_strided_slice %380 {offsets = [0, 60], sizes = [16, 20], strides = [1, 1]} : vector<16x80xf32> to vector<16x20xf32>
    %384 = vector.extract_strided_slice %375 {offsets = [0, 40], sizes = [16, 20], strides = [1, 1]} : vector<16x80xf32> to vector<16x20xf32>
    %385 = math.tanh %384 : vector<16x20xf32>
    %386 = arith.mulf %382, %308 : vector<16x20xf32>
    %387 = arith.mulf %381, %385 : vector<16x20xf32>
    %388 = arith.addf %386, %387 : vector<16x20xf32>
    %389 = math.tanh %388 : vector<16x20xf32>
    %390 = arith.mulf %383, %389 : vector<16x20xf32>
    %391 = tpu.concatenate %390, %330 in 1 : vector<16x20xf32>, vector<16x20xf32> -> vector<16x40xf32>
    %392 = arith.truncf %391 : vector<16x40xf32> to vector<16x40xbf16>
    %cst_70 = arith.constant dense<0.000000e+00> : vector<16x80xf32>
    %393 = tpu.matmul %392, %21, %cst_70 {dimension_numbers = #tpu.dot_dimension_numbers<[1], [0], [0], [1], [0, 0, 1, 1], [], []>} : vector<16x40xbf16>, vector<40x80xbf16>, vector<16x80xf32> -> vector<16x80xf32>
    %394 = vector.broadcast %3 : vector<1x80xf32> to vector<16x80xf32>
    %395 = arith.addf %393, %394 : vector<16x80xf32>
    %396 = arith.negf %395 : vector<16x80xf32>
    %397 = math.exp %396 : vector<16x80xf32>
    %cst_71 = arith.constant 1.000000e+00 : f32
    %398 = vector.broadcast %cst_71 : f32 to vector<16x80xf32>
    %399 = arith.addf %398, %397 : vector<16x80xf32>
    %400 = arith.divf %398, %399 : vector<16x80xf32>
    %401 = vector.extract_strided_slice %400 {offsets = [0, 0], sizes = [16, 20], strides = [1, 1]} : vector<16x80xf32> to vector<16x20xf32>
    %402 = vector.extract_strided_slice %400 {offsets = [0, 20], sizes = [16, 20], strides = [1, 1]} : vector<16x80xf32> to vector<16x20xf32>
    %403 = vector.extract_strided_slice %400 {offsets = [0, 60], sizes = [16, 20], strides = [1, 1]} : vector<16x80xf32> to vector<16x20xf32>
    %404 = vector.extract_strided_slice %395 {offsets = [0, 40], sizes = [16, 20], strides = [1, 1]} : vector<16x80xf32> to vector<16x20xf32>
    %405 = math.tanh %404 : vector<16x20xf32>
    %406 = arith.mulf %402, %328 : vector<16x20xf32>
    %407 = arith.mulf %401, %405 : vector<16x20xf32>
    %408 = arith.addf %406, %407 : vector<16x20xf32>
    %409 = math.tanh %408 : vector<16x20xf32>
    %410 = arith.mulf %403, %409 : vector<16x20xf32>
    %411 = tpu.concatenate %410, %350 in 1 : vector<16x20xf32>, vector<16x20xf32> -> vector<16x40xf32>
    %412 = arith.truncf %411 : vector<16x40xf32> to vector<16x40xbf16>
    %cst_72 = arith.constant dense<0.000000e+00> : vector<16x80xf32>
    %413 = tpu.matmul %412, %23, %cst_72 {dimension_numbers = #tpu.dot_dimension_numbers<[1], [0], [0], [1], [0, 0, 1, 1], [], []>} : vector<16x40xbf16>, vector<40x80xbf16>, vector<16x80xf32> -> vector<16x80xf32>
    %414 = vector.broadcast %4 : vector<1x80xf32> to vector<16x80xf32>
    %415 = arith.addf %413, %414 : vector<16x80xf32>
    %416 = arith.negf %415 : vector<16x80xf32>
    %417 = math.exp %416 : vector<16x80xf32>
    %cst_73 = arith.constant 1.000000e+00 : f32
    %418 = vector.broadcast %cst_73 : f32 to vector<16x80xf32>
    %419 = arith.addf %418, %417 : vector<16x80xf32>
    %420 = arith.divf %418, %419 : vector<16x80xf32>
    %421 = vector.extract_strided_slice %420 {offsets = [0, 0], sizes = [16, 20], strides = [1, 1]} : vector<16x80xf32> to vector<16x20xf32>
    %422 = vector.extract_strided_slice %420 {offsets = [0, 20], sizes = [16, 20], strides = [1, 1]} : vector<16x80xf32> to vector<16x20xf32>
    %423 = vector.extract_strided_slice %420 {offsets = [0, 60], sizes = [16, 20], strides = [1, 1]} : vector<16x80xf32> to vector<16x20xf32>
    %424 = vector.extract_strided_slice %415 {offsets = [0, 40], sizes = [16, 20], strides = [1, 1]} : vector<16x80xf32> to vector<16x20xf32>
    %425 = math.tanh %424 : vector<16x20xf32>
    %426 = arith.mulf %422, %348 : vector<16x20xf32>
    %427 = arith.mulf %421, %425 : vector<16x20xf32>
    %428 = arith.addf %426, %427 : vector<16x20xf32>
    %429 = math.tanh %428 : vector<16x20xf32>
    %430 = arith.mulf %423, %429 : vector<16x20xf32>
    %c64_74 = arith.constant 64 : index
    %c0_75 = arith.constant 0 : index
    %431 = vector.load %arg4[%c64_74, %c0_75] : memref<128x20xf32, #tpu.memory_space<vmem>>, vector<16x20xf32>
    tpu.vector_store %arg4[%c64_74, %c0_75], %430 {strides = array<i32>} : memref<128x20xf32, #tpu.memory_space<vmem>>, vector<16x20xf32>,
    %c80 = arith.constant 80 : index
    %c0_76 = arith.constant 0 : index
    %432 = vector.load %arg3[%c80, %c0_76] : memref<128x80xf32, #tpu.memory_space<vmem>>, vector<16x80xf32>
    %433 = arith.truncf %370 : vector<16x20xf32> to vector<16x20xbf16>
    %cst_77 = arith.constant dense<0.000000e+00> : vector<16x80xf32>
    %434 = tpu.matmul %433, %17, %cst_77 {dimension_numbers = #tpu.dot_dimension_numbers<[1], [0], [0], [1], [0, 0, 1, 1], [], []>} : vector<16x20xbf16>, vector<20x80xbf16>, vector<16x80xf32> -> vector<16x80xf32>
    %435 = arith.addf %432, %434 : vector<16x80xf32>
    %436 = arith.negf %435 : vector<16x80xf32>
    %437 = math.exp %436 : vector<16x80xf32>
    %cst_78 = arith.constant 1.000000e+00 : f32
    %438 = vector.broadcast %cst_78 : f32 to vector<16x80xf32>
    %439 = arith.addf %438, %437 : vector<16x80xf32>
    %440 = arith.divf %438, %439 : vector<16x80xf32>
    %441 = vector.extract_strided_slice %440 {offsets = [0, 0], sizes = [16, 20], strides = [1, 1]} : vector<16x80xf32> to vector<16x20xf32>
    %442 = vector.extract_strided_slice %440 {offsets = [0, 20], sizes = [16, 20], strides = [1, 1]} : vector<16x80xf32> to vector<16x20xf32>
    %443 = vector.extract_strided_slice %440 {offsets = [0, 60], sizes = [16, 20], strides = [1, 1]} : vector<16x80xf32> to vector<16x20xf32>
    %444 = vector.extract_strided_slice %435 {offsets = [0, 40], sizes = [16, 20], strides = [1, 1]} : vector<16x80xf32> to vector<16x20xf32>
    %445 = math.tanh %444 : vector<16x20xf32>
    %446 = arith.mulf %442, %368 : vector<16x20xf32>
    %447 = arith.mulf %441, %445 : vector<16x20xf32>
    %448 = arith.addf %446, %447 : vector<16x20xf32>
    %449 = math.tanh %448 : vector<16x20xf32>
    %450 = arith.mulf %443, %449 : vector<16x20xf32>
    %451 = tpu.concatenate %450, %390 in 1 : vector<16x20xf32>, vector<16x20xf32> -> vector<16x40xf32>
    %452 = arith.truncf %451 : vector<16x40xf32> to vector<16x40xbf16>
    %cst_79 = arith.constant dense<0.000000e+00> : vector<16x80xf32>
    %453 = tpu.matmul %452, %19, %cst_79 {dimension_numbers = #tpu.dot_dimension_numbers<[1], [0], [0], [1], [0, 0, 1, 1], [], []>} : vector<16x40xbf16>, vector<40x80xbf16>, vector<16x80xf32> -> vector<16x80xf32>
    %454 = vector.broadcast %2 : vector<1x80xf32> to vector<16x80xf32>
    %455 = arith.addf %453, %454 : vector<16x80xf32>
    %456 = arith.negf %455 : vector<16x80xf32>
    %457 = math.exp %456 : vector<16x80xf32>
    %cst_80 = arith.constant 1.000000e+00 : f32
    %458 = vector.broadcast %cst_80 : f32 to vector<16x80xf32>
    %459 = arith.addf %458, %457 : vector<16x80xf32>
    %460 = arith.divf %458, %459 : vector<16x80xf32>
    %461 = vector.extract_strided_slice %460 {offsets = [0, 0], sizes = [16, 20], strides = [1, 1]} : vector<16x80xf32> to vector<16x20xf32>
    %462 = vector.extract_strided_slice %460 {offsets = [0, 20], sizes = [16, 20], strides = [1, 1]} : vector<16x80xf32> to vector<16x20xf32>
    %463 = vector.extract_strided_slice %460 {offsets = [0, 60], sizes = [16, 20], strides = [1, 1]} : vector<16x80xf32> to vector<16x20xf32>
    %464 = vector.extract_strided_slice %455 {offsets = [0, 40], sizes = [16, 20], strides = [1, 1]} : vector<16x80xf32> to vector<16x20xf32>
    %465 = math.tanh %464 : vector<16x20xf32>
    %466 = arith.mulf %462, %388 : vector<16x20xf32>
    %467 = arith.mulf %461, %465 : vector<16x20xf32>
    %468 = arith.addf %466, %467 : vector<16x20xf32>
    %469 = math.tanh %468 : vector<16x20xf32>
    %470 = arith.mulf %463, %469 : vector<16x20xf32>
    %471 = tpu.concatenate %470, %410 in 1 : vector<16x20xf32>, vector<16x20xf32> -> vector<16x40xf32>
    %472 = arith.truncf %471 : vector<16x40xf32> to vector<16x40xbf16>
    %cst_81 = arith.constant dense<0.000000e+00> : vector<16x80xf32>
    %473 = tpu.matmul %472, %21, %cst_81 {dimension_numbers = #tpu.dot_dimension_numbers<[1], [0], [0], [1], [0, 0, 1, 1], [], []>} : vector<16x40xbf16>, vector<40x80xbf16>, vector<16x80xf32> -> vector<16x80xf32>
    %474 = vector.broadcast %3 : vector<1x80xf32> to vector<16x80xf32>
    %475 = arith.addf %473, %474 : vector<16x80xf32>
    %476 = arith.negf %475 : vector<16x80xf32>
    %477 = math.exp %476 : vector<16x80xf32>
    %cst_82 = arith.constant 1.000000e+00 : f32
    %478 = vector.broadcast %cst_82 : f32 to vector<16x80xf32>
    %479 = arith.addf %478, %477 : vector<16x80xf32>
    %480 = arith.divf %478, %479 : vector<16x80xf32>
    %481 = vector.extract_strided_slice %480 {offsets = [0, 0], sizes = [16, 20], strides = [1, 1]} : vector<16x80xf32> to vector<16x20xf32>
    %482 = vector.extract_strided_slice %480 {offsets = [0, 20], sizes = [16, 20], strides = [1, 1]} : vector<16x80xf32> to vector<16x20xf32>
    %483 = vector.extract_strided_slice %480 {offsets = [0, 60], sizes = [16, 20], strides = [1, 1]} : vector<16x80xf32> to vector<16x20xf32>
    %484 = vector.extract_strided_slice %475 {offsets = [0, 40], sizes = [16, 20], strides = [1, 1]} : vector<16x80xf32> to vector<16x20xf32>
    %485 = math.tanh %484 : vector<16x20xf32>
    %486 = arith.mulf %482, %408 : vector<16x20xf32>
    %487 = arith.mulf %481, %485 : vector<16x20xf32>
    %488 = arith.addf %486, %487 : vector<16x20xf32>
    %489 = math.tanh %488 : vector<16x20xf32>
    %490 = arith.mulf %483, %489 : vector<16x20xf32>
    %491 = tpu.concatenate %490, %430 in 1 : vector<16x20xf32>, vector<16x20xf32> -> vector<16x40xf32>
    %492 = arith.truncf %491 : vector<16x40xf32> to vector<16x40xbf16>
    %cst_83 = arith.constant dense<0.000000e+00> : vector<16x80xf32>
    %493 = tpu.matmul %492, %23, %cst_83 {dimension_numbers = #tpu.dot_dimension_numbers<[1], [0], [0], [1], [0, 0, 1, 1], [], []>} : vector<16x40xbf16>, vector<40x80xbf16>, vector<16x80xf32> -> vector<16x80xf32>
    %494 = vector.broadcast %4 : vector<1x80xf32> to vector<16x80xf32>
    %495 = arith.addf %493, %494 : vector<16x80xf32>
    %496 = arith.negf %495 : vector<16x80xf32>
    %497 = math.exp %496 : vector<16x80xf32>
    %cst_84 = arith.constant 1.000000e+00 : f32
    %498 = vector.broadcast %cst_84 : f32 to vector<16x80xf32>
    %499 = arith.addf %498, %497 : vector<16x80xf32>
    %500 = arith.divf %498, %499 : vector<16x80xf32>
    %501 = vector.extract_strided_slice %500 {offsets = [0, 0], sizes = [16, 20], strides = [1, 1]} : vector<16x80xf32> to vector<16x20xf32>
    %502 = vector.extract_strided_slice %500 {offsets = [0, 20], sizes = [16, 20], strides = [1, 1]} : vector<16x80xf32> to vector<16x20xf32>
    %503 = vector.extract_strided_slice %500 {offsets = [0, 60], sizes = [16, 20], strides = [1, 1]} : vector<16x80xf32> to vector<16x20xf32>
    %504 = vector.extract_strided_slice %495 {offsets = [0, 40], sizes = [16, 20], strides = [1, 1]} : vector<16x80xf32> to vector<16x20xf32>
    %505 = math.tanh %504 : vector<16x20xf32>
    %506 = arith.mulf %502, %428 : vector<16x20xf32>
    %507 = arith.mulf %501, %505 : vector<16x20xf32>
    %508 = arith.addf %506, %507 : vector<16x20xf32>
    %509 = math.tanh %508 : vector<16x20xf32>
    %510 = arith.mulf %503, %509 : vector<16x20xf32>
    %c80_85 = arith.constant 80 : index
    %c0_86 = arith.constant 0 : index
    %511 = vector.load %arg4[%c80_85, %c0_86] : memref<128x20xf32, #tpu.memory_space<vmem>>, vector<16x20xf32>
    tpu.vector_store %arg4[%c80_85, %c0_86], %510 {strides = array<i32>} : memref<128x20xf32, #tpu.memory_space<vmem>>, vector<16x20xf32>,
    %c96 = arith.constant 96 : index
    %c0_87 = arith.constant 0 : index
    %512 = vector.load %arg3[%c96, %c0_87] : memref<128x80xf32, #tpu.memory_space<vmem>>, vector<16x80xf32>
    %513 = arith.truncf %450 : vector<16x20xf32> to vector<16x20xbf16>
    %cst_88 = arith.constant dense<0.000000e+00> : vector<16x80xf32>
    %514 = tpu.matmul %513, %17, %cst_88 {dimension_numbers = #tpu.dot_dimension_numbers<[1], [0], [0], [1], [0, 0, 1, 1], [], []>} : vector<16x20xbf16>, vector<20x80xbf16>, vector<16x80xf32> -> vector<16x80xf32>
    %515 = arith.addf %512, %514 : vector<16x80xf32>
    %516 = arith.negf %515 : vector<16x80xf32>
    %517 = math.exp %516 : vector<16x80xf32>
    %cst_89 = arith.constant 1.000000e+00 : f32
    %518 = vector.broadcast %cst_89 : f32 to vector<16x80xf32>
    %519 = arith.addf %518, %517 : vector<16x80xf32>
    %520 = arith.divf %518, %519 : vector<16x80xf32>
    %521 = vector.extract_strided_slice %520 {offsets = [0, 0], sizes = [16, 20], strides = [1, 1]} : vector<16x80xf32> to vector<16x20xf32>
    %522 = vector.extract_strided_slice %520 {offsets = [0, 20], sizes = [16, 20], strides = [1, 1]} : vector<16x80xf32> to vector<16x20xf32>
    %523 = vector.extract_strided_slice %520 {offsets = [0, 60], sizes = [16, 20], strides = [1, 1]} : vector<16x80xf32> to vector<16x20xf32>
    %524 = vector.extract_strided_slice %515 {offsets = [0, 40], sizes = [16, 20], strides = [1, 1]} : vector<16x80xf32> to vector<16x20xf32>
    %525 = math.tanh %524 : vector<16x20xf32>
    %526 = arith.mulf %522, %448 : vector<16x20xf32>
    %527 = arith.mulf %521, %525 : vector<16x20xf32>
    %528 = arith.addf %526, %527 : vector<16x20xf32>
    %529 = math.tanh %528 : vector<16x20xf32>
    %530 = arith.mulf %523, %529 : vector<16x20xf32>
    %531 = tpu.concatenate %530, %470 in 1 : vector<16x20xf32>, vector<16x20xf32> -> vector<16x40xf32>
    %532 = arith.truncf %531 : vector<16x40xf32> to vector<16x40xbf16>
    %cst_90 = arith.constant dense<0.000000e+00> : vector<16x80xf32>
    %533 = tpu.matmul %532, %19, %cst_90 {dimension_numbers = #tpu.dot_dimension_numbers<[1], [0], [0], [1], [0, 0, 1, 1], [], []>} : vector<16x40xbf16>, vector<40x80xbf16>, vector<16x80xf32> -> vector<16x80xf32>
    %534 = vector.broadcast %2 : vector<1x80xf32> to vector<16x80xf32>
    %535 = arith.addf %533, %534 : vector<16x80xf32>
    %536 = arith.negf %535 : vector<16x80xf32>
    %537 = math.exp %536 : vector<16x80xf32>
    %cst_91 = arith.constant 1.000000e+00 : f32
    %538 = vector.broadcast %cst_91 : f32 to vector<16x80xf32>
    %539 = arith.addf %538, %537 : vector<16x80xf32>
    %540 = arith.divf %538, %539 : vector<16x80xf32>
    %541 = vector.extract_strided_slice %540 {offsets = [0, 0], sizes = [16, 20], strides = [1, 1]} : vector<16x80xf32> to vector<16x20xf32>
    %542 = vector.extract_strided_slice %540 {offsets = [0, 20], sizes = [16, 20], strides = [1, 1]} : vector<16x80xf32> to vector<16x20xf32>
    %543 = vector.extract_strided_slice %540 {offsets = [0, 60], sizes = [16, 20], strides = [1, 1]} : vector<16x80xf32> to vector<16x20xf32>
    %544 = vector.extract_strided_slice %535 {offsets = [0, 40], sizes = [16, 20], strides = [1, 1]} : vector<16x80xf32> to vector<16x20xf32>
    %545 = math.tanh %544 : vector<16x20xf32>
    %546 = arith.mulf %542, %468 : vector<16x20xf32>
    %547 = arith.mulf %541, %545 : vector<16x20xf32>
    %548 = arith.addf %546, %547 : vector<16x20xf32>
    %549 = math.tanh %548 : vector<16x20xf32>
    %550 = arith.mulf %543, %549 : vector<16x20xf32>
    %551 = tpu.concatenate %550, %490 in 1 : vector<16x20xf32>, vector<16x20xf32> -> vector<16x40xf32>
    %552 = arith.truncf %551 : vector<16x40xf32> to vector<16x40xbf16>
    %cst_92 = arith.constant dense<0.000000e+00> : vector<16x80xf32>
    %553 = tpu.matmul %552, %21, %cst_92 {dimension_numbers = #tpu.dot_dimension_numbers<[1], [0], [0], [1], [0, 0, 1, 1], [], []>} : vector<16x40xbf16>, vector<40x80xbf16>, vector<16x80xf32> -> vector<16x80xf32>
    %554 = vector.broadcast %3 : vector<1x80xf32> to vector<16x80xf32>
    %555 = arith.addf %553, %554 : vector<16x80xf32>
    %556 = arith.negf %555 : vector<16x80xf32>
    %557 = math.exp %556 : vector<16x80xf32>
    %cst_93 = arith.constant 1.000000e+00 : f32
    %558 = vector.broadcast %cst_93 : f32 to vector<16x80xf32>
    %559 = arith.addf %558, %557 : vector<16x80xf32>
    %560 = arith.divf %558, %559 : vector<16x80xf32>
    %561 = vector.extract_strided_slice %560 {offsets = [0, 0], sizes = [16, 20], strides = [1, 1]} : vector<16x80xf32> to vector<16x20xf32>
    %562 = vector.extract_strided_slice %560 {offsets = [0, 20], sizes = [16, 20], strides = [1, 1]} : vector<16x80xf32> to vector<16x20xf32>
    %563 = vector.extract_strided_slice %560 {offsets = [0, 60], sizes = [16, 20], strides = [1, 1]} : vector<16x80xf32> to vector<16x20xf32>
    %564 = vector.extract_strided_slice %555 {offsets = [0, 40], sizes = [16, 20], strides = [1, 1]} : vector<16x80xf32> to vector<16x20xf32>
    %565 = math.tanh %564 : vector<16x20xf32>
    %566 = arith.mulf %562, %488 : vector<16x20xf32>
    %567 = arith.mulf %561, %565 : vector<16x20xf32>
    %568 = arith.addf %566, %567 : vector<16x20xf32>
    %569 = math.tanh %568 : vector<16x20xf32>
    %570 = arith.mulf %563, %569 : vector<16x20xf32>
    %571 = tpu.concatenate %570, %510 in 1 : vector<16x20xf32>, vector<16x20xf32> -> vector<16x40xf32>
    %572 = arith.truncf %571 : vector<16x40xf32> to vector<16x40xbf16>
    %cst_94 = arith.constant dense<0.000000e+00> : vector<16x80xf32>
    %573 = tpu.matmul %572, %23, %cst_94 {dimension_numbers = #tpu.dot_dimension_numbers<[1], [0], [0], [1], [0, 0, 1, 1], [], []>} : vector<16x40xbf16>, vector<40x80xbf16>, vector<16x80xf32> -> vector<16x80xf32>
    %574 = vector.broadcast %4 : vector<1x80xf32> to vector<16x80xf32>
    %575 = arith.addf %573, %574 : vector<16x80xf32>
    %576 = arith.negf %575 : vector<16x80xf32>
    %577 = math.exp %576 : vector<16x80xf32>
    %cst_95 = arith.constant 1.000000e+00 : f32
    %578 = vector.broadcast %cst_95 : f32 to vector<16x80xf32>
    %579 = arith.addf %578, %577 : vector<16x80xf32>
    %580 = arith.divf %578, %579 : vector<16x80xf32>
    %581 = vector.extract_strided_slice %580 {offsets = [0, 0], sizes = [16, 20], strides = [1, 1]} : vector<16x80xf32> to vector<16x20xf32>
    %582 = vector.extract_strided_slice %580 {offsets = [0, 20], sizes = [16, 20], strides = [1, 1]} : vector<16x80xf32> to vector<16x20xf32>
    %583 = vector.extract_strided_slice %580 {offsets = [0, 60], sizes = [16, 20], strides = [1, 1]} : vector<16x80xf32> to vector<16x20xf32>
    %584 = vector.extract_strided_slice %575 {offsets = [0, 40], sizes = [16, 20], strides = [1, 1]} : vector<16x80xf32> to vector<16x20xf32>
    %585 = math.tanh %584 : vector<16x20xf32>
    %586 = arith.mulf %582, %508 : vector<16x20xf32>
    %587 = arith.mulf %581, %585 : vector<16x20xf32>
    %588 = arith.addf %586, %587 : vector<16x20xf32>
    %589 = math.tanh %588 : vector<16x20xf32>
    %590 = arith.mulf %583, %589 : vector<16x20xf32>
    %c96_96 = arith.constant 96 : index
    %c0_97 = arith.constant 0 : index
    %591 = vector.load %arg4[%c96_96, %c0_97] : memref<128x20xf32, #tpu.memory_space<vmem>>, vector<16x20xf32>
    tpu.vector_store %arg4[%c96_96, %c0_97], %590 {strides = array<i32>} : memref<128x20xf32, #tpu.memory_space<vmem>>, vector<16x20xf32>,
    %c112_98 = arith.constant 112 : index
    %c0_99 = arith.constant 0 : index
    %592 = vector.load %arg3[%c112_98, %c0_99] : memref<128x80xf32, #tpu.memory_space<vmem>>, vector<16x80xf32>
    %593 = arith.truncf %530 : vector<16x20xf32> to vector<16x20xbf16>
    %cst_100 = arith.constant dense<0.000000e+00> : vector<16x80xf32>
    %594 = tpu.matmul %593, %17, %cst_100 {dimension_numbers = #tpu.dot_dimension_numbers<[1], [0], [0], [1], [0, 0, 1, 1], [], []>} : vector<16x20xbf16>, vector<20x80xbf16>, vector<16x80xf32> -> vector<16x80xf32>
    %595 = arith.addf %592, %594 : vector<16x80xf32>
    %596 = arith.negf %595 : vector<16x80xf32>
    %597 = math.exp %596 : vector<16x80xf32>
    %cst_101 = arith.constant 1.000000e+00 : f32
    %598 = vector.broadcast %cst_101 : f32 to vector<16x80xf32>
    %599 = arith.addf %598, %597 : vector<16x80xf32>
    %600 = arith.divf %598, %599 : vector<16x80xf32>
    %601 = vector.extract_strided_slice %600 {offsets = [0, 0], sizes = [16, 20], strides = [1, 1]} : vector<16x80xf32> to vector<16x20xf32>
    %602 = vector.extract_strided_slice %600 {offsets = [0, 20], sizes = [16, 20], strides = [1, 1]} : vector<16x80xf32> to vector<16x20xf32>
    %603 = vector.extract_strided_slice %600 {offsets = [0, 60], sizes = [16, 20], strides = [1, 1]} : vector<16x80xf32> to vector<16x20xf32>
    %604 = vector.extract_strided_slice %595 {offsets = [0, 40], sizes = [16, 20], strides = [1, 1]} : vector<16x80xf32> to vector<16x20xf32>
    %605 = math.tanh %604 : vector<16x20xf32>
    %606 = arith.mulf %602, %528 : vector<16x20xf32>
    %607 = arith.mulf %601, %605 : vector<16x20xf32>
    %608 = arith.addf %606, %607 : vector<16x20xf32>
    %609 = math.tanh %608 : vector<16x20xf32>
    %610 = arith.mulf %603, %609 : vector<16x20xf32>
    %611 = tpu.concatenate %610, %550 in 1 : vector<16x20xf32>, vector<16x20xf32> -> vector<16x40xf32>
    %612 = arith.truncf %611 : vector<16x40xf32> to vector<16x40xbf16>
    %cst_102 = arith.constant dense<0.000000e+00> : vector<16x80xf32>
    %613 = tpu.matmul %612, %19, %cst_102 {dimension_numbers = #tpu.dot_dimension_numbers<[1], [0], [0], [1], [0, 0, 1, 1], [], []>} : vector<16x40xbf16>, vector<40x80xbf16>, vector<16x80xf32> -> vector<16x80xf32>
    %614 = vector.broadcast %2 : vector<1x80xf32> to vector<16x80xf32>
    %615 = arith.addf %613, %614 : vector<16x80xf32>
    %616 = arith.negf %615 : vector<16x80xf32>
    %617 = math.exp %616 : vector<16x80xf32>
    %cst_103 = arith.constant 1.000000e+00 : f32
    %618 = vector.broadcast %cst_103 : f32 to vector<16x80xf32>
    %619 = arith.addf %618, %617 : vector<16x80xf32>
    %620 = arith.divf %618, %619 : vector<16x80xf32>
    %621 = vector.extract_strided_slice %620 {offsets = [0, 0], sizes = [16, 20], strides = [1, 1]} : vector<16x80xf32> to vector<16x20xf32>
    %622 = vector.extract_strided_slice %620 {offsets = [0, 20], sizes = [16, 20], strides = [1, 1]} : vector<16x80xf32> to vector<16x20xf32>
    %623 = vector.extract_strided_slice %620 {offsets = [0, 60], sizes = [16, 20], strides = [1, 1]} : vector<16x80xf32> to vector<16x20xf32>
    %624 = vector.extract_strided_slice %615 {offsets = [0, 40], sizes = [16, 20], strides = [1, 1]} : vector<16x80xf32> to vector<16x20xf32>
    %625 = math.tanh %624 : vector<16x20xf32>
    %626 = arith.mulf %622, %548 : vector<16x20xf32>
    %627 = arith.mulf %621, %625 : vector<16x20xf32>
    %628 = arith.addf %626, %627 : vector<16x20xf32>
    %629 = math.tanh %628 : vector<16x20xf32>
    %630 = arith.mulf %623, %629 : vector<16x20xf32>
    %631 = tpu.concatenate %630, %570 in 1 : vector<16x20xf32>, vector<16x20xf32> -> vector<16x40xf32>
    %632 = arith.truncf %631 : vector<16x40xf32> to vector<16x40xbf16>
    %cst_104 = arith.constant dense<0.000000e+00> : vector<16x80xf32>
    %633 = tpu.matmul %632, %21, %cst_104 {dimension_numbers = #tpu.dot_dimension_numbers<[1], [0], [0], [1], [0, 0, 1, 1], [], []>} : vector<16x40xbf16>, vector<40x80xbf16>, vector<16x80xf32> -> vector<16x80xf32>
    %634 = vector.broadcast %3 : vector<1x80xf32> to vector<16x80xf32>
    %635 = arith.addf %633, %634 : vector<16x80xf32>
    %636 = arith.negf %635 : vector<16x80xf32>
    %637 = math.exp %636 : vector<16x80xf32>
    %cst_105 = arith.constant 1.000000e+00 : f32
    %638 = vector.broadcast %cst_105 : f32 to vector<16x80xf32>
    %639 = arith.addf %638, %637 : vector<16x80xf32>
    %640 = arith.divf %638, %639 : vector<16x80xf32>
    %641 = vector.extract_strided_slice %640 {offsets = [0, 0], sizes = [16, 20], strides = [1, 1]} : vector<16x80xf32> to vector<16x20xf32>
    %642 = vector.extract_strided_slice %640 {offsets = [0, 20], sizes = [16, 20], strides = [1, 1]} : vector<16x80xf32> to vector<16x20xf32>
    %643 = vector.extract_strided_slice %640 {offsets = [0, 60], sizes = [16, 20], strides = [1, 1]} : vector<16x80xf32> to vector<16x20xf32>
    %644 = vector.extract_strided_slice %635 {offsets = [0, 40], sizes = [16, 20], strides = [1, 1]} : vector<16x80xf32> to vector<16x20xf32>
    %645 = math.tanh %644 : vector<16x20xf32>
    %646 = arith.mulf %642, %568 : vector<16x20xf32>
    %647 = arith.mulf %641, %645 : vector<16x20xf32>
    %648 = arith.addf %646, %647 : vector<16x20xf32>
    %649 = math.tanh %648 : vector<16x20xf32>
    %650 = arith.mulf %643, %649 : vector<16x20xf32>
    %651 = tpu.concatenate %650, %590 in 1 : vector<16x20xf32>, vector<16x20xf32> -> vector<16x40xf32>
    %652 = arith.truncf %651 : vector<16x40xf32> to vector<16x40xbf16>
    %cst_106 = arith.constant dense<0.000000e+00> : vector<16x80xf32>
    %653 = tpu.matmul %652, %23, %cst_106 {dimension_numbers = #tpu.dot_dimension_numbers<[1], [0], [0], [1], [0, 0, 1, 1], [], []>} : vector<16x40xbf16>, vector<40x80xbf16>, vector<16x80xf32> -> vector<16x80xf32>
    %654 = vector.broadcast %4 : vector<1x80xf32> to vector<16x80xf32>
    %655 = arith.addf %653, %654 : vector<16x80xf32>
    %656 = arith.negf %655 : vector<16x80xf32>
    %657 = math.exp %656 : vector<16x80xf32>
    %cst_107 = arith.constant 1.000000e+00 : f32
    %658 = vector.broadcast %cst_107 : f32 to vector<16x80xf32>
    %659 = arith.addf %658, %657 : vector<16x80xf32>
    %660 = arith.divf %658, %659 : vector<16x80xf32>
    %661 = vector.extract_strided_slice %660 {offsets = [0, 0], sizes = [16, 20], strides = [1, 1]} : vector<16x80xf32> to vector<16x20xf32>
    %662 = vector.extract_strided_slice %660 {offsets = [0, 20], sizes = [16, 20], strides = [1, 1]} : vector<16x80xf32> to vector<16x20xf32>
    %663 = vector.extract_strided_slice %660 {offsets = [0, 60], sizes = [16, 20], strides = [1, 1]} : vector<16x80xf32> to vector<16x20xf32>
    %664 = vector.extract_strided_slice %655 {offsets = [0, 40], sizes = [16, 20], strides = [1, 1]} : vector<16x80xf32> to vector<16x20xf32>
    %665 = math.tanh %664 : vector<16x20xf32>
    %666 = arith.mulf %662, %588 : vector<16x20xf32>
    %667 = arith.mulf %661, %665 : vector<16x20xf32>
    %668 = arith.addf %666, %667 : vector<16x20xf32>
    %669 = math.tanh %668 : vector<16x20xf32>
    %670 = arith.mulf %663, %669 : vector<16x20xf32>
    %c112_108 = arith.constant 112 : index
    %c0_109 = arith.constant 0 : index
    %671 = vector.load %arg4[%c112_108, %c0_109] : memref<128x20xf32, #tpu.memory_space<vmem>>, vector<16x20xf32>
    tpu.vector_store %arg4[%c112_108, %c0_109], %670 {strides = array<i32>} : memref<128x20xf32, #tpu.memory_space<vmem>>, vector<16x20xf32>,
    %c160 = arith.constant 160 : index
    %c0_110 = arith.constant 0 : index
    %672 = vector.load %arg1[%c160, %c0_110] : memref<192x80xf32, #tpu.memory_space<vmem>>, vector<24x80xf32>
    %673 = vector.extract_strided_slice %672 {offsets = [0, 0], sizes = [20, 12], strides = [1, 1]} : vector<24x80xf32> to vector<20x12xf32>
    %674 = arith.truncf %673 : vector<20x12xf32> to vector<20x12xbf16>
    %c184 = arith.constant 184 : index
    %c0_111 = arith.constant 0 : index
    %675 = vector.load %arg1[%c184, %c0_111] : memref<192x80xf32, #tpu.memory_space<vmem>>, vector<8x80xf32>
    %676 = vector.extract_strided_slice %675 {offsets = [0, 0], sizes = [1, 4], strides = [1, 1]} : vector<8x80xf32> to vector<1x4xf32>
    %c0_112 = arith.constant 0 : index
    %c0_113 = arith.constant 0 : index
    %677 = vector.load %arg4[%c0_112, %c0_113] : memref<128x20xf32, #tpu.memory_space<vmem>>, vector<128x20xf32>
    %678 = arith.truncf %677 : vector<128x20xf32> to vector<128x20xbf16>
    %cst_114 = arith.constant dense<0.000000e+00> : vector<128x12xf32>
    %679 = tpu.matmul %678, %674, %cst_114 {dimension_numbers = #tpu.dot_dimension_numbers<[1], [0], [0], [1], [0, 0, 1, 1], [], []>} : vector<128x20xbf16>, vector<20x12xbf16>, vector<128x12xf32> -> vector<128x12xf32>
    %680 = vector.shape_cast %679 : vector<128x12xf32> to vector<8x16x12xf32>
    %681 = vector.shape_cast %676 : vector<1x4xf32> to vector<1x1x4xf32>
    %682 = vector.broadcast %681 : vector<1x1x4xf32> to vector<8x14x4xf32>
    %683 = vector.extract_strided_slice %680 {offsets = [0, 0, 0], sizes = [8, 14, 4], strides = [1, 1, 1]} : vector<8x16x12xf32> to vector<8x14x4xf32>
    %684 = arith.addf %682, %683 : vector<8x14x4xf32>
    %685 = vector.extract_strided_slice %680 {offsets = [0, 1, 4], sizes = [8, 14, 4], strides = [1, 1, 1]} : vector<8x16x12xf32> to vector<8x14x4xf32>
    %686 = arith.addf %684, %685 : vector<8x14x4xf32>
    %687 = vector.extract_strided_slice %680 {offsets = [0, 2, 8], sizes = [8, 14, 4], strides = [1, 1, 1]} : vector<8x16x12xf32> to vector<8x14x4xf32>
    %688 = arith.addf %686, %687 : vector<8x14x4xf32>
    %c0_115 = arith.constant 0 : index
    %c0_116 = arith.constant 0 : index
    %c0_117 = arith.constant 0 : index
    %689 = vector.load %arg2[%c0_115, %c0_116, %c0_117] : memref<8x14x4xf32, #tpu.memory_space<vmem>>, vector<8x14x4xf32>
    tpu.vector_store %arg2[%c0_115, %c0_116, %c0_117], %688 {strides = array<i32>} : memref<8x14x4xf32, #tpu.memory_space<vmem>>, vector<8x14x4xf32>,
    return
  }
}

</mosaic_0001>

<bundles_post_ra>
// kernel: tpu_custom_call.1
= control target key start
LH: loop header
LB: loop body
LE: loop exit
PB: predicated region body
PF: predicated region fallthrough
CT: control target
= control target key end

     0   :  { %vm68_vm0 = vcmask 1041408   ;;  %vm43_vm1 = vcmask 31744   ;;  %v5448_v20 = vmov 0.0   ;;  %vm5449_vm2 = vmmov 0   ;;  %s5451_s15 = smov 88   ;;  %s5452_s16 = smov 20   ;;  %s7072_s1 = inlined_call_operand.vmem [shape: f32[192,80], index: 1, kind: input, shape index: {}]   ;;  %s7073_s0 = inlined_call_operand.vmem [shape: f32[8,16,4], index: 0, kind: input, shape index: {}]   ;;  %s7074_s2 = inlined_call_operand.vmem [shape: f32[8,14,4], index: 2, kind: output, shape index: {}]  }
   0x1   :  { %v13_v0 = vld [vmem:[%s7072_s1] sm:$0xff]  ;;  %v24_v2 = vld [vmem:[%s7073_s0 + $0x48] sm:$0xff]  ;;  %v25_v5 = vld [vmem:[%s7073_s0 + $0x50] sm:$0xff]  ;;  %v5450_v28 = vmov 0   ;;  %v39_v29 = vlaneseq  ;;  %vm169_vm3 = vcmask 654336   ;;  %s5453_s25 = smov 40  }
   0x2   :  { %v23_v1 = vld [vmem:[%s7073_s0 + $0x40] sm:$0xff]  ;;  %v14_v3 = vpack.c.bf16 %v13_v0, %v13_v0  ;;  %v26_v6 = vld [vmem:[%s7073_s0 + $0x58] sm:$0xff]  ;;  %v186_v7 = vld [vmem:[%s7072_s1 + $0x8] sm:$0xff]  ;;  %vm334_vm4 = vcmask 1043456   ;;  %s5454_s28 = smov 68   ;;  %vm217_vm5 = vcmask 162816  }
   0x3   :  { %v35_v4 = vpack.c.bf16 %v24_v2, %v23_v1  ;;  %v187_v8 = vld [vmem:[%s7072_s1 + $0x10] sm:$0xff]  ;;  %v15_v9 = vld [vmem:[%s7073_s0] sm:$0xff]  ;;  %v16_v10 = vld [vmem:[%s7073_s0 + $0x8] sm:$0xff]  ;;  %v36_v12 = vpack.c.bf16 %v26_v6, %v25_v5  ;;  %v5544_v30 = vshrl.u32 %v39_v29, 7  ;;  %vm330_vm6 = vcmask 326656  }
   0x4   :  { %4700 = vmatprep.subr.msk.bf16.mxu1 %vm68_vm0, %v14_v3  ;;  %v70_v11 = vsel %vm68_vm0, %v14_v3, 0  ;;  %4699 = vmatprep.subr.msk.bf16.mxu0 %vm68_vm0, %v14_v3  ;;  %v31_v13 = vpack.c.bf16 %v16_v10, %v15_v9  ;;  %v17_v14 = vld [vmem:[%s7073_s0 + $0x10] sm:$0xff]  ;;  %v18_v15 = vld [vmem:[%s7073_s0 + $0x18] sm:$0xff]  ;;  %v27_v16 = vld [vmem:[%s7073_s0 + $0x60] sm:$0xff]  ;;  %v5512_v17 = vpack.c.bf16 %v187_v8, %v186_v7  ;;  %vm3906_vm7 = vcmask 1046528  }
   0x5   :  { %4698 = vmatpush3.bf16.msra.mxu1 %v70_v11  ;;  %4365 = vmatprep.mubr.msk.bf16.mxu1 %vm43_vm1, %v35_v4  ;;  %v32_v18 = vpack.c.bf16 %v18_v15, %v17_v14  ;;  %v28_v19 = vld [vmem:[%s7073_s0 + $0x68] sm:$0xff]  ;;  %v188_v22 = vld [vmem:[%s7072_s1 + $0x18] sm:$0xff]  ;;  %v29_v24 = vld [vmem:[%s7073_s0 + $0x70] sm:$0xff]  ;;  %v41_v31 = vsub.s32 0, %v5544_v30  ;;  %vm3995_vm8 = vcmask 1045504   ;;  %vm4085_vm9 = vcmask 29696  }
   0x6   :  { %4356 = vmatpush3.bf16.msra.mxu0 %v70_v11  ;;  %4373 = vmatprep.subr.bf16.mxu1 %v5448_v20  ;;  %v37_v21 = vpack.c.bf16 %v28_v19, %v27_v16  ;;  %v190_v23 = vpack.c.bf16 %v188_v22, %v188_v22  ;;  %v30_v25 = vld [vmem:[%s7073_s0 + $0x78] sm:$0xff] }
   0x7   :  { %4357 = vmatprep.mubr.msk.bf16.mxu0 %vm43_vm1, %v31_v13  ;;  %4401 = vmatprep.subr.bf16.mxu0 %v5448_v20  ;;  %v38_v27 = vpack.c.bf16 %v30_v25, %v29_v24  ;;  %v5550_v32 = vld [vmem:[%s7072_s1 + $0x98] sm:$0xff]  ;;  %v191_v24 = vld [vmem:[%s7072_s1 + $0x20] sm:$0xff]  ;;  %v192_v25 = vld [vmem:[%s7072_s1 + $0x28] sm:$0xff] }
   0x8   :  { %4366 = vmatmul.mubr.msk.bf16.vlgmr.msra.gmra.mrb[0].mxu1 %vm43_vm1, %v36_v12  ;;  %v5535_v26 = vsel %vm68_vm0, %v190_v23, 0  ;;  %v5555_v33 = vrot.slane %v5550_v32, %v41_v31  ;;  %v194_v29 = vld [vmem:[%s7072_s1 + $0x38] sm:$0xff] }
   0x9   :  { %4374 = vmatpush3.bf16.msra.mxu1 %v5512_v17  ;;  %4358 = vmatmul.mubr.msk.bf16.vlgmr.msra.gmra.mrb[0].mxu0 %vm43_vm1, %v32_v18 }
   0xa   :  { %4369 = vmatprep.mubr.msk.bf16.mxu1 %vm43_vm1, %v37_v21  ;;  %4375 = vmatprep.subr.bf16.mxu1 %v5448_v20 }
   0xd   :  { %4376 = vmatpush3.bf16.msra.mxu1 %v5535_v26 }
   0xe   :  { %4381 = vmatprep.subr.bf16.mxu1 %v5448_v20 }
  0x10   :  { %4370 = vmatmul.mubr.msk.bf16.gmra.mrb[4].mxu1 %vm43_vm1, %v38_v27  ;;  %v193_v27 = vld [vmem:[%s7072_s1 + $0x30] sm:$0xff] }
  0x11   :  { %4377 = vmatprep.mubr.msk.bf16.mxu1 %vm5449_vm2, %v5448_v20 }
  0x18   :  { %4378 = vmatmul.mubr.bf16.vlgmr.msra.gmra.mrb[8].mxu1 %v5450_v28  ;;  %v5600_v28 = vpack.c.bf16 %v192_v25, %v191_v24  ;;  %v202_v24 = vld [vmem:[%s7072_s1 + $0x60] sm:$0xff] }
  0x19   :  { %4387 = vmatprep.mubr.msk.bf16.mxu1 %vm5449_vm2, %v5448_v20 }
  0x1a   :  { %4382 = vmatpush3.bf16.msra.mxu1 %v5600_v28 }
  0x1b   :  { %4383 = vmatprep.subr.bf16.mxu1 %v5448_v20 }
  0xdb   :  { %v4367_v34 = vpop.f32.mrb[0].mxu1 }
  0xdc   :  { %v147_v35 = vadd.f32 %v4367_v34, %v5555_v33  ;;  %v138_v36 = vpop.f32.mrb[1].mxu1  ;;  %v4359_v37 = vpop.f32.mrb[0].mxu0  ;;  %v5606_v34 = vpack.c.bf16 %v194_v29, %v193_v27 }
  0xdd   :  { %v139_v38 = vadd.f32 %v138_v36, %v5555_v33  ;;  %v4368_v39 = vpop.f32.mrb[2].mxu1  ;;  %v115_v40 = vadd.f32 %v4359_v37, %v5555_v33  ;;  %v106_v41 = vpop.f32.mrb[1].mxu0  ;;  %v195_v37 = vld [vmem:[%s7072_s1 + $0x40] sm:$0xff] }
  0xde   :  { %180 = vst.msk [vmem:[#allocation2 + $0x50] sm:$0xff] %vm169_vm3, %v147_v35  ;;  %v150_v42 = vadd.f32 %v4368_v39, %v5555_v33  ;;  %v141_v43 = vpop.f32.mrb[3].mxu1  ;;  %v107_v44 = vadd.f32 %v106_v41, %v5555_v33  ;;  %v4360_v45 = vpop.f32.mrb[2].mxu0  ;;  %4384 = vmatpush3.bf16.msra.mxu1 %v5606_v34 }
  0xdf   :  { %178 = vst.msk [vmem:[#allocation2 + $0x40] sm:$0xff] %vm169_vm3, %v139_v38  ;;  %172 = vst.msk [vmem:[#allocation2 + $0x10] sm:$0xff] %vm169_vm3, %v115_v40  ;;  %v142_v46 = vadd.f32 %v141_v43, %v5555_v33  ;;  %v118_v47 = vadd.f32 %v4360_v45, %v5555_v33  ;;  %v109_v48 = vpop.f32.mrb[3].mxu0  ;;  %4385 = vmatprep.subr.bf16.mxu1 %v5448_v20  ;;  %v198_v38 = vpack.c.bf16 %v195_v37, %v195_v37 }
  0xe0   :  { %181 = vst.msk [vmem:[#allocation2 + $0x58] sm:$0xff] %vm169_vm3, %v150_v42  ;;  %170 = vst.msk [vmem:[#allocation2] sm:$0xff] %vm169_vm3, %v107_v44  ;;  %v110_v49 = vadd.f32 %v109_v48, %v5555_v33 }
  0xe1   :  { %179 = vst.msk [vmem:[#allocation2 + $0x48] sm:$0xff] %vm169_vm3, %v142_v46  ;;  %173 = vst.msk [vmem:[#allocation2 + $0x18] sm:$0xff] %vm169_vm3, %v118_v47  ;;  %v5617_v39 = vsel %vm334_vm4, %v198_v38, 0 }
  0xe2   :  { %171 = vst.msk [vmem:[#allocation2 + $0x8] sm:$0xff] %vm169_vm3, %v110_v49  ;;  %4386 = vmatpush3.bf16.msra.mxu1 %v5617_v39 }
  0xe3   :  { %v4371_v50 = vpop.f32.mrb[4].mxu1  ;;  %4391 = vmatprep.subr.bf16.mxu1 %v5448_v20 }
  0xe4   :  { %v163_v51 = vadd.f32 %v4371_v50, %v5555_v33  ;;  %v154_v52 = vpop.f32.mrb[5].mxu1 }
  0xe5   :  { %v155_v53 = vadd.f32 %v154_v52, %v5555_v33  ;;  %v4372_v54 = vpop.f32.mrb[6].mxu1  ;;  %v328_v52 = vsub.s32 1, %v5544_v30 }
  0xe6   :  { %184 = vst.msk [vmem:[#allocation2 + $0x70] sm:$0xff] %vm169_vm3, %v163_v51  ;;  %v166_v55 = vadd.f32 %v4372_v54, %v5555_v33  ;;  %v157_v56 = vpop.f32.mrb[7].mxu1 }
  0xe7   :  { %182 = vst.msk [vmem:[#allocation2 + $0x60] sm:$0xff] %vm169_vm3, %v155_v53  ;;  %v158_v57 = vadd.f32 %v157_v56, %v5555_v33  ;;  %v215_v58 = vld [vmem:[#allocation2] sm:$0xff]  ;;  %v5637_v53 = vrot.slane %v5550_v32, %v328_v52 }
  0xe8   :  { %185 = vst.msk [vmem:[#allocation2 + $0x78] sm:$0xff] %vm169_vm3, %v166_v55 }
  0xe9   :  { %183 = vst.msk [vmem:[#allocation2 + $0x68] sm:$0xff] %vm169_vm3, %v158_v57  ;;  %v216_v62 = vld [vmem:[#allocation2 + $0x8] sm:$0xff] }
  0xeb   :  { %v258_v59 = vpop.f32.mrb[8].mxu1 }
  0xec   :  { %v265_v60 = vadd.f32 %v258_v59, %v215_v58  ;;  %v4379_v61 = vpop.f32.mrb[9].mxu1 }
  0xed   :  { %v261_v63 = vpop.f32.mrb[10].mxu1 }
  0xee   :  { %4936 = vtanh.f32 %v265_v60  ;;  %v266_v0 = vadd.f32 %v261_v63, %v216_v62  ;;  %v4380_v1 = vpop.f32.mrb[11].mxu1  ;;  %v4113_v4 = vmul.f32 -1.442695, %v265_v60 }
  0xf0   :  { %4938 = vtanh.f32 %v266_v0  ;;  %v4114_v5 = vmul.f32 -1.442695, %v266_v0 }
  0xf1   :  { %4940 = vpow2.f32 %v4113_v4 }
  0xf2   :  { %4942 = vpow2.f32 %v4114_v5 }
  0xf8   :  { %v4937_v2 = vpop.eup %4936 }
  0xf9   :  { %285 = vrot.lane.b32.xlu0 %v4937_v2, %s5451_s15 }
  0xfa   :  { %v4939_v3 = vpop.eup %4938 }
  0xfb   :  { %v4941_v6 = vpop.eup %4940 }
  0xfc   :  { %v273_v7 = vadd.f32 1.0, %v4941_v6  ;;  %v4943_v8 = vpop.eup %4942 }
  0xfd   :  { %287 = vrot.lane.b32.xlu0 %v4939_v3, %s5451_s15  ;;  %v274_v9 = vadd.f32 1.0, %v4943_v8 }
  0xfe   :  { %4944 = vrcp.f32 %v273_v7 }
  0xff   :  { %4946 = vrcp.f32 %v274_v9 }
 0x108   :  { %v4945_v10 = vpop.eup %4944 }
 0x109   :  { %v4947_v13 = vpop.eup %4946  ;;  %v281_v16 = vmul.f32 0.0, %v4945_v10 }
 0x10a   :  { %v282_v21 = vmul.f32 0.0, %v4947_v13 }
 0x16b   :  { %v286_v11 = vpop.permute.xlu0 %285 }
 0x16c   :  { %v291_v12 = vmul.f32 %v4945_v10, %v286_v11 }
 0x16e   :  { %295 = vrot.lane.b32.xlu1 %v291_v12, %s5452_s16 }
 0x16f   :  { %v288_v14 = vpop.permute.xlu0 %287 }
 0x170   :  { %v292_v15 = vmul.f32 %v4947_v13, %v288_v14 }
 0x172   :  { %297 = vrot.lane.b32.xlu1 %v292_v15, %s5452_s16 }
 0x1e0   :  { %v296_v18 = vpop.permute.xlu1 %295 }
 0x1e1   :  { %v5585_v19 = vadd.f32 %v296_v18, %v281_v16  ;;  %v199_v16 = vld [vmem:[%s7072_s1 + $0x48] sm:$0xff]  ;;  %v200_v18 = vld [vmem:[%s7072_s1 + $0x50] sm:$0xff] }
 0x1e3   :  { %4948 = vtanh.f32 %v5585_v19 }
 0x1e4   :  { %v298_v22 = vpop.permute.xlu1 %297 }
 0x1e5   :  { %v5588_v23 = vadd.f32 %v298_v22, %v282_v21  ;;  %v201_v21 = vld [vmem:[%s7072_s1 + $0x58] sm:$0xff]  ;;  %v5660_v22 = vpack.c.bf16 %v200_v18, %v199_v16 }
 0x1e6   :  { %v5666_v25 = vpack.c.bf16 %v202_v24, %v201_v21 }
 0x1e7   :  { %4950 = vtanh.f32 %v5588_v23 }
 0x1ed   :  { %v4949_v35 = vpop.eup %4948 }
 0x1ee   :  { %307 = vrot.lane.b32.xlu0 %v4949_v35, %s5453_s25  ;;  %v203_v35 = vld [vmem:[%s7072_s1 + $0x68] sm:$0xff] }
 0x1f1   :  { %v4951_v36 = vpop.eup %4950 }
 0x1f2   :  { %309 = vrot.lane.b32.xlu1 %v4951_v36, %s5453_s25  ;;  %v206_v36 = vpack.c.bf16 %v203_v35, %v203_v35 }
 0x1f4   :  { %v5681_v37 = vsel %vm334_vm4, %v206_v36, 0 }
 0x260   :  { %v308_v40 = vpop.permute.xlu0 %307 }
 0x261   :  { %v5621_v42 = vmul.f32 %v4945_v10, %v308_v40 }
 0x264   :  { %v310_v41 = vpop.permute.xlu1 %309 }
 0x265   :  { %v5623_v43 = vmul.f32 %v4947_v13, %v310_v41 }
 0x267   :  { %v4711_v44 = vpack.i.bf16 %v5623_v43, %v5621_v42  ;;  %v659_v45 = vpack.c.bf16 %v5623_v43, %v5621_v42 }
 0x269   :  { %4712 = vrot.lane.b32.xlu0 %v4711_v44, %s5454_s28 }
 0x2db   :  { %v4713_v46 = vpop.permute.xlu0 %4712 }
 0x2dc   :  { %v4715_v47 = vunpack.i.h.bf16 %v4713_v46  ;;  %v4714_v48 = vunpack.i.l.bf16 %v4713_v46 }
 0x2de   :  { %v324_v49 = vsel %vm217_vm5, %v4715_v47, 0.0  ;;  %v323_v50 = vsel %vm217_vm5, %v4714_v48, 0.0 }
 0x2df   :  { %v325_v51 = vpack.c.bf16 %v324_v49, %v323_v50 }
 0x2e1   :  { %4388 = vmatmul.mubr.msk.bf16.vlgmr.msra.gmra.mrb[12].mxu1 %vm330_vm6, %v325_v51  ;;  %v440_v51 = vsub.s32 2, %v5544_v30 }
 0x2e2   :  { %4397 = vmatprep.mubr.msk.bf16.mxu1 %vm5449_vm2, %v5448_v20  ;;  %4392 = vmatpush3.bf16.msra.mxu1 %v5660_v22 }
 0x2e3   :  { %4393 = vmatprep.subr.bf16.mxu1 %v5448_v20  ;;  %v5709_v52 = vrot.slane %v5550_v32, %v440_v51 }
 0x2e6   :  { %4394 = vmatpush3.bf16.msra.mxu1 %v5666_v25 }
 0x2e7   :  { %4395 = vmatprep.subr.bf16.mxu1 %v5448_v20 }
 0x2ea   :  { %4396 = vmatpush3.bf16.msra.mxu1 %v5681_v37 }
 0x2eb   :  { %4411 = vmatprep.subr.bf16.mxu1 %v5448_v20 }
 0x3b4   :  { %v372_v54 = vpop.f32.mrb[12].mxu1 }
 0x3b5   :  { %v373_v55 = vadd.f32 %v372_v54, %v5637_v53  ;;  %v4389_v56 = vpop.f32.mrb[13].mxu1 }
 0x3b6   :  { %v375_v57 = vpop.f32.mrb[14].mxu1 }
 0x3b7   :  { %4952 = vtanh.f32 %v373_v55  ;;  %v376_v58 = vadd.f32 %v375_v57, %v5637_v53  ;;  %v4390_v59 = vpop.f32.mrb[15].mxu1  ;;  %v4116_v62 = vmul.f32 -1.442695, %v373_v55 }
 0x3b9   :  { %4954 = vtanh.f32 %v376_v58  ;;  %v4117_v63 = vmul.f32 -1.442695, %v376_v58 }
 0x3ba   :  { %4956 = vpow2.f32 %v4116_v62 }
 0x3bb   :  { %4958 = vpow2.f32 %v4117_v63 }
 0x3c1   :  { %v4953_v60 = vpop.eup %4952 }
 0x3c2   :  { %397 = vrot.lane.b32.xlu1 %v4953_v60, %s5451_s15  ;;  %v657_v60 = vld [vmem:[#allocation2 + $0x10] sm:$0xff] }
 0x3c3   :  { %v4955_v61 = vpop.eup %4954 }
 0x3c4   :  { %399 = vrot.lane.b32.xlu0 %v4955_v61, %s5451_s15  ;;  %v4957_v0 = vpop.eup %4956 }
 0x3c5   :  { %v4959_v1 = vpop.eup %4958  ;;  %v385_v2 = vadd.f32 1.0, %v4957_v0  ;;  %v658_v0 = vld [vmem:[#allocation2 + $0x18] sm:$0xff] }
 0x3c6   :  { %v386_v3 = vadd.f32 1.0, %v4959_v1 }
 0x3c7   :  { %4960 = vrcp.f32 %v385_v2 }
 0x3c8   :  { %4962 = vrcp.f32 %v386_v3 }
 0x3d1   :  { %v4961_v4 = vpop.eup %4960 }
 0x3d2   :  { %v4963_v7 = vpop.eup %4962  ;;  %v393_v10 = vmul.f32 0.0, %v4961_v4 }
 0x3d3   :  { %v394_v13 = vmul.f32 0.0, %v4963_v7 }
 0x434   :  { %v398_v5 = vpop.permute.xlu1 %397 }
 0x435   :  { %v403_v6 = vmul.f32 %v4961_v4, %v398_v5 }
 0x436   :  { %v400_v8 = vpop.permute.xlu0 %399 }
 0x437   :  { %407 = vrot.lane.b32.xlu1 %v403_v6, %s5452_s16  ;;  %v404_v9 = vmul.f32 %v4963_v7, %v400_v8 }
 0x439   :  { %409 = vrot.lane.b32.xlu0 %v404_v9, %s5452_s16 }
 0x4a9   :  { %v408_v11 = vpop.permute.xlu1 %407 }
 0x4aa   :  { %v5645_v12 = vadd.f32 %v408_v11, %v393_v10 }
 0x4ab   :  { %v410_v14 = vpop.permute.xlu0 %409 }
 0x4ac   :  { %4964 = vtanh.f32 %v5645_v12  ;;  %v5648_v15 = vadd.f32 %v410_v14, %v394_v13 }
 0x4ae   :  { %4966 = vtanh.f32 %v5648_v15 }
 0x4b6   :  { %v4965_v27 = vpop.eup %4964 }
 0x4b7   :  { %419 = vrot.lane.b32.xlu1 %v4965_v27, %s5453_s25 }
 0x4b8   :  { %v4967_v29 = vpop.eup %4966 }
 0x4b9   :  { %421 = vrot.lane.b32.xlu0 %v4967_v29, %s5453_s25 }
 0x4bd   :  { %661 = vrot.lane.b32.xlu0 %v659_v45, %s5454_s28 }
 0x529   :  { %v420_v38 = vpop.permute.xlu1 %419 }
 0x52a   :  { %v425_v41 = vmul.f32 %v4961_v4, %v420_v38 }
 0x52b   :  { %v422_v40 = vpop.permute.xlu0 %421 }
 0x52c   :  { %v426_v44 = vmul.f32 %v4963_v7, %v422_v40 }
 0x52e   :  { %v5685_v46 = vpack.i.bf16 %v426_v44, %v425_v41 }
 0x52f   :  { %v662_v50 = vpop.permute.xlu0 %661 }
 0x530   :  { %4717 = vrot.lane.b32.xlu1 %v5685_v46, %s5454_s28 }
 0x5a2   :  { %v4718_v42 = vpop.permute.xlu1 %4717 }
 0x5a3   :  { %v4720_v43 = vunpack.i.h.bf16 %v4718_v42  ;;  %v4719_v45 = vunpack.i.l.bf16 %v4718_v42 }
 0x5a5   :  { %v436_v47 = vsel %vm217_vm5, %v4720_v43, 0.0  ;;  %v435_v48 = vsel %vm217_vm5, %v4719_v45, 0.0 }
 0x5a6   :  { %v437_v49 = vpack.c.bf16 %v436_v47, %v435_v48 }
 0x5a8   :  { %4398 = vmatmul.mubr.msk.bf16.vlgmr.msra.gmra.mrb[16].mxu1 %vm330_vm6, %v437_v49 }
 0x5a9   :  { %4412 = vmatpush3.bf16.msra.mxu1 %v5512_v17  ;;  %4415 = vmatprep.mubr.msk.bf16.mxu1 %vm5449_vm2, %v5448_v20 }
 0x5aa   :  { %4413 = vmatprep.subr.bf16.mxu1 %v5448_v20 }
 0x5ad   :  { %4414 = vmatpush3.bf16.msra.mxu1 %v5535_v26 }
 0x5ae   :  { %4429 = vmatprep.subr.bf16.mxu1 %v5448_v20 }
 0x5b0   :  { %4416 = vmatmul.mubr.msk.bf16.vlgmr.msra.gmra.mrb[20].mxu1 %vm217_vm5, %v662_v50 }
 0x5b1   :  { %4430 = vmatpush3.bf16.msra.mxu1 %v5660_v22  ;;  %4435 = vmatprep.mubr.msk.bf16.mxu1 %vm5449_vm2, %v5448_v20 }
 0x5b2   :  { %4431 = vmatprep.subr.bf16.mxu1 %v5448_v20 }
 0x5b5   :  { %4432 = vmatpush3.bf16.msra.mxu1 %v5666_v25 }
 0x5b6   :  { %4433 = vmatprep.subr.bf16.mxu1 %v5448_v20 }
 0x5b9   :  { %4434 = vmatpush3.bf16.msra.mxu1 %v5681_v37 }
 0x5ba   :  { %4449 = vmatprep.subr.bf16.mxu1 %v5448_v20 }
 0x67b   :  { %v482_v54 = vpop.f32.mrb[16].mxu1 }
 0x67c   :  { %v483_v55 = vadd.f32 %v482_v54, %v5709_v52  ;;  %v4399_v56 = vpop.f32.mrb[17].mxu1 }
 0x67d   :  { %v485_v57 = vpop.f32.mrb[18].mxu1 }
 0x67e   :  { %4968 = vtanh.f32 %v483_v55  ;;  %v486_v58 = vadd.f32 %v485_v57, %v5709_v52  ;;  %v4400_v59 = vpop.f32.mrb[19].mxu1  ;;  %v4119_v8 = vmul.f32 -1.442695, %v483_v55 }
 0x680   :  { %4970 = vtanh.f32 %v486_v58  ;;  %v4120_v9 = vmul.f32 -1.442695, %v486_v58 }
 0x683   :  { %v700_v61 = vpop.f32.mrb[20].mxu1 }
 0x684   :  { %v707_v62 = vadd.f32 %v700_v61, %v657_v60  ;;  %v4417_v63 = vpop.f32.mrb[21].mxu1 }
 0x685   :  { %v703_v1 = vpop.f32.mrb[22].mxu1 }
 0x686   :  { %4972 = vtanh.f32 %v707_v62  ;;  %v708_v2 = vadd.f32 %v703_v1, %v658_v0  ;;  %v4418_v3 = vpop.f32.mrb[23].mxu1  ;;  %v4125_v10 = vmul.f32 -1.442695, %v707_v62 }
 0x688   :  { %v4969_v4 = vpop.eup %4968  ;;  %4974 = vtanh.f32 %v708_v2  ;;  %v4126_v11 = vmul.f32 -1.442695, %v708_v2  ;;  %v208_v2 = vld [vmem:[%s7072_s1 + $0x78] sm:$0xff] }
 0x689   :  { %507 = vrot.lane.b32.xlu1 %v4969_v4, %s5451_s15  ;;  %4976 = vpow2.f32 %v4119_v8  ;;  %v20_v4 = vld [vmem:[%s7073_s0 + $0x28] sm:$0xff] }
 0x68a   :  { %v4971_v5 = vpop.eup %4970  ;;  %4978 = vpow2.f32 %v4120_v9  ;;  %v209_v9 = vld [vmem:[%s7072_s1 + $0x80] sm:$0xff] }
 0x68b   :  { %509 = vrot.lane.b32.xlu0 %v4971_v5, %s5451_s15  ;;  %4980 = vpow2.f32 %v4125_v10  ;;  %v21_v5 = vld [vmem:[%s7073_s0 + $0x30] sm:$0xff]  ;;  %v210_v10 = vld [vmem:[%s7072_s1 + $0x88] sm:$0xff] }
 0x68c   :  { %4982 = vpow2.f32 %v4126_v11  ;;  %v5776_v11 = vpack.c.bf16 %v210_v10, %v209_v9 }
 0x690   :  { %v4973_v6 = vpop.eup %4972 }
 0x691   :  { %727 = vrot.lane.b32.xlu1 %v4973_v6, %s5451_s15  ;;  %v22_v6 = vld [vmem:[%s7073_s0 + $0x38] sm:$0xff] }
 0x692   :  { %v4975_v7 = vpop.eup %4974  ;;  %v34_v8 = vpack.c.bf16 %v22_v6, %v21_v5 }
 0x693   :  { %729 = vrot.lane.b32.xlu0 %v4975_v7, %s5451_s15  ;;  %v4977_v13 = vpop.eup %4976 }
 0x694   :  { %v4979_v14 = vpop.eup %4978  ;;  %v495_v16 = vadd.f32 1.0, %v4977_v13 }
 0x695   :  { %v496_v18 = vadd.f32 1.0, %v4979_v14  ;;  %v4981_v21 = vpop.eup %4980 }
 0x696   :  { %4984 = vrcp.f32 %v495_v16  ;;  %v4983_v24 = vpop.eup %4982  ;;  %v715_v27 = vadd.f32 1.0, %v4981_v21  ;;  %v211_v16 = vld [vmem:[%s7072_s1 + $0x90] sm:$0xff] }
 0x697   :  { %4986 = vrcp.f32 %v496_v18  ;;  %v716_v29 = vadd.f32 1.0, %v4983_v24  ;;  %v214_v18 = vpack.c.bf16 %v211_v16, %v211_v16 }
 0x698   :  { %4988 = vrcp.f32 %v715_v27 }
 0x699   :  { %4990 = vrcp.f32 %v716_v29  ;;  %v5791_v21 = vsel %vm334_vm4, %v214_v18, 0 }
 0x6a0   :  { %v5717_v35 = vpop.eup %4984 }
 0x6a1   :  { %v5720_v40 = vpop.eup %4986  ;;  %v503_v50 = vmul.f32 0.0, %v5717_v35 }
 0x6a2   :  { %v5725_v42 = vpop.eup %4988  ;;  %v504_v55 = vmul.f32 0.0, %v5720_v40 }
 0x6a3   :  { %v4991_v47 = vpop.eup %4990  ;;  %v723_v58 = vmul.f32 %v5725_v42, %v5585_v19  ;;  %v207_v19 = vld [vmem:[%s7072_s1 + $0x70] sm:$0xff] }
 0x6a4   :  { %v724_v61 = vmul.f32 %v4991_v47, %v5588_v23  ;;  %v19_v23 = vld [vmem:[%s7073_s0 + $0x20] sm:$0xff]  ;;  %v5758_v3 = vpack.c.bf16 %v208_v2, %v207_v19 }
 0x6a5   :  { %v33_v7 = vpack.c.bf16 %v20_v4, %v19_v23 }
 0x6a6   :  { %4402 = vmatpush3.bf16.msra.mxu0 %v5758_v3 }
 0x6a7   :  { %4361 = vmatprep.mubr.msk.bf16.mxu0 %vm43_vm1, %v33_v7  ;;  %4403 = vmatprep.subr.bf16.mxu0 %v5448_v20 }
 0x6a8   :  { %4362 = vmatmul.mubr.msk.bf16.gmra.mrb[4].mxu0 %vm43_vm1, %v34_v8 }
 0x6a9   :  { %4407 = vmatprep.mubr.msk.bf16.mxu0 %vm5449_vm2, %v5448_v20 }
 0x6aa   :  { %4404 = vmatpush3.bf16.msra.mxu0 %v5776_v11 }
 0x6ab   :  { %4405 = vmatprep.subr.bf16.mxu0 %v5448_v20 }
 0x6ae   :  { %4406 = vmatpush3.bf16.msra.mxu0 %v5791_v21 }
 0x6af   :  { %4419 = vmatprep.subr.bf16.mxu0 %v5448_v20 }
 0x6fb   :  { %v508_v36 = vpop.permute.xlu1 %507 }
 0x6fc   :  { %v513_v38 = vmul.f32 %v5717_v35, %v508_v36 }
 0x6fd   :  { %v510_v41 = vpop.permute.xlu0 %509 }
 0x6fe   :  { %517 = vrot.lane.b32.xlu1 %v513_v38, %s5452_s16  ;;  %v514_v44 = vmul.f32 %v5720_v40, %v510_v41 }
 0x700   :  { %519 = vrot.lane.b32.xlu0 %v514_v44, %s5452_s16 }
 0x703   :  { %v728_v43 = vpop.permute.xlu1 %727 }
 0x704   :  { %v733_v45 = vmul.f32 %v5725_v42, %v728_v43 }
 0x705   :  { %v730_v48 = vpop.permute.xlu0 %729 }
 0x706   :  { %737 = vrot.lane.b32.xlu1 %v733_v45, %s5452_s16  ;;  %v734_v49 = vmul.f32 %v4991_v47, %v730_v48 }
 0x708   :  { %739 = vrot.lane.b32.xlu0 %v734_v49, %s5452_s16 }
 0x770   :  { %v518_v51 = vpop.permute.xlu1 %517 }
 0x771   :  { %v5731_v54 = vadd.f32 %v518_v51, %v503_v50 }
 0x772   :  { %v520_v56 = vpop.permute.xlu0 %519 }
 0x773   :  { %4992 = vtanh.f32 %v5731_v54  ;;  %v5735_v57 = vadd.f32 %v520_v56, %v504_v55 }
 0x775   :  { %4994 = vtanh.f32 %v5735_v57 }
 0x778   :  { %v738_v59 = vpop.permute.xlu1 %737 }
 0x779   :  { %v5740_v60 = vadd.f32 %v738_v59, %v723_v58 }
 0x77a   :  { %v740_v62 = vpop.permute.xlu0 %739 }
 0x77b   :  { %4996 = vtanh.f32 %v5740_v60  ;;  %v5744_v63 = vadd.f32 %v740_v62, %v724_v61  ;;  %v4363_v48 = vpop.f32.mrb[4].mxu0 }
 0x77c   :  { %v131_v49 = vadd.f32 %v4363_v48, %v5555_v33  ;;  %v122_v50 = vpop.f32.mrb[5].mxu0 }
 0x77d   :  { %v4993_v0 = vpop.eup %4992  ;;  %4998 = vtanh.f32 %v5744_v63  ;;  %v4364_v51 = vpop.f32.mrb[6].mxu0 }
 0x77e   :  { %529 = vrot.lane.b32.xlu1 %v4993_v0, %s5453_s25  ;;  %176 = vst.msk [vmem:[#allocation2 + $0x30] sm:$0xff] %vm169_vm3, %v131_v49 }
 0x77f   :  { %v4995_v1 = vpop.eup %4994 }
 0x780   :  { %531 = vrot.lane.b32.xlu0 %v4995_v1, %s5453_s25 }
 0x785   :  { %v4997_v13 = vpop.eup %4996 }
 0x786   :  { %749 = vrot.lane.b32.xlu1 %v4997_v13, %s5453_s25 }
 0x787   :  { %v4999_v14 = vpop.eup %4998 }
 0x788   :  { %751 = vrot.lane.b32.xlu0 %v4999_v14, %s5453_s25 }
 0x7f0   :  { %v530_v24 = vpop.permute.xlu1 %529 }
 0x7f1   :  { %v535_v29 = vmul.f32 %v5717_v35, %v530_v24 }
 0x7f2   :  { %v532_v27 = vpop.permute.xlu0 %531 }
 0x7f3   :  { %v536_v36 = vmul.f32 %v5720_v40, %v532_v27 }
 0x7f5   :  { %v5797_v38 = vpack.i.bf16 %v536_v36, %v535_v29 }
 0x7f7   :  { %4722 = vrot.lane.b32.xlu1 %v5797_v38, %s5454_s28 }
 0x7f8   :  { %v750_v41 = vpop.permute.xlu1 %749 }
 0x7f9   :  { %v5802_v43 = vmul.f32 %v5725_v42, %v750_v41  ;;  %v123_v42 = vadd.f32 %v122_v50, %v5555_v33 }
 0x7fa   :  { %v752_v44 = vpop.permute.xlu0 %751 }
 0x7fb   :  { %v5804_v45 = vmul.f32 %v4991_v47, %v752_v44  ;;  %4732 = vrot.lane.b32.xlu1 %v5685_v46, %s5451_s15  ;;  %v134_v47 = vadd.f32 %v4364_v51, %v5555_v33  ;;  %v125_v46 = vpop.f32.mrb[7].mxu0  ;;  %174 = vst.msk [vmem:[#allocation2 + $0x20] sm:$0xff] %vm169_vm3, %v123_v42 }
 0x7fc   :  { %v126_v55 = vadd.f32 %v125_v46, %v5555_v33 }
 0x7fd   :  { %v4726_v35 = vpack.i.bf16 %v5804_v45, %v5802_v43  ;;  %v1096_v40 = vpack.c.bf16 %v5804_v45, %v5802_v43  ;;  %177 = vst.msk [vmem:[#allocation2 + $0x38] sm:$0xff] %vm169_vm3, %v134_v47 }
 0x7fe   :  { %175 = vst.msk [vmem:[#allocation2 + $0x28] sm:$0xff] %vm169_vm3, %v126_v55 }
 0x7ff   :  { %4727 = vrot.lane.b32.xlu0 %v4726_v35, %s5454_s28 }
 0x869   :  { %v4723_v56 = vpop.permute.xlu1 %4722 }
 0x86a   :  { %v4725_v58 = vunpack.i.h.bf16 %v4723_v56  ;;  %v4724_v59 = vunpack.i.l.bf16 %v4723_v56 }
 0x86c   :  { %v546_v61 = vsel %vm217_vm5, %v4725_v58, 0.0  ;;  %v545_v62 = vsel %vm217_vm5, %v4724_v59, 0.0 }
 0x86d   :  { %v547_v0 = vpack.c.bf16 %v546_v61, %v545_v62  ;;  %v4733_v33 = vpop.permute.xlu1 %4732 }
 0x86e   :  { %v4735_v23 = vunpack.i.h.bf16 %v4733_v33  ;;  %v4734_v4 = vunpack.i.l.bf16 %v4733_v33 }
 0x86f   :  { %4408 = vmatmul.mubr.msk.bf16.vlgmr.msra.gmra.mrb[8].mxu0 %vm330_vm6, %v547_v0  ;;  %v550_v0 = vsub.s32 3, %v5544_v30 }
 0x870   :  { %4420 = vmatpush3.bf16.msra.mxu0 %v5600_v28  ;;  %4425 = vmatprep.mubr.msk.bf16.mxu0 %vm5449_vm2, %v5448_v20 }
 0x871   :  { %v4728_v1 = vpop.permute.xlu0 %4727  ;;  %4421 = vmatprep.subr.bf16.mxu0 %v5448_v20 }
 0x872   :  { %v4730_v19 = vunpack.i.h.bf16 %v4728_v1  ;;  %v4729_v2 = vunpack.i.l.bf16 %v4728_v1 }
 0x874   :  { %4422 = vmatpush3.bf16.msra.mxu0 %v5606_v34  ;;  %v772_v5 = vsel %vm217_vm5, %v4730_v19, %v4735_v23  ;;  %v771_v6 = vsel %vm217_vm5, %v4729_v2, %v4734_v4  ;;  %v5858_v2 = vrot.slane %v5550_v32, %v550_v0 }
 0x875   :  { %4423 = vmatprep.subr.bf16.mxu0 %v5448_v20  ;;  %v773_v7 = vpack.c.bf16 %v772_v5, %v771_v6 }
 0x878   :  { %4424 = vmatpush3.bf16.msra.mxu0 %v5617_v39 }
 0x879   :  { %4439 = vmatprep.subr.bf16.mxu0 %v5448_v20 }
 0x87b   :  { %4426 = vmatmul.mubr.msk.bf16.vlgmr.msra.gmra.mrb[12].mxu0 %vm330_vm6, %v773_v7 }
 0x87c   :  { %4440 = vmatpush3.bf16.msra.mxu0 %v5758_v3  ;;  %4445 = vmatprep.mubr.msk.bf16.mxu0 %vm5449_vm2, %v5448_v20 }
 0x87d   :  { %4441 = vmatprep.subr.bf16.mxu0 %v5448_v20 }
 0x880   :  { %4442 = vmatpush3.bf16.msra.mxu0 %v5776_v11 }
 0x881   :  { %4443 = vmatprep.subr.bf16.mxu0 %v5448_v20 }
 0x884   :  { %4444 = vmatpush3.bf16.msra.mxu0 %v5791_v21 }
 0x885   :  { %4457 = vmatprep.subr.bf16.mxu0 %v5448_v20 }
 0x942   :  { %v592_v8 = vpop.f32.mrb[8].mxu0 }
 0x943   :  { %v4409_v9 = vpop.f32.mrb[9].mxu0 }
 0x944   :  { %v595_v10 = vpop.f32.mrb[10].mxu0 }
 0x945   :  { %v4410_v13 = vpop.f32.mrb[11].mxu0  ;;  %v596_v32 = vadd.f32 %v595_v10, %v5858_v2 }
 0x94e   :  { %v811_v14 = vpop.f32.mrb[12].mxu0 }
 0x94f   :  { %v812_v16 = vadd.f32 %v811_v14, %v5637_v53  ;;  %v4427_v18 = vpop.f32.mrb[13].mxu0 }
 0x950   :  { %v814_v24 = vpop.f32.mrb[14].mxu0 }
 0x951   :  { %5000 = vtanh.f32 %v812_v16  ;;  %v4428_v27 = vpop.f32.mrb[15].mxu0  ;;  %v815_v29 = vadd.f32 %v814_v24, %v5637_v53  ;;  %v4128_v44 = vmul.f32 -1.442695, %v812_v16 }
 0x953   :  { %5002 = vtanh.f32 %v815_v29  ;;  %v4129_v35 = vmul.f32 -1.442695, %v815_v29 }
 0x954   :  { %5004 = vpow2.f32 %v4128_v44 }
 0x955   :  { %5006 = vpow2.f32 %v4129_v35 }
 0x95b   :  { %v5001_v36 = vpop.eup %5000 }
 0x95c   :  { %836 = vrot.lane.b32.xlu0 %v5001_v36, %s5451_s15 }
 0x95d   :  { %v5003_v41 = vpop.eup %5002 }
 0x95e   :  { %838 = vrot.lane.b32.xlu1 %v5003_v41, %s5451_s15  ;;  %v5005_v48 = vpop.eup %5004 }
 0x95f   :  { %v824_v49 = vadd.f32 1.0, %v5005_v48  ;;  %v5007_v50 = vpop.eup %5006 }
 0x960   :  { %v825_v42 = vadd.f32 1.0, %v5007_v50 }
 0x961   :  { %5008 = vrcp.f32 %v824_v49 }
 0x962   :  { %5010 = vrcp.f32 %v825_v42 }
 0x96b   :  { %v5009_v51 = vpop.eup %5008 }
 0x96c   :  { %v5011_v55 = vpop.eup %5010  ;;  %v832_v59 = vmul.f32 %v5009_v51, %v5645_v12  ;;  %v593_v12 = vadd.f32 %v592_v8, %v5858_v2 }
 0x96d   :  { %v833_v33 = vmul.f32 %v5011_v55, %v5648_v15 }
 0x96e   :  { %v4122_v45 = vmul.f32 -1.442695, %v593_v12 }
 0x9ce   :  { %v837_v47 = vpop.permute.xlu0 %836 }
 0x9cf   :  { %v842_v46 = vmul.f32 %v5009_v51, %v837_v47 }
 0x9d0   :  { %v839_v56 = vpop.permute.xlu1 %838 }
 0x9d1   :  { %846 = vrot.lane.b32.xlu0 %v842_v46, %s5452_s16  ;;  %v843_v58 = vmul.f32 %v5011_v55, %v839_v56 }
 0x9d3   :  { %848 = vrot.lane.b32.xlu1 %v843_v58, %s5452_s16 }
 0xa43   :  { %v847_v61 = vpop.permute.xlu0 %846 }
 0xa44   :  { %v5850_v62 = vadd.f32 %v847_v61, %v832_v59  ;;  %v1095_v59 = vld [vmem:[#allocation2 + $0x28] sm:$0xff] }
 0xa45   :  { %v849_v1 = vpop.permute.xlu1 %848 }
 0xa46   :  { %5012 = vtanh.f32 %v5850_v62  ;;  %v5855_v19 = vadd.f32 %v849_v1, %v833_v33 }
 0xa48   :  { %5014 = vtanh.f32 %v5855_v19 }
 0xa49   :  { %5016 = vtanh.f32 %v593_v12 }
 0xa4a   :  { %5018 = vtanh.f32 %v596_v32 }
 0xa4b   :  { %5020 = vpow2.f32 %v4122_v45 }
 0xa50   :  { %v5013_v23 = vpop.eup %5012 }
 0xa51   :  { %858 = vrot.lane.b32.xlu0 %v5013_v23, %s5453_s25 }
 0xa52   :  { %v5015_v4 = vpop.eup %5014 }
 0xa53   :  { %860 = vrot.lane.b32.xlu1 %v5015_v4, %s5453_s25  ;;  %v5017_v15 = vpop.eup %5016 }
 0xa57   :  { %4742 = vrot.lane.b32.xlu1 %v5797_v38, %s5451_s15  ;;  %v5019_v38 = vpop.eup %5018 }
 0xa58   :  { %v5021_v42 = vpop.eup %5020 }
 0xa5b   :  { %617 = vrot.lane.b32.xlu1 %v5017_v15, %s5451_s15 }
 0xac3   :  { %v859_v5 = vpop.permute.xlu0 %858 }
 0xac4   :  { %v864_v7 = vmul.f32 %v5009_v51, %v859_v5  ;;  %v1094_v51 = vld [vmem:[#allocation2 + $0x20] sm:$0xff] }
 0xac5   :  { %v861_v6 = vpop.permute.xlu1 %860 }
 0xac6   :  { %v865_v9 = vmul.f32 %v5011_v55, %v861_v6  ;;  %v605_v55 = vadd.f32 1.0, %v5021_v42 }
 0xac8   :  { %v5868_v8 = vpack.i.bf16 %v865_v9, %v864_v7 }
 0xac9   :  { %v4743_v13 = vpop.permute.xlu1 %4742 }
 0xaca   :  { %4737 = vrot.lane.b32.xlu0 %v5868_v8, %s5454_s28  ;;  %v4745_v14 = vunpack.i.h.bf16 %v4743_v13  ;;  %v4744_v16 = vunpack.i.l.bf16 %v4743_v13 }
 0xacd   :  { %v618_v15 = vpop.permute.xlu1 %617 }
 0xace   :  { %1098 = vrot.lane.b32.xlu0 %v1096_v40, %s5454_s28  ;;  %v4123_v40 = vmul.f32 -1.442695, %v596_v32 }
 0xad0   :  { %5022 = vpow2.f32 %v4123_v40 }
 0xad2   :  { %619 = vrot.lane.b32.xlu0 %v5019_v38, %s5451_s15 }
 0xada   :  { %v5023_v46 = vpop.eup %5022 }
 0xadb   :  { %v606_v1 = vadd.f32 1.0, %v5023_v46 }
 0xb3c   :  { %v4738_v10 = vpop.permute.xlu0 %4737 }
 0xb3d   :  { %v4740_v18 = vunpack.i.h.bf16 %v4738_v10  ;;  %v4739_v24 = vunpack.i.l.bf16 %v4738_v10 }
 0xb3f   :  { %v880_v27 = vsel %vm217_vm5, %v4739_v24, %v4744_v16  ;;  %v881_v29 = vsel %vm217_vm5, %v4740_v18, %v4745_v14 }
 0xb40   :  { %v882_v36 = vpack.c.bf16 %v881_v29, %v880_v27  ;;  %v1099_v43 = vpop.permute.xlu0 %1098 }
 0xb42   :  { %4436 = vmatmul.mubr.msk.bf16.vlgmr.msra.gmra.mrb[24].mxu1 %vm330_vm6, %v882_v36 }
 0xb43   :  { %4450 = vmatpush3.bf16.msra.mxu1 %v5512_v17  ;;  %4453 = vmatprep.mubr.msk.bf16.mxu1 %vm5449_vm2, %v5448_v20 }
 0xb44   :  { %4451 = vmatprep.subr.bf16.mxu1 %v5448_v20  ;;  %v620_v7 = vpop.permute.xlu0 %619 }
 0xb47   :  { %4452 = vmatpush3.bf16.msra.mxu1 %v5535_v26 }
 0xb48   :  { %4467 = vmatprep.subr.bf16.mxu1 %v5448_v20 }
 0xb4a   :  { %4454 = vmatmul.mubr.msk.bf16.vlgmr.msra.gmra.mrb[28].mxu1 %vm217_vm5, %v1099_v43 }
 0xb4b   :  { %4468 = vmatpush3.bf16.msra.mxu1 %v5660_v22  ;;  %4473 = vmatprep.mubr.msk.bf16.mxu1 %vm5449_vm2, %v5448_v20 }
 0xb4c   :  { %4469 = vmatprep.subr.bf16.mxu1 %v5448_v20 }
 0xb4f   :  { %4470 = vmatpush3.bf16.msra.mxu1 %v5666_v25 }
 0xb50   :  { %4471 = vmatprep.subr.bf16.mxu1 %v5448_v20 }
 0xb53   :  { %4472 = vmatpush3.bf16.msra.mxu1 %v5681_v37 }
 0xb54   :  { %4487 = vmatprep.subr.bf16.mxu1 %v5448_v20 }
 0xc15   :  { %v920_v41 = vpop.f32.mrb[24].mxu1 }
 0xc16   :  { %v921_v44 = vadd.f32 %v920_v41, %v5709_v52  ;;  %v4437_v35 = vpop.f32.mrb[25].mxu1 }
 0xc17   :  { %v923_v48 = vpop.f32.mrb[26].mxu1 }
 0xc18   :  { %5024 = vtanh.f32 %v921_v44  ;;  %v924_v49 = vadd.f32 %v923_v48, %v5709_v52  ;;  %v4438_v50 = vpop.f32.mrb[27].mxu1  ;;  %v4131_v13 = vmul.f32 -1.442695, %v921_v44 }
 0xc1a   :  { %5026 = vtanh.f32 %v924_v49  ;;  %v4132_v10 = vmul.f32 -1.442695, %v924_v49 }
 0xc1d   :  { %v1137_v47 = vpop.f32.mrb[28].mxu1 }
 0xc1e   :  { %v1144_v56 = vadd.f32 %v1137_v47, %v1094_v51  ;;  %v4455_v58 = vpop.f32.mrb[29].mxu1 }
 0xc1f   :  { %v1140_v61 = vpop.f32.mrb[30].mxu1 }
 0xc20   :  { %5028 = vtanh.f32 %v1144_v56  ;;  %v1145_v0 = vadd.f32 %v1140_v61, %v1095_v59  ;;  %v4456_v33 = vpop.f32.mrb[31].mxu1  ;;  %v4137_v14 = vmul.f32 -1.442695, %v1144_v56 }
 0xc21   :  { %5030 = vrcp.f32 %v605_v55 }
 0xc22   :  { %v5025_v23 = vpop.eup %5024  ;;  %5032 = vtanh.f32 %v1145_v0  ;;  %v4138_v16 = vmul.f32 -1.442695, %v1145_v0 }
 0xc23   :  { %945 = vrot.lane.b32.xlu1 %v5025_v23, %s5451_s15  ;;  %5034 = vrcp.f32 %v606_v1 }
 0xc24   :  { %v5027_v12 = vpop.eup %5026  ;;  %5036 = vpow2.f32 %v4131_v13 }
 0xc25   :  { %947 = vrot.lane.b32.xlu0 %v5027_v12, %s5451_s15  ;;  %5038 = vpow2.f32 %v4132_v10 }
 0xc26   :  { %5040 = vpow2.f32 %v4137_v14 }
 0xc27   :  { %5042 = vpow2.f32 %v4138_v16 }
 0xc2a   :  { %v5029_v4 = vpop.eup %5028 }
 0xc2b   :  { %1164 = vrot.lane.b32.xlu1 %v5029_v4, %s5451_s15  ;;  %v5900_v32 = vpop.eup %5030 }
 0xc2c   :  { %v5033_v5 = vpop.eup %5032  ;;  %v623_v6 = vmul.f32 %v5900_v32, %v618_v15  ;;  %v613_v56 = vmul.f32 0.0, %v5900_v32 }
 0xc2d   :  { %1166 = vrot.lane.b32.xlu0 %v5033_v5, %s5451_s15  ;;  %v5904_v9 = vpop.eup %5034 }
 0xc2e   :  { %v624_v38 = vmul.f32 %v5904_v9, %v620_v7  ;;  %v5037_v18 = vpop.eup %5036  ;;  %v614_v0 = vmul.f32 0.0, %v5904_v9 }
 0xc2f   :  { %627 = vrot.lane.b32.xlu1 %v623_v6, %s5452_s16  ;;  %v5039_v24 = vpop.eup %5038  ;;  %v933_v27 = vadd.f32 1.0, %v5037_v18 }
 0xc30   :  { %v934_v29 = vadd.f32 1.0, %v5039_v24  ;;  %v5041_v36 = vpop.eup %5040 }
 0xc31   :  { %629 = vrot.lane.b32.xlu0 %v624_v38, %s5452_s16  ;;  %5044 = vrcp.f32 %v933_v27  ;;  %v5043_v43 = vpop.eup %5042  ;;  %v1152_v45 = vadd.f32 1.0, %v5041_v36 }
 0xc32   :  { %5046 = vrcp.f32 %v934_v29  ;;  %v1153_v40 = vadd.f32 1.0, %v5043_v43 }
 0xc33   :  { %5048 = vrcp.f32 %v1152_v45 }
 0xc34   :  { %5050 = vrcp.f32 %v1153_v40 }
 0xc3b   :  { %v5045_v41 = vpop.eup %5044 }
 0xc3c   :  { %v5047_v48 = vpop.eup %5046  ;;  %v941_v4 = vmul.f32 %v5045_v41, %v5731_v54 }
 0xc3d   :  { %v5049_v42 = vpop.eup %5048  ;;  %v942_v6 = vmul.f32 %v5047_v48, %v5735_v57 }
 0xc3e   :  { %v5051_v46 = vpop.eup %5050  ;;  %v1160_v13 = vmul.f32 %v5049_v42, %v5740_v60 }
 0xc3f   :  { %v1161_v16 = vmul.f32 %v5051_v46, %v5744_v63 }
 0xc95   :  { %v946_v44 = vpop.permute.xlu1 %945 }
 0xc96   :  { %v951_v35 = vmul.f32 %v5045_v41, %v946_v44 }
 0xc97   :  { %v948_v49 = vpop.permute.xlu0 %947 }
 0xc98   :  { %955 = vrot.lane.b32.xlu1 %v951_v35, %s5452_s16  ;;  %v952_v50 = vmul.f32 %v5047_v48, %v948_v49 }
 0xc9a   :  { %957 = vrot.lane.b32.xlu0 %v952_v50, %s5452_s16 }
 0xc9d   :  { %v1165_v51 = vpop.permute.xlu1 %1164 }
 0xc9e   :  { %v1170_v47 = vmul.f32 %v5049_v42, %v1165_v51 }
 0xc9f   :  { %v1167_v55 = vpop.permute.xlu0 %1166 }
 0xca0   :  { %1174 = vrot.lane.b32.xlu1 %v1170_v47, %s5452_s16  ;;  %v1171_v58 = vmul.f32 %v5051_v46, %v1167_v55 }
 0xca1   :  { %v628_v59 = vpop.permute.xlu1 %627 }
 0xca2   :  { %v5913_v61 = vadd.f32 %v628_v59, %v613_v56  ;;  %1176 = vrot.lane.b32.xlu0 %v1171_v58, %s5452_s16 }
 0xca3   :  { %v630_v33 = vpop.permute.xlu0 %629 }
 0xca4   :  { %5052 = vtanh.f32 %v5913_v61  ;;  %v5918_v1 = vadd.f32 %v630_v33, %v614_v0 }
 0xca6   :  { %5054 = vtanh.f32 %v5918_v1 }
 0xcae   :  { %v5053_v23 = vpop.eup %5052 }
 0xcaf   :  { %639 = vrot.lane.b32.xlu1 %v5053_v23, %s5453_s25 }
 0xcb0   :  { %v5055_v12 = vpop.eup %5054 }
 0xcb1   :  { %641 = vrot.lane.b32.xlu0 %v5055_v12, %s5453_s25 }
 0xd0a   :  { %v956_v15 = vpop.permute.xlu1 %955 }
 0xd0b   :  { %v5924_v5 = vadd.f32 %v956_v15, %v941_v4 }
 0xd0c   :  { %v958_v7 = vpop.permute.xlu0 %957 }
 0xd0d   :  { %5056 = vtanh.f32 %v5924_v5  ;;  %v5928_v38 = vadd.f32 %v958_v7, %v942_v6 }
 0xd0f   :  { %5058 = vtanh.f32 %v5928_v38 }
 0xd12   :  { %v1175_v10 = vpop.permute.xlu1 %1174 }
 0xd13   :  { %v5932_v14 = vadd.f32 %v1175_v10, %v1160_v13 }
 0xd14   :  { %v1177_v54 = vpop.permute.xlu0 %1176 }
 0xd15   :  { %5060 = vtanh.f32 %v5932_v14  ;;  %v5936_v18 = vadd.f32 %v1177_v54, %v1161_v16 }
 0xd17   :  { %v5057_v57 = vpop.eup %5056  ;;  %5062 = vtanh.f32 %v5936_v18 }
 0xd18   :  { %967 = vrot.lane.b32.xlu1 %v5057_v57, %s5453_s25 }
 0xd19   :  { %v5059_v24 = vpop.eup %5058 }
 0xd1a   :  { %969 = vrot.lane.b32.xlu0 %v5059_v24, %s5453_s25 }
 0xd1f   :  { %v5061_v27 = vpop.eup %5060 }
 0xd20   :  { %1186 = vrot.lane.b32.xlu1 %v5061_v27, %s5453_s25 }
 0xd21   :  { %v5063_v60 = vpop.eup %5062  ;;  %v640_v29 = vpop.permute.xlu1 %639 }
 0xd22   :  { %1188 = vrot.lane.b32.xlu0 %v5063_v60, %s5453_s25  ;;  %v5944_v36 = vmul.f32 %v5900_v32, %v640_v29 }
 0xd23   :  { %v642_v63 = vpop.permute.xlu0 %641 }
 0xd24   :  { %v5947_v43 = vmul.f32 %v5904_v9, %v642_v63 }
 0xd26   :  { %v4751_v45 = vpack.i.bf16 %v5947_v43, %v5944_v36 }
 0xd28   :  { %4752 = vrot.lane.b32.xlu0 %v4751_v45, %s5451_s15 }
 0xd2c   :  { %4762 = vrot.lane.b32.xlu0 %v5868_v8, %s5451_s15 }
 0xd8a   :  { %v968_v40 = vpop.permute.xlu1 %967 }
 0xd8b   :  { %v973_v35 = vmul.f32 %v5045_v41, %v968_v40 }
 0xd8c   :  { %v970_v44 = vpop.permute.xlu0 %969 }
 0xd8d   :  { %v974_v49 = vmul.f32 %v5047_v48, %v970_v44 }
 0xd8f   :  { %v5954_v50 = vpack.i.bf16 %v974_v49, %v973_v35 }
 0xd91   :  { %4747 = vrot.lane.b32.xlu1 %v5954_v50, %s5454_s28 }
 0xd92   :  { %v1187_v32 = vpop.permute.xlu1 %1186 }
 0xd93   :  { %v5958_v51 = vmul.f32 %v5049_v42, %v1187_v32 }
 0xd94   :  { %v1189_v9 = vpop.permute.xlu0 %1188 }
 0xd95   :  { %v5960_v47 = vmul.f32 %v5051_v46, %v1189_v9 }
 0xd97   :  { %v4756_v55 = vpack.i.bf16 %v5960_v47, %v5958_v51  ;;  %v1533_v8 = vpack.c.bf16 %v5960_v47, %v5958_v51 }
 0xd99   :  { %4757 = vrot.lane.b32.xlu1 %v4756_v55, %s5454_s28 }
 0xd9a   :  { %v4753_v41 = vpop.permute.xlu0 %4752 }
 0xd9b   :  { %v4755_v56 = vunpack.i.h.bf16 %v4753_v41  ;;  %v4754_v58 = vunpack.i.l.bf16 %v4753_v41 }
 0xd9e   :  { %v4763_v23 = vpop.permute.xlu0 %4762 }
 0xd9f   :  { %v4765_v6 = vunpack.i.h.bf16 %v4763_v23  ;;  %v4764_v7 = vunpack.i.l.bf16 %v4763_v23 }
 0xe03   :  { %v4748_v48 = vpop.permute.xlu1 %4747 }
 0xe04   :  { %v4750_v59 = vunpack.i.h.bf16 %v4748_v48  ;;  %v4749_v0 = vunpack.i.l.bf16 %v4748_v48 }
 0xe06   :  { %v989_v33 = vsel %vm217_vm5, %v4749_v0, %v4754_v58  ;;  %v990_v42 = vsel %vm217_vm5, %v4750_v59, %v4755_v56 }
 0xe07   :  { %v991_v46 = vpack.c.bf16 %v990_v42, %v989_v33 }
 0xe09   :  { %4446 = vmatmul.mubr.msk.bf16.vlgmr.msra.gmra.mrb[16].mxu0 %vm330_vm6, %v991_v46 }
 0xe0a   :  { %4458 = vmatpush3.bf16.msra.mxu0 %v5600_v28  ;;  %4463 = vmatprep.mubr.msk.bf16.mxu0 %vm5449_vm2, %v5448_v20 }
 0xe0b   :  { %v4758_v12 = vpop.permute.xlu1 %4757  ;;  %4459 = vmatprep.subr.bf16.mxu0 %v5448_v20 }
 0xe0c   :  { %v4760_v4 = vunpack.i.h.bf16 %v4758_v12  ;;  %v4759_v15 = vunpack.i.l.bf16 %v4758_v12 }
 0xe0e   :  { %4460 = vmatpush3.bf16.msra.mxu0 %v5606_v34  ;;  %v1208_v13 = vsel %vm217_vm5, %v4759_v15, %v4764_v7  ;;  %v1209_v10 = vsel %vm217_vm5, %v4760_v4, %v4765_v6 }
 0xe0f   :  { %4461 = vmatprep.subr.bf16.mxu0 %v5448_v20  ;;  %v1210_v16 = vpack.c.bf16 %v1209_v10, %v1208_v13 }
 0xe12   :  { %4462 = vmatpush3.bf16.msra.mxu0 %v5617_v39 }
 0xe13   :  { %4477 = vmatprep.subr.bf16.mxu0 %v5448_v20 }
 0xe15   :  { %4464 = vmatmul.mubr.msk.bf16.vlgmr.msra.gmra.mrb[20].mxu0 %vm330_vm6, %v1210_v16 }
 0xe16   :  { %4478 = vmatpush3.bf16.msra.mxu0 %v5758_v3  ;;  %4483 = vmatprep.mubr.msk.bf16.mxu0 %vm5449_vm2, %v5448_v20 }
 0xe17   :  { %4479 = vmatprep.subr.bf16.mxu0 %v5448_v20 }
 0xe1a   :  { %4480 = vmatpush3.bf16.msra.mxu0 %v5776_v11 }
 0xe1b   :  { %4481 = vmatprep.subr.bf16.mxu0 %v5448_v20 }
 0xe1e   :  { %4482 = vmatpush3.bf16.msra.mxu0 %v5791_v21 }
 0xe1f   :  { %4505 = vmatprep.subr.bf16.mxu0 %v5448_v20 }
 0xedc   :  { %v5989_v54 = vpop.f32.mrb[16].mxu0 }
 0xedd   :  { %v4447_v57 = vpop.f32.mrb[17].mxu0 }
 0xede   :  { %v5991_v24 = vpop.f32.mrb[18].mxu0 }
 0xedf   :  { %v4448_v27 = vpop.f32.mrb[19].mxu0 }
 0xee8   :  { %v1248_v60 = vpop.f32.mrb[20].mxu0 }
 0xee9   :  { %v1249_v29 = vadd.f32 %v1248_v60, %v5637_v53  ;;  %v4465_v63 = vpop.f32.mrb[21].mxu0 }
 0xeea   :  { %v1251_v45 = vpop.f32.mrb[22].mxu0 }
 0xeeb   :  { %5064 = vtanh.f32 %v1249_v29  ;;  %v4466_v40 = vpop.f32.mrb[23].mxu0  ;;  %v1252_v44 = vadd.f32 %v1251_v45, %v5637_v53  ;;  %v4140_v32 = vmul.f32 -1.442695, %v1249_v29 }
 0xeed   :  { %5066 = vtanh.f32 %v1252_v44  ;;  %v4141_v9 = vmul.f32 -1.442695, %v1252_v44 }
 0xeee   :  { %5068 = vpow2.f32 %v4140_v32 }
 0xeef   :  { %5070 = vpow2.f32 %v4141_v9 }
 0xef5   :  { %v5065_v35 = vpop.eup %5064 }
 0xef6   :  { %1273 = vrot.lane.b32.xlu1 %v5065_v35, %s5451_s15 }
 0xef7   :  { %v5067_v49 = vpop.eup %5066 }
 0xef8   :  { %1275 = vrot.lane.b32.xlu0 %v5067_v49, %s5451_s15  ;;  %v5069_v55 = vpop.eup %5068 }
 0xef9   :  { %v1261_v41 = vadd.f32 1.0, %v5069_v55  ;;  %v5071_v48 = vpop.eup %5070  ;;  %v1531_v55 = vld [vmem:[#allocation2 + $0x30] sm:$0xff] }
 0xefa   :  { %v1262_v56 = vadd.f32 1.0, %v5071_v48 }
 0xefb   :  { %5072 = vrcp.f32 %v1261_v41 }
 0xefc   :  { %5074 = vrcp.f32 %v1262_v56 }
 0xf05   :  { %v5073_v58 = vpop.eup %5072 }
 0xf06   :  { %v5075_v33 = vpop.eup %5074  ;;  %v1269_v23 = vmul.f32 %v5073_v58, %v5850_v62 }
 0xf07   :  { %v1270_v15 = vmul.f32 %v5075_v33, %v5855_v19 }
 0xf68   :  { %v1274_v59 = vpop.permute.xlu1 %1273 }
 0xf69   :  { %v1279_v0 = vmul.f32 %v5073_v58, %v1274_v59 }
 0xf6a   :  { %v1276_v42 = vpop.permute.xlu0 %1275 }
 0xf6b   :  { %1283 = vrot.lane.b32.xlu1 %v1279_v0, %s5452_s16  ;;  %v1280_v46 = vmul.f32 %v5075_v33, %v1276_v42 }
 0xf6d   :  { %1285 = vrot.lane.b32.xlu0 %v1280_v46, %s5452_s16 }
 0xfdd   :  { %v1284_v12 = vpop.permute.xlu1 %1283 }
 0xfde   :  { %v6000_v4 = vadd.f32 %v1284_v12, %v1269_v23 }
 0xfdf   :  { %v1286_v6 = vpop.permute.xlu0 %1285 }
 0xfe0   :  { %5076 = vtanh.f32 %v6000_v4  ;;  %v6004_v7 = vadd.f32 %v1286_v6, %v1270_v15 }
 0xfe2   :  { %5078 = vtanh.f32 %v6004_v7 }
 0xfea   :  { %v5077_v13 = vpop.eup %5076 }
 0xfeb   :  { %1295 = vrot.lane.b32.xlu1 %v5077_v13, %s5453_s25 }
 0xfec   :  { %v5079_v10 = vpop.eup %5078 }
 0xfed   :  { %1297 = vrot.lane.b32.xlu0 %v5079_v10, %s5453_s25 }
 0xff1   :  { %4772 = vrot.lane.b32.xlu0 %v5954_v50, %s5451_s15 }
0x105d   :  { %v1296_v62 = vpop.permute.xlu1 %1295 }
0x105e   :  { %v1301_v57 = vmul.f32 %v5073_v58, %v1296_v62  ;;  %v1532_v58 = vld [vmem:[#allocation2 + $0x38] sm:$0xff] }
0x105f   :  { %v1298_v16 = vpop.permute.xlu0 %1297 }
0x1060   :  { %v1302_v27 = vmul.f32 %v5075_v33, %v1298_v16 }
0x1062   :  { %v6011_v60 = vpack.i.bf16 %v1302_v27, %v1301_v57 }
0x1063   :  { %v4773_v19 = vpop.permute.xlu0 %4772 }
0x1064   :  { %4767 = vrot.lane.b32.xlu1 %v6011_v60, %s5454_s28  ;;  %v4775_v63 = vunpack.i.h.bf16 %v4773_v19  ;;  %v4774_v45 = vunpack.i.l.bf16 %v4773_v19 }
0x1068   :  { %1535 = vrot.lane.b32.xlu1 %v1533_v8, %s5454_s28 }
0x10d6   :  { %v4768_v29 = vpop.permute.xlu1 %4767 }
0x10d7   :  { %v4770_v40 = vunpack.i.h.bf16 %v4768_v29  ;;  %v4769_v50 = vunpack.i.l.bf16 %v4768_v29 }
0x10d9   :  { %v1317_v44 = vsel %vm217_vm5, %v4769_v50, %v4774_v45  ;;  %v1318_v35 = vsel %vm217_vm5, %v4770_v40, %v4775_v63 }
0x10da   :  { %v1319_v49 = vpack.c.bf16 %v1318_v35, %v1317_v44  ;;  %v1536_v51 = vpop.permute.xlu1 %1535 }
0x10dc   :  { %4474 = vmatmul.mubr.msk.bf16.vlgmr.msra.gmra.mrb[32].mxu1 %vm330_vm6, %v1319_v49  ;;  %v1033_v49 = vadd.f32 %v5991_v24, %v5858_v2  ;;  %v1030_v24 = vadd.f32 %v5989_v54, %v5858_v2 }
0x10dd   :  { %4488 = vmatpush3.bf16.msra.mxu1 %v5512_v17  ;;  %4491 = vmatprep.mubr.msk.bf16.mxu1 %vm5449_vm2, %v5448_v20 }
0x10de   :  { %4489 = vmatprep.subr.bf16.mxu1 %v5448_v20 }
0x10e1   :  { %4490 = vmatpush3.bf16.msra.mxu1 %v5535_v26 }
0x10e2   :  { %4495 = vmatprep.subr.bf16.mxu1 %v5448_v20 }
0x10e4   :  { %4492 = vmatmul.mubr.msk.bf16.vlgmr.msra.gmra.mrb[36].mxu1 %vm217_vm5, %v1536_v51 }
0x10e5   :  { %4496 = vmatpush3.bf16.msra.mxu1 %v5600_v28  ;;  %4501 = vmatprep.mubr.msk.bf16.mxu1 %vm5449_vm2, %v5448_v20 }
0x10e6   :  { %4497 = vmatprep.subr.bf16.mxu1 %v5448_v20 }
0x10e9   :  { %4498 = vmatpush3.bf16.msra.mxu1 %v5606_v34 }
0x10ea   :  { %4499 = vmatprep.subr.bf16.mxu1 %v5448_v20 }
0x10ed   :  { %4500 = vmatpush3.bf16.msra.mxu1 %v5617_v39 }
0x10ee   :  { %4515 = vmatprep.subr.bf16.mxu1 %v5448_v20 }
0x11af   :  { %v1357_v47 = vpop.f32.mrb[32].mxu1 }
0x11b0   :  { %v4475_v8 = vpop.f32.mrb[33].mxu1 }
0x11b1   :  { %v1360_v32 = vpop.f32.mrb[34].mxu1 }
0x11b2   :  { %v4476_v9 = vpop.f32.mrb[35].mxu1  ;;  %v1361_v8 = vadd.f32 %v1360_v32, %v5709_v52  ;;  %v1358_v32 = vadd.f32 %v1357_v47, %v5709_v52 }
0x11b7   :  { %v1574_v41 = vpop.f32.mrb[36].mxu1 }
0x11b8   :  { %v1581_v48 = vadd.f32 %v1574_v41, %v1531_v55  ;;  %v4493_v56 = vpop.f32.mrb[37].mxu1 }
0x11b9   :  { %v1577_v59 = vpop.f32.mrb[38].mxu1 }
0x11ba   :  { %5080 = vtanh.f32 %v1581_v48  ;;  %v1582_v0 = vadd.f32 %v1577_v59, %v1532_v58  ;;  %v4494_v33 = vpop.f32.mrb[39].mxu1  ;;  %v4149_v23 = vmul.f32 -1.442695, %v1581_v48 }
0x11bc   :  { %5082 = vtanh.f32 %v1582_v0  ;;  %v4150_v12 = vmul.f32 -1.442695, %v1582_v0 }
0x11bd   :  { %5084 = vpow2.f32 %v4149_v23 }
0x11be   :  { %5086 = vpow2.f32 %v4150_v12 }
0x11c4   :  { %v5081_v42 = vpop.eup %5080 }
0x11c5   :  { %1601 = vrot.lane.b32.xlu0 %v5081_v42, %s5451_s15 }
0x11c6   :  { %v5083_v46 = vpop.eup %5082 }
0x11c7   :  { %1603 = vrot.lane.b32.xlu1 %v5083_v46, %s5451_s15  ;;  %v5085_v15 = vpop.eup %5084 }
0x11c8   :  { %v5087_v6 = vpop.eup %5086  ;;  %v1589_v13 = vadd.f32 1.0, %v5085_v15 }
0x11c9   :  { %v1590_v10 = vadd.f32 1.0, %v5087_v6 }
0x11ca   :  { %5088 = vrcp.f32 %v1589_v13  ;;  %v4134_v13 = vmul.f32 -1.442695, %v1030_v24 }
0x11cb   :  { %5090 = vrcp.f32 %v1590_v10  ;;  %v4135_v10 = vmul.f32 -1.442695, %v1033_v49 }
0x11d4   :  { %v5089_v62 = vpop.eup %5088 }
0x11d5   :  { %v5091_v27 = vpop.eup %5090  ;;  %v1597_v63 = vmul.f32 %v5089_v62, %v5932_v14 }
0x11d6   :  { %v1598_v50 = vmul.f32 %v5091_v27, %v5936_v18 }
0x1237   :  { %v1602_v16 = vpop.permute.xlu0 %1601 }
0x1238   :  { %v1607_v57 = vmul.f32 %v5089_v62, %v1602_v16  ;;  %v4144_v16 = vmul.f32 -1.442695, %v1361_v8 }
0x1239   :  { %v1604_v19 = vpop.permute.xlu1 %1603 }
0x123a   :  { %1611 = vrot.lane.b32.xlu0 %v1607_v57, %s5452_s16  ;;  %v1608_v29 = vmul.f32 %v5091_v27, %v1604_v19 }
0x123c   :  { %1613 = vrot.lane.b32.xlu1 %v1608_v29, %s5452_s16 }
0x12ac   :  { %v1612_v45 = vpop.permute.xlu0 %1611 }
0x12ad   :  { %v6042_v40 = vadd.f32 %v1612_v45, %v1597_v63 }
0x12ae   :  { %v1614_v44 = vpop.permute.xlu1 %1613 }
0x12af   :  { %5092 = vtanh.f32 %v6042_v40  ;;  %v6046_v35 = vadd.f32 %v1614_v44, %v1598_v50 }
0x12b1   :  { %5094 = vtanh.f32 %v6046_v35 }
0x12b2   :  { %5096 = vtanh.f32 %v1033_v49 }
0x12b3   :  { %5098 = vtanh.f32 %v1361_v8 }
0x12b4   :  { %5100 = vtanh.f32 %v1030_v24 }
0x12b5   :  { %5102 = vtanh.f32 %v1358_v32 }
0x12b6   :  { %5104 = vpow2.f32 %v4134_v13 }
0x12b7   :  { %5106 = vpow2.f32 %v4135_v10 }
0x12b9   :  { %v5093_v51 = vpop.eup %5092 }
0x12ba   :  { %1623 = vrot.lane.b32.xlu0 %v5093_v51, %s5453_s25 }
0x12bb   :  { %v5095_v14 = vpop.eup %5094 }
0x12bc   :  { %1625 = vrot.lane.b32.xlu1 %v5095_v14, %s5453_s25  ;;  %v5097_v18 = vpop.eup %5096 }
0x12bd   :  { %v5099_v9 = vpop.eup %5098 }
0x12be   :  { %v5101_v59 = vpop.eup %5100 }
0x12bf   :  { %v5103_v54 = vpop.eup %5102 }
0x12c0   :  { %4782 = vrot.lane.b32.xlu1 %v6011_v60, %s5451_s15  ;;  %v5105_v57 = vpop.eup %5104 }
0x12c1   :  { %v5107_v19 = vpop.eup %5106  ;;  %v1042_v29 = vadd.f32 1.0, %v5105_v57 }
0x12c2   :  { %v1043_v49 = vadd.f32 1.0, %v5107_v19 }
0x12c4   :  { %1056 = vrot.lane.b32.xlu1 %v5097_v18, %s5451_s15 }
0x12c8   :  { %1384 = vrot.lane.b32.xlu1 %v5099_v9, %s5451_s15 }
0x132c   :  { %v1624_v55 = vpop.permute.xlu0 %1623 }
0x132d   :  { %v6061_v48 = vmul.f32 %v5089_v62, %v1624_v55  ;;  %v4143_v62 = vmul.f32 -1.442695, %v1358_v32 }
0x132e   :  { %v1626_v41 = vpop.permute.xlu1 %1625 }
0x132f   :  { %v6063_v56 = vmul.f32 %v5091_v27, %v1626_v41  ;;  %5108 = vpow2.f32 %v4143_v62 }
0x1330   :  { %5110 = vpow2.f32 %v4144_v16 }
0x1331   :  { %v4776_v60 = vpack.i.bf16 %v6063_v56, %v6061_v48  ;;  %v1970_v58 = vpack.c.bf16 %v6063_v56, %v6061_v48 }
0x1332   :  { %v4783_v47 = vpop.permute.xlu1 %4782 }
0x1333   :  { %4777 = vrot.lane.b32.xlu0 %v4776_v60, %s5454_s28  ;;  %v4785_v33 = vunpack.i.h.bf16 %v4783_v47  ;;  %v4784_v42 = vunpack.i.l.bf16 %v4783_v47 }
0x1336   :  { %v1057_v55 = vpop.permute.xlu1 %1056 }
0x1337   :  { %1054 = vrot.lane.b32.xlu0 %v5101_v59, %s5451_s15 }
0x1339   :  { %v5109_v50 = vpop.eup %5108 }
0x133a   :  { %v5111_v18 = vpop.eup %5110  ;;  %v1370_v9 = vadd.f32 1.0, %v5109_v50 }
0x133b   :  { %1382 = vrot.lane.b32.xlu0 %v5103_v54, %s5451_s15  ;;  %v1371_v8 = vadd.f32 1.0, %v5111_v18 }
0x13a5   :  { %v4778_v0 = vpop.permute.xlu0 %4777 }
0x13a6   :  { %v4780_v46 = vunpack.i.h.bf16 %v4778_v0  ;;  %v4779_v23 = vunpack.i.l.bf16 %v4778_v0 }
0x13a8   :  { %v1645_v12 = vsel %vm217_vm5, %v4779_v23, %v4784_v42  ;;  %v1646_v15 = vsel %vm217_vm5, %v4780_v46, %v4785_v33  ;;  %v1385_v42 = vpop.permute.xlu1 %1384 }
0x13a9   :  { %v1647_v6 = vpack.c.bf16 %v1646_v15, %v1645_v12  ;;  %v1055_v24 = vpop.permute.xlu0 %1054 }
0x13ab   :  { %4502 = vmatmul.mubr.msk.bf16.vlgmr.msra.gmra.mrb[40].mxu1 %vm330_vm6, %v1647_v6 }
0x13ac   :  { %4516 = vmatpush3.bf16.msra.mxu1 %v5758_v3  ;;  %4521 = vmatprep.mubr.msk.bf16.mxu1 %vm5449_vm2, %v5448_v20 }
0x13ad   :  { %4517 = vmatprep.subr.bf16.mxu1 %v5448_v20  ;;  %v1383_v54 = vpop.permute.xlu0 %1382 }
0x13b0   :  { %4518 = vmatpush3.bf16.msra.mxu1 %v5776_v11 }
0x13b1   :  { %4519 = vmatprep.subr.bf16.mxu1 %v5448_v20 }
0x13b4   :  { %4520 = vmatpush3.bf16.msra.mxu1 %v5791_v21 }
0x13b5   :  { %4543 = vmatprep.subr.bf16.mxu1 %v5448_v20 }
0x147e   :  { %v1685_v27 = vpop.f32.mrb[40].mxu1 }
0x147f   :  { %v1686_v63 = vadd.f32 %v1685_v27, %v5637_v53  ;;  %v4503_v45 = vpop.f32.mrb[41].mxu1 }
0x1480   :  { %v1688_v44 = vpop.f32.mrb[42].mxu1 }
0x1481   :  { %5112 = vtanh.f32 %v1686_v63  ;;  %v1689_v51 = vadd.f32 %v1688_v44, %v5637_v53  ;;  %v4504_v14 = vpop.f32.mrb[43].mxu1  ;;  %v4152_v15 = vmul.f32 -1.442695, %v1686_v63 }
0x1482   :  { %5114 = vrcp.f32 %v1042_v29 }
0x1483   :  { %5116 = vtanh.f32 %v1689_v51  ;;  %v4153_v6 = vmul.f32 -1.442695, %v1689_v51 }
0x1484   :  { %5118 = vrcp.f32 %v1043_v49 }
0x1485   :  { %5120 = vrcp.f32 %v1370_v9 }
0x1486   :  { %5122 = vrcp.f32 %v1371_v8 }
0x1487   :  { %5124 = vpow2.f32 %v4152_v15 }
0x1488   :  { %5126 = vpow2.f32 %v4153_v6 }
0x148b   :  { %v5113_v32 = vpop.eup %5112 }
0x148c   :  { %1710 = vrot.lane.b32.xlu0 %v5113_v32, %s5451_s15  ;;  %v6086_v41 = vpop.eup %5114 }
0x148d   :  { %v5117_v60 = vpop.eup %5116  ;;  %v1060_v59 = vmul.f32 %v6086_v41, %v1055_v24  ;;  %v1050_v50 = vmul.f32 %v6086_v41, %v5913_v61 }
0x148e   :  { %1712 = vrot.lane.b32.xlu1 %v5117_v60, %s5451_s15  ;;  %v6090_v47 = vpop.eup %5118 }
0x148f   :  { %v6093_v0 = vpop.eup %5120  ;;  %v1061_v33 = vmul.f32 %v6090_v47, %v1057_v55  ;;  %v1051_v14 = vmul.f32 %v6090_v47, %v5918_v1 }
0x1490   :  { %1064 = vrot.lane.b32.xlu0 %v1060_v59, %s5452_s16  ;;  %v1388_v46 = vmul.f32 %v6093_v0, %v1383_v54  ;;  %v6098_v23 = vpop.eup %5122  ;;  %v1378_v18 = vmul.f32 %v6093_v0, %v5924_v5 }
0x1491   :  { %v1389_v12 = vmul.f32 %v6098_v23, %v1385_v42  ;;  %v5125_v13 = vpop.eup %5124  ;;  %v1379_v61 = vmul.f32 %v6098_v23, %v5928_v38 }
0x1492   :  { %1066 = vrot.lane.b32.xlu1 %v1061_v33, %s5452_s16  ;;  %v5127_v10 = vpop.eup %5126  ;;  %v1698_v62 = vadd.f32 1.0, %v5125_v13 }
0x1493   :  { %v1699_v16 = vadd.f32 1.0, %v5127_v10 }
0x1494   :  { %1392 = vrot.lane.b32.xlu0 %v1388_v46, %s5452_s16  ;;  %5128 = vrcp.f32 %v1698_v62 }
0x1495   :  { %5130 = vrcp.f32 %v1699_v16 }
0x1496   :  { %1394 = vrot.lane.b32.xlu1 %v1389_v12, %s5452_s16 }
0x149e   :  { %v5129_v57 = vpop.eup %5128 }
0x149f   :  { %v5131_v29 = vpop.eup %5130  ;;  %v1706_v38 = vmul.f32 %v5129_v57, %v6000_v4 }
0x14a0   :  { %v1707_v42 = vmul.f32 %v5131_v29, %v6004_v7 }
0x14fe   :  { %v1711_v27 = vpop.permute.xlu0 %1710 }
0x14ff   :  { %v1716_v19 = vmul.f32 %v5129_v57, %v1711_v27 }
0x1500   :  { %v1713_v45 = vpop.permute.xlu1 %1712 }
0x1501   :  { %1720 = vrot.lane.b32.xlu0 %v1716_v19, %s5452_s16  ;;  %v1717_v63 = vmul.f32 %v5131_v29, %v1713_v45 }
0x1502   :  { %v1065_v44 = vpop.permute.xlu0 %1064 }
0x1503   :  { %v6106_v51 = vadd.f32 %v1065_v44, %v1050_v50  ;;  %1722 = vrot.lane.b32.xlu1 %v1717_v63, %s5452_s16 }
0x1504   :  { %v1067_v49 = vpop.permute.xlu1 %1066 }
0x1505   :  { %5132 = vtanh.f32 %v6106_v51  ;;  %v6114_v9 = vadd.f32 %v1067_v49, %v1051_v14 }
0x1506   :  { %v1393_v8 = vpop.permute.xlu0 %1392 }
0x1507   :  { %v6116_v24 = vadd.f32 %v1393_v8, %v1378_v18  ;;  %5134 = vtanh.f32 %v6114_v9 }
0x1508   :  { %v1395_v32 = vpop.permute.xlu1 %1394 }
0x1509   :  { %5136 = vtanh.f32 %v6116_v24  ;;  %v6122_v1 = vadd.f32 %v1395_v32, %v1379_v61 }
0x150b   :  { %5138 = vtanh.f32 %v6122_v1 }
0x150f   :  { %v5133_v55 = vpop.eup %5132 }
0x1510   :  { %1076 = vrot.lane.b32.xlu0 %v5133_v55, %s5453_s25 }
0x1511   :  { %v5135_v5 = vpop.eup %5134 }
0x1512   :  { %1078 = vrot.lane.b32.xlu1 %v5135_v5, %s5453_s25 }
0x1513   :  { %v5137_v60 = vpop.eup %5136 }
0x1514   :  { %1404 = vrot.lane.b32.xlu0 %v5137_v60, %s5453_s25 }
0x1515   :  { %v5139_v59 = vpop.eup %5138 }
0x1516   :  { %1406 = vrot.lane.b32.xlu1 %v5139_v59, %s5453_s25 }
0x1573   :  { %v1721_v54 = vpop.permute.xlu0 %1720 }
0x1574   :  { %v6130_v33 = vadd.f32 %v1721_v54, %v1706_v38 }
0x1575   :  { %v1723_v46 = vpop.permute.xlu1 %1722 }
0x1576   :  { %5140 = vtanh.f32 %v6130_v33  ;;  %v6134_v12 = vadd.f32 %v1723_v46, %v1707_v42 }
0x1578   :  { %5142 = vtanh.f32 %v6134_v12 }
0x1580   :  { %v5141_v15 = vpop.eup %5140 }
0x1581   :  { %1732 = vrot.lane.b32.xlu0 %v5141_v15, %s5453_s25 }
0x1582   :  { %v1077_v6 = vpop.permute.xlu0 %1076  ;;  %v5143_v13 = vpop.eup %5142 }
0x1583   :  { %1734 = vrot.lane.b32.xlu1 %v5143_v13, %s5453_s25  ;;  %v6140_v10 = vmul.f32 %v6086_v41, %v1077_v6 }
0x1584   :  { %v1079_v4 = vpop.permute.xlu1 %1078 }
0x1585   :  { %v6143_v7 = vmul.f32 %v6090_v47, %v1079_v4 }
0x1586   :  { %v1405_v62 = vpop.permute.xlu0 %1404 }
0x1587   :  { %v4791_v16 = vpack.i.bf16 %v6143_v7, %v6140_v10  ;;  %v1410_v19 = vmul.f32 %v6093_v0, %v1405_v62 }
0x1588   :  { %v1407_v27 = vpop.permute.xlu1 %1406 }
0x1589   :  { %v1411_v45 = vmul.f32 %v6098_v23, %v1407_v27  ;;  %4792 = vrot.lane.b32.xlu1 %v4791_v16, %s5451_s15 }
0x158b   :  { %v4801_v50 = vpack.i.bf16 %v1411_v45, %v1410_v19  ;;  %v1968_v19 = vld [vmem:[#allocation2 + $0x40] sm:$0xff] }
0x158d   :  { %4787 = vrot.lane.b32.xlu0 %v4801_v50, %s5454_s28  ;;  %4802 = vrot.lane.b32.xlu1 %v4801_v50, %s5451_s15 }
0x15f3   :  { %v1733_v41 = vpop.permute.xlu0 %1732 }
0x15f4   :  { %v1738_v47 = vmul.f32 %v5129_v57, %v1733_v41 }
0x15f5   :  { %v1735_v63 = vpop.permute.xlu1 %1734 }
0x15f6   :  { %v1739_v44 = vmul.f32 %v5131_v29, %v1735_v63  ;;  %v1969_v63 = vld [vmem:[#allocation2 + $0x48] sm:$0xff] }
0x15f8   :  { %v6152_v14 = vpack.i.bf16 %v1739_v44, %v1738_v47 }
0x15fa   :  { %4797 = vrot.lane.b32.xlu0 %v6152_v14, %s5454_s28 }
0x15fb   :  { %v4793_v49 = vpop.permute.xlu1 %4792 }
0x15fc   :  { %v4795_v23 = vunpack.i.h.bf16 %v4793_v49  ;;  %v4794_v18 = vunpack.i.l.bf16 %v4793_v49 }
0x15fe   :  { %1972 = vrot.lane.b32.xlu0 %v1970_v58, %s5454_s28 }
0x15ff   :  { %v4788_v0 = vpop.permute.xlu0 %4787  ;;  %v4803_v48 = vpop.permute.xlu1 %4802 }
0x1600   :  { %v4790_v8 = vunpack.i.h.bf16 %v4788_v0  ;;  %v4789_v61 = vunpack.i.l.bf16 %v4788_v0  ;;  %v4805_v58 = vunpack.i.h.bf16 %v4803_v48  ;;  %v4804_v55 = vunpack.i.l.bf16 %v4803_v48 }
0x1602   :  { %v1426_v32 = vsel %vm217_vm5, %v4789_v61, %v4794_v18  ;;  %v1427_v57 = vsel %vm217_vm5, %v4790_v8, %v4795_v23 }
0x1603   :  { %v1428_v29 = vpack.c.bf16 %v1427_v57, %v1426_v32 }
0x1605   :  { %4484 = vmatmul.mubr.msk.bf16.vlgmr.msra.gmra.mrb[24].mxu0 %vm330_vm6, %v1428_v29 }
0x1606   :  { %4506 = vmatpush3.bf16.msra.mxu0 %v5660_v22  ;;  %4511 = vmatprep.mubr.msk.bf16.mxu0 %vm5449_vm2, %v5448_v20 }
0x1607   :  { %4507 = vmatprep.subr.bf16.mxu0 %v5448_v20 }
0x160a   :  { %4508 = vmatpush3.bf16.msra.mxu0 %v5666_v25 }
0x160b   :  { %4509 = vmatprep.subr.bf16.mxu0 %v5448_v20 }
0x160e   :  { %4510 = vmatpush3.bf16.msra.mxu0 %v5681_v37 }
0x160f   :  { %4525 = vmatprep.subr.bf16.mxu0 %v5448_v20 }
0x166c   :  { %v4798_v56 = vpop.permute.xlu0 %4797 }
0x166d   :  { %v4800_v5 = vunpack.i.h.bf16 %v4798_v56  ;;  %v4799_v60 = vunpack.i.l.bf16 %v4798_v56 }
0x166f   :  { %v1754_v59 = vsel %vm217_vm5, %v4799_v60, %v4804_v55  ;;  %v1755_v38 = vsel %vm217_vm5, %v4800_v5, %v4805_v58 }
0x1670   :  { %v1756_v54 = vpack.c.bf16 %v1755_v38, %v1754_v59  ;;  %v1973_v42 = vpop.permute.xlu0 %1972 }
0x1672   :  { %4512 = vmatmul.mubr.msk.bf16.vlgmr.msra.gmra.mrb[28].mxu0 %vm330_vm6, %v1756_v54 }
0x1673   :  { %4526 = vmatpush3.bf16.msra.mxu0 %v5512_v17  ;;  %4529 = vmatprep.mubr.msk.bf16.mxu0 %vm5449_vm2, %v5448_v20 }
0x1674   :  { %4527 = vmatprep.subr.bf16.mxu0 %v5448_v20 }
0x1677   :  { %4528 = vmatpush3.bf16.msra.mxu0 %v5535_v26 }
0x1678   :  { %4533 = vmatprep.subr.bf16.mxu0 %v5448_v20 }
0x167a   :  { %4530 = vmatmul.mubr.msk.bf16.vlgmr.msra.gmra.mrb[32].mxu0 %vm217_vm5, %v1973_v42 }
0x167b   :  { %4534 = vmatpush3.bf16.msra.mxu0 %v5600_v28  ;;  %4539 = vmatprep.mubr.msk.bf16.mxu0 %vm5449_vm2, %v5448_v20 }
0x167c   :  { %4535 = vmatprep.subr.bf16.mxu0 %v5448_v20 }
0x167f   :  { %4536 = vmatpush3.bf16.msra.mxu0 %v5606_v34 }
0x1680   :  { %4537 = vmatprep.subr.bf16.mxu0 %v5448_v20 }
0x1683   :  { %4538 = vmatpush3.bf16.msra.mxu0 %v5617_v39 }
0x1684   :  { %4553 = vmatprep.subr.bf16.mxu0 %v5448_v20 }
0x16d8   :  { %v1466_v46 = vpop.f32.mrb[24].mxu0 }
0x16d9   :  { %v4485_v15 = vpop.f32.mrb[25].mxu0 }
0x16da   :  { %v1469_v6 = vpop.f32.mrb[26].mxu0 }
0x16db   :  { %v4486_v13 = vpop.f32.mrb[27].mxu0 }
0x1745   :  { %v1794_v4 = vpop.f32.mrb[28].mxu0 }
0x1746   :  { %v4513_v62 = vpop.f32.mrb[29].mxu0 }
0x1747   :  { %v1797_v16 = vpop.f32.mrb[30].mxu0  ;;  %v1470_v62 = vadd.f32 %v1469_v6, %v5858_v2  ;;  %v1467_v6 = vadd.f32 %v1466_v46, %v5858_v2 }
0x1748   :  { %v4514_v27 = vpop.f32.mrb[31].mxu0 }
0x174d   :  { %v2011_v45 = vpop.f32.mrb[32].mxu0 }
0x174e   :  { %v2018_v50 = vadd.f32 %v2011_v45, %v1968_v19  ;;  %v4531_v41 = vpop.f32.mrb[33].mxu0  ;;  %v1798_v19 = vadd.f32 %v1797_v16, %v5709_v52  ;;  %v1795_v16 = vadd.f32 %v1794_v4, %v5709_v52 }
0x174f   :  { %v2014_v47 = vpop.f32.mrb[34].mxu0 }
0x1750   :  { %5144 = vtanh.f32 %v2018_v50  ;;  %v2019_v44 = vadd.f32 %v2014_v47, %v1969_v63  ;;  %v4532_v49 = vpop.f32.mrb[35].mxu0  ;;  %v4161_v18 = vmul.f32 -1.442695, %v2018_v50 }
0x1752   :  { %5146 = vtanh.f32 %v2019_v44  ;;  %v4162_v8 = vmul.f32 -1.442695, %v2019_v44 }
0x1753   :  { %5148 = vpow2.f32 %v4161_v18 }
0x1754   :  { %5150 = vpow2.f32 %v4162_v8 }
0x175a   :  { %v5145_v0 = vpop.eup %5144 }
0x175b   :  { %2038 = vrot.lane.b32.xlu1 %v5145_v0, %s5451_s15 }
0x175c   :  { %v5147_v23 = vpop.eup %5146 }
0x175d   :  { %2040 = vrot.lane.b32.xlu0 %v5147_v23, %s5451_s15  ;;  %v5149_v61 = vpop.eup %5148 }
0x175e   :  { %v5151_v32 = vpop.eup %5150  ;;  %v2026_v57 = vadd.f32 1.0, %v5149_v61 }
0x175f   :  { %v2027_v29 = vadd.f32 1.0, %v5151_v32 }
0x1760   :  { %5152 = vrcp.f32 %v2026_v57 }
0x1761   :  { %5154 = vrcp.f32 %v2027_v29 }
0x176a   :  { %v5153_v48 = vpop.eup %5152 }
0x176b   :  { %v5155_v55 = vpop.eup %5154  ;;  %v2034_v59 = vmul.f32 %v5153_v48, %v6042_v40 }
0x176c   :  { %v2035_v42 = vmul.f32 %v5155_v55, %v6046_v35 }
0x17cd   :  { %v2039_v56 = vpop.permute.xlu1 %2038 }
0x17ce   :  { %v2044_v58 = vmul.f32 %v5153_v48, %v2039_v56  ;;  %v4147_v56 = vmul.f32 -1.442695, %v1470_v62 }
0x17cf   :  { %v2041_v5 = vpop.permute.xlu0 %2040 }
0x17d0   :  { %2048 = vrot.lane.b32.xlu1 %v2044_v58, %s5452_s16  ;;  %v2045_v60 = vmul.f32 %v5155_v55, %v2041_v5  ;;  %v4155_v58 = vmul.f32 -1.442695, %v1795_v16 }
0x17d2   :  { %2050 = vrot.lane.b32.xlu0 %v2045_v60, %s5452_s16 }
0x1842   :  { %v2049_v38 = vpop.permute.xlu1 %2048 }
0x1843   :  { %v6194_v54 = vadd.f32 %v2049_v38, %v2034_v59 }
0x1844   :  { %v2051_v15 = vpop.permute.xlu0 %2050 }
0x1845   :  { %5156 = vtanh.f32 %v6194_v54  ;;  %v6198_v13 = vadd.f32 %v2051_v15, %v2035_v42 }
0x1847   :  { %5158 = vtanh.f32 %v6198_v13 }
0x1848   :  { %5160 = vtanh.f32 %v1470_v62 }
0x1849   :  { %5162 = vtanh.f32 %v1798_v19 }
0x184a   :  { %5164 = vtanh.f32 %v1467_v6 }
0x184b   :  { %5166 = vtanh.f32 %v1795_v16 }
0x184f   :  { %v5157_v27 = vpop.eup %5156 }
0x1850   :  { %2060 = vrot.lane.b32.xlu1 %v5157_v27, %s5453_s25 }
0x1851   :  { %v5159_v40 = vpop.eup %5158 }
0x1852   :  { %2062 = vrot.lane.b32.xlu0 %v5159_v40, %s5453_s25  ;;  %v5161_v35 = vpop.eup %5160 }
0x1853   :  { %v5163_v45 = vpop.eup %5162 }
0x1854   :  { %v5165_v49 = vpop.eup %5164 }
0x1855   :  { %v5167_v46 = vpop.eup %5166 }
0x1856   :  { %4812 = vrot.lane.b32.xlu0 %v6152_v14, %s5451_s15 }
0x185a   :  { %1493 = vrot.lane.b32.xlu0 %v5161_v35, %s5451_s15 }
0x185e   :  { %1821 = vrot.lane.b32.xlu0 %v5163_v45, %s5451_s15 }
0x18c2   :  { %v2061_v50 = vpop.permute.xlu1 %2060 }
0x18c3   :  { %v6211_v63 = vmul.f32 %v5153_v48, %v2061_v50  ;;  %v4146_v48 = vmul.f32 -1.442695, %v1467_v6 }
0x18c4   :  { %v2063_v41 = vpop.permute.xlu0 %2062 }
0x18c5   :  { %v6213_v47 = vmul.f32 %v5155_v55, %v2063_v41  ;;  %5168 = vpow2.f32 %v4146_v48  ;;  %v4156_v55 = vmul.f32 -1.442695, %v1798_v19 }
0x18c6   :  { %5170 = vpow2.f32 %v4147_v56 }
0x18c7   :  { %v4806_v14 = vpack.i.bf16 %v6213_v47, %v6211_v63  ;;  %v2407_v44 = vpack.c.bf16 %v6213_v47, %v6211_v63  ;;  %5172 = vpow2.f32 %v4155_v58 }
0x18c8   :  { %v4813_v4 = vpop.permute.xlu0 %4812  ;;  %5174 = vpow2.f32 %v4156_v55 }
0x18c9   :  { %4807 = vrot.lane.b32.xlu1 %v4806_v14, %s5454_s28  ;;  %v4815_v23 = vunpack.i.h.bf16 %v4813_v4  ;;  %v4814_v18 = vunpack.i.l.bf16 %v4813_v4 }
0x18cc   :  { %v1494_v14 = vpop.permute.xlu0 %1493 }
0x18cd   :  { %1491 = vrot.lane.b32.xlu1 %v5165_v49, %s5451_s15 }
0x18cf   :  { %v5169_v5 = vpop.eup %5168 }
0x18d0   :  { %v5171_v59 = vpop.eup %5170  ;;  %v1479_v38 = vadd.f32 1.0, %v5169_v5 }
0x18d1   :  { %1819 = vrot.lane.b32.xlu1 %v5167_v46, %s5451_s15  ;;  %v5173_v27 = vpop.eup %5172  ;;  %v1480_v62 = vadd.f32 1.0, %v5171_v59 }
0x18d2   :  { %v5175_v6 = vpop.eup %5174  ;;  %v1807_v16 = vadd.f32 1.0, %v5173_v27 }
0x18d3   :  { %v1808_v19 = vadd.f32 1.0, %v5175_v6 }
0x193b   :  { %v4808_v0 = vpop.permute.xlu1 %4807 }
0x193c   :  { %v4810_v8 = vunpack.i.h.bf16 %v4808_v0  ;;  %v4809_v61 = vunpack.i.l.bf16 %v4808_v0 }
0x193e   :  { %v2082_v32 = vsel %vm217_vm5, %v4809_v61, %v4814_v18  ;;  %v2083_v57 = vsel %vm217_vm5, %v4810_v8, %v4815_v23  ;;  %v1822_v61 = vpop.permute.xlu0 %1821 }
0x193f   :  { %v2084_v29 = vpack.c.bf16 %v2083_v57, %v2082_v32  ;;  %v1492_v50 = vpop.permute.xlu1 %1491 }
0x1941   :  { %4540 = vmatmul.mubr.msk.bf16.vlgmr.msra.gmra.mrb[36].mxu0 %vm330_vm6, %v2084_v29 }
0x1942   :  { %4554 = vmatpush3.bf16.msra.mxu0 %v5758_v3  ;;  %4559 = vmatprep.mubr.msk.bf16.mxu0 %vm5449_vm2, %v5448_v20 }
0x1943   :  { %4555 = vmatprep.subr.bf16.mxu0 %v5448_v20  ;;  %v1820_v0 = vpop.permute.xlu1 %1819 }
0x1946   :  { %4556 = vmatpush3.bf16.msra.mxu0 %v5776_v11 }
0x1947   :  { %4557 = vmatprep.subr.bf16.mxu0 %v5448_v20 }
0x194a   :  { %4558 = vmatpush3.bf16.msra.mxu0 %v5791_v21 }
0x194b   :  { %4581 = vmatprep.subr.bf16.mxu0 %v5448_v20 }
0x1a14   :  { %v2122_v60 = vpop.f32.mrb[36].mxu0 }
0x1a15   :  { %v2123_v42 = vadd.f32 %v2122_v60, %v5637_v53  ;;  %v4541_v15 = vpop.f32.mrb[37].mxu0 }
0x1a16   :  { %v2125_v40 = vpop.f32.mrb[38].mxu0 }
0x1a17   :  { %5176 = vtanh.f32 %v2123_v42  ;;  %v2126_v35 = vadd.f32 %v2125_v40, %v5637_v53  ;;  %v4542_v45 = vpop.f32.mrb[39].mxu0  ;;  %v4164_v48 = vmul.f32 -1.442695, %v2123_v42 }
0x1a18   :  { %5178 = vrcp.f32 %v1479_v38 }
0x1a19   :  { %5180 = vtanh.f32 %v2126_v35  ;;  %v4165_v56 = vmul.f32 -1.442695, %v2126_v35 }
0x1a1a   :  { %5182 = vrcp.f32 %v1480_v62 }
0x1a1b   :  { %5184 = vrcp.f32 %v1807_v16 }
0x1a1c   :  { %5186 = vrcp.f32 %v1808_v19 }
0x1a1d   :  { %5188 = vpow2.f32 %v4164_v48 }
0x1a1e   :  { %5190 = vpow2.f32 %v4165_v56 }
0x1a21   :  { %v5177_v41 = vpop.eup %5176 }
0x1a22   :  { %2147 = vrot.lane.b32.xlu1 %v5177_v41, %s5451_s15  ;;  %v6236_v49 = vpop.eup %5178 }
0x1a23   :  { %v5181_v46 = vpop.eup %5180  ;;  %v1497_v4 = vmul.f32 %v6236_v49, %v1492_v50  ;;  %v1487_v45 = vmul.f32 %v6236_v49, %v6106_v51 }
0x1a24   :  { %2149 = vrot.lane.b32.xlu0 %v5181_v46, %s5451_s15  ;;  %v6240_v23 = vpop.eup %5182 }
0x1a25   :  { %v6243_v18 = vpop.eup %5184  ;;  %v1498_v8 = vmul.f32 %v6240_v23, %v1494_v14  ;;  %v1488_v6 = vmul.f32 %v6240_v23, %v6114_v9 }
0x1a26   :  { %1501 = vrot.lane.b32.xlu1 %v1497_v4, %s5452_s16  ;;  %v1825_v32 = vmul.f32 %v6243_v18, %v1820_v0  ;;  %v6248_v57 = vpop.eup %5186  ;;  %v1815_v19 = vmul.f32 %v6243_v18, %v6116_v24 }
0x1a27   :  { %v1826_v29 = vmul.f32 %v6248_v57, %v1822_v61  ;;  %v5189_v58 = vpop.eup %5188  ;;  %v1816_v51 = vmul.f32 %v6248_v57, %v6122_v1 }
0x1a28   :  { %1503 = vrot.lane.b32.xlu0 %v1498_v8, %s5452_s16  ;;  %v5191_v55 = vpop.eup %5190  ;;  %v2135_v5 = vadd.f32 1.0, %v5189_v58 }
0x1a29   :  { %v2136_v60 = vadd.f32 1.0, %v5191_v55 }
0x1a2a   :  { %1829 = vrot.lane.b32.xlu1 %v1825_v32, %s5452_s16  ;;  %5192 = vrcp.f32 %v2135_v5 }
0x1a2b   :  { %5194 = vrcp.f32 %v2136_v60 }
0x1a2c   :  { %1831 = vrot.lane.b32.xlu0 %v1826_v29, %s5452_s16 }
0x1a34   :  { %v5193_v59 = vpop.eup %5192 }
0x1a35   :  { %v5195_v27 = vpop.eup %5194  ;;  %v2143_v1 = vmul.f32 %v5193_v59, %v6130_v33 }
0x1a36   :  { %v2144_v29 = vmul.f32 %v5195_v27, %v6134_v12 }
0x1a94   :  { %v2148_v38 = vpop.permute.xlu1 %2147 }
0x1a95   :  { %v2153_v15 = vmul.f32 %v5193_v59, %v2148_v38 }
0x1a96   :  { %v2150_v40 = vpop.permute.xlu0 %2149 }
0x1a97   :  { %2157 = vrot.lane.b32.xlu1 %v2153_v15, %s5452_s16  ;;  %v2154_v42 = vmul.f32 %v5195_v27, %v2150_v40 }
0x1a98   :  { %v1502_v35 = vpop.permute.xlu1 %1501 }
0x1a99   :  { %v6256_v62 = vadd.f32 %v1502_v35, %v1487_v45  ;;  %2159 = vrot.lane.b32.xlu0 %v2154_v42, %s5452_s16 }
0x1a9a   :  { %v1504_v16 = vpop.permute.xlu0 %1503 }
0x1a9b   :  { %5196 = vtanh.f32 %v6256_v62  ;;  %v6264_v50 = vadd.f32 %v1504_v16, %v1488_v6 }
0x1a9c   :  { %v1830_v41 = vpop.permute.xlu1 %1829 }
0x1a9d   :  { %v6266_v14 = vadd.f32 %v1830_v41, %v1815_v19  ;;  %5198 = vtanh.f32 %v6264_v50 }
0x1a9e   :  { %v1832_v46 = vpop.permute.xlu0 %1831 }
0x1a9f   :  { %5200 = vtanh.f32 %v6266_v14  ;;  %v6272_v9 = vadd.f32 %v1832_v46, %v1816_v51 }
0x1aa1   :  { %5202 = vtanh.f32 %v6272_v9 }
0x1aa5   :  { %v5197_v4 = vpop.eup %5196 }
0x1aa6   :  { %1513 = vrot.lane.b32.xlu1 %v5197_v4, %s5453_s25 }
0x1aa7   :  { %v5199_v24 = vpop.eup %5198 }
0x1aa8   :  { %1515 = vrot.lane.b32.xlu0 %v5199_v24, %s5453_s25 }
0x1aa9   :  { %v5201_v0 = vpop.eup %5200 }
0x1aaa   :  { %1841 = vrot.lane.b32.xlu1 %v5201_v0, %s5453_s25 }
0x1aab   :  { %v5203_v8 = vpop.eup %5202 }
0x1aac   :  { %1843 = vrot.lane.b32.xlu0 %v5203_v8, %s5453_s25 }
0x1b09   :  { %v2158_v61 = vpop.permute.xlu1 %2157 }
0x1b0a   :  { %v6280_v32 = vadd.f32 %v2158_v61, %v2143_v1 }
0x1b0b   :  { %v2160_v48 = vpop.permute.xlu0 %2159 }
0x1b0c   :  { %5204 = vtanh.f32 %v6280_v32  ;;  %v6284_v56 = vadd.f32 %v2160_v48, %v2144_v29 }
0x1b0e   :  { %5206 = vtanh.f32 %v6284_v56 }
0x1b16   :  { %v5205_v58 = vpop.eup %5204 }
0x1b17   :  { %2169 = vrot.lane.b32.xlu1 %v5205_v58, %s5453_s25 }
0x1b18   :  { %v1514_v55 = vpop.permute.xlu1 %1513  ;;  %v5207_v5 = vpop.eup %5206 }
0x1b19   :  { %2171 = vrot.lane.b32.xlu0 %v5207_v5, %s5453_s25  ;;  %v6290_v60 = vmul.f32 %v6236_v49, %v1514_v55 }
0x1b1a   :  { %v1516_v33 = vpop.permute.xlu0 %1515 }
0x1b1b   :  { %v6293_v12 = vmul.f32 %v6240_v23, %v1516_v33 }
0x1b1c   :  { %v1842_v38 = vpop.permute.xlu1 %1841 }
0x1b1d   :  { %v4821_v15 = vpack.i.bf16 %v6293_v12, %v6290_v60  ;;  %v1847_v45 = vmul.f32 %v6243_v18, %v1842_v38 }
0x1b1e   :  { %v1844_v40 = vpop.permute.xlu0 %1843 }
0x1b1f   :  { %v1848_v42 = vmul.f32 %v6248_v57, %v1844_v40  ;;  %4822 = vrot.lane.b32.xlu0 %v4821_v15, %s5451_s15 }
0x1b21   :  { %v4831_v35 = vpack.i.bf16 %v1848_v42, %v1847_v45 }
0x1b23   :  { %4817 = vrot.lane.b32.xlu1 %v4831_v35, %s5454_s28  ;;  %4832 = vrot.lane.b32.xlu0 %v4831_v35, %s5451_s15  ;;  %v2405_v35 = vld [vmem:[#allocation2 + $0x50] sm:$0xff] }
0x1b89   :  { %v2170_v49 = vpop.permute.xlu1 %2169 }
0x1b8a   :  { %v2175_v23 = vmul.f32 %v5193_v59, %v2170_v49 }
0x1b8b   :  { %v2172_v6 = vpop.permute.xlu0 %2171 }
0x1b8c   :  { %v2176_v16 = vmul.f32 %v5195_v27, %v2172_v6 }
0x1b8e   :  { %v6302_v19 = vpack.i.bf16 %v2176_v16, %v2175_v23  ;;  %v2406_v16 = vld [vmem:[#allocation2 + $0x58] sm:$0xff] }
0x1b90   :  { %4827 = vrot.lane.b32.xlu1 %v6302_v19, %s5454_s28 }
0x1b91   :  { %v4823_v41 = vpop.permute.xlu0 %4822 }
0x1b92   :  { %v4825_v57 = vunpack.i.h.bf16 %v4823_v41  ;;  %v4824_v51 = vunpack.i.l.bf16 %v4823_v41 }
0x1b94   :  { %2409 = vrot.lane.b32.xlu1 %v2407_v44, %s5454_s28 }
0x1b95   :  { %v4818_v18 = vpop.permute.xlu1 %4817  ;;  %v4833_v63 = vpop.permute.xlu0 %4832 }
0x1b96   :  { %v4820_v46 = vunpack.i.h.bf16 %v4818_v18  ;;  %v4819_v4 = vunpack.i.l.bf16 %v4818_v18  ;;  %v4835_v44 = vunpack.i.h.bf16 %v4833_v63  ;;  %v4834_v0 = vunpack.i.l.bf16 %v4833_v63 }
0x1b98   :  { %v1863_v24 = vsel %vm217_vm5, %v4819_v4, %v4824_v51  ;;  %v1864_v59 = vsel %vm217_vm5, %v4820_v46, %v4825_v57 }
0x1b99   :  { %v1865_v27 = vpack.c.bf16 %v1864_v59, %v1863_v24 }
0x1b9b   :  { %4522 = vmatmul.mubr.msk.bf16.vlgmr.msra.gmra.mrb[44].mxu1 %vm330_vm6, %v1865_v27 }
0x1b9c   :  { %4544 = vmatpush3.bf16.msra.mxu1 %v5660_v22  ;;  %4549 = vmatprep.mubr.msk.bf16.mxu1 %vm5449_vm2, %v5448_v20 }
0x1b9d   :  { %4545 = vmatprep.subr.bf16.mxu1 %v5448_v20 }
0x1ba0   :  { %4546 = vmatpush3.bf16.msra.mxu1 %v5666_v25 }
0x1ba1   :  { %4547 = vmatprep.subr.bf16.mxu1 %v5448_v20 }
0x1ba4   :  { %4548 = vmatpush3.bf16.msra.mxu1 %v5681_v37 }
0x1ba5   :  { %4563 = vmatprep.subr.bf16.mxu1 %v5448_v20 }
0x1c02   :  { %v4828_v47 = vpop.permute.xlu1 %4827 }
0x1c03   :  { %v4830_v8 = vunpack.i.h.bf16 %v4828_v47  ;;  %v4829_v1 = vunpack.i.l.bf16 %v4828_v47 }
0x1c05   :  { %v2191_v61 = vsel %vm217_vm5, %v4829_v1, %v4834_v0  ;;  %v2192_v29 = vsel %vm217_vm5, %v4830_v8, %v4835_v44 }
0x1c06   :  { %v2193_v48 = vpack.c.bf16 %v2192_v29, %v2191_v61  ;;  %v2410_v58 = vpop.permute.xlu1 %2409 }
0x1c08   :  { %4550 = vmatmul.mubr.msk.bf16.vlgmr.msra.gmra.mrb[48].mxu1 %vm330_vm6, %v2193_v48 }
0x1c09   :  { %4564 = vmatpush3.bf16.msra.mxu1 %v5512_v17  ;;  %4567 = vmatprep.mubr.msk.bf16.mxu1 %vm5449_vm2, %v5448_v20 }
0x1c0a   :  { %4565 = vmatprep.subr.bf16.mxu1 %v5448_v20 }
0x1c0d   :  { %4566 = vmatpush3.bf16.msra.mxu1 %v5535_v26 }
0x1c0e   :  { %4571 = vmatprep.subr.bf16.mxu1 %v5448_v20 }
0x1c10   :  { %4568 = vmatmul.mubr.msk.bf16.vlgmr.msra.gmra.mrb[52].mxu1 %vm217_vm5, %v2410_v58 }
0x1c11   :  { %4572 = vmatpush3.bf16.msra.mxu1 %v5600_v28  ;;  %4577 = vmatprep.mubr.msk.bf16.mxu1 %vm5449_vm2, %v5448_v20 }
0x1c12   :  { %4573 = vmatprep.subr.bf16.mxu1 %v5448_v20 }
0x1c15   :  { %4574 = vmatpush3.bf16.msra.mxu1 %v5606_v34 }
0x1c16   :  { %4575 = vmatprep.subr.bf16.mxu1 %v5448_v20 }
0x1c19   :  { %4576 = vmatpush3.bf16.msra.mxu1 %v5617_v39 }
0x1c1a   :  { %4591 = vmatprep.subr.bf16.mxu1 %v5448_v20 }
0x1c6e   :  { %v1903_v55 = vpop.f32.mrb[44].mxu1 }
0x1c6f   :  { %v4523_v5 = vpop.f32.mrb[45].mxu1 }
0x1c70   :  { %v1906_v33 = vpop.f32.mrb[46].mxu1 }
0x1c71   :  { %v4524_v38 = vpop.f32.mrb[47].mxu1 }
0x1cdb   :  { %v2231_v15 = vpop.f32.mrb[48].mxu1 }
0x1cdc   :  { %v4551_v40 = vpop.f32.mrb[49].mxu1 }
0x1cdd   :  { %v2234_v45 = vpop.f32.mrb[50].mxu1 }
0x1cde   :  { %v4552_v42 = vpop.f32.mrb[51].mxu1 }
0x1ce3   :  { %v2448_v49 = vpop.f32.mrb[52].mxu1 }
0x1ce4   :  { %v2455_v6 = vadd.f32 %v2448_v49, %v2405_v35  ;;  %v4569_v23 = vpop.f32.mrb[53].mxu1  ;;  %v1907_v35 = vadd.f32 %v1906_v33, %v5858_v2  ;;  %v1904_v33 = vadd.f32 %v1903_v55, %v5858_v2 }
0x1ce5   :  { %v2451_v41 = vpop.f32.mrb[54].mxu1 }
0x1ce6   :  { %5208 = vtanh.f32 %v2455_v6  ;;  %v2456_v18 = vadd.f32 %v2451_v41, %v2406_v16  ;;  %v4570_v57 = vpop.f32.mrb[55].mxu1  ;;  %v4173_v4 = vmul.f32 -1.442695, %v2455_v6  ;;  %v2235_v6 = vadd.f32 %v2234_v45, %v5709_v52 }
0x1ce7   :  { %v2232_v45 = vadd.f32 %v2231_v15, %v5709_v52 }
0x1ce8   :  { %5210 = vtanh.f32 %v2456_v18  ;;  %v4174_v24 = vmul.f32 -1.442695, %v2456_v18 }
0x1ce9   :  { %5212 = vpow2.f32 %v4173_v4 }
0x1cea   :  { %5214 = vpow2.f32 %v4174_v24 }
0x1cf0   :  { %v5209_v51 = vpop.eup %5208 }
0x1cf1   :  { %2475 = vrot.lane.b32.xlu0 %v5209_v51, %s5451_s15 }
0x1cf2   :  { %v5211_v46 = vpop.eup %5210 }
0x1cf3   :  { %2477 = vrot.lane.b32.xlu1 %v5211_v46, %s5451_s15  ;;  %v5213_v59 = vpop.eup %5212 }
0x1cf4   :  { %v5215_v27 = vpop.eup %5214  ;;  %v2463_v63 = vadd.f32 1.0, %v5213_v59 }
0x1cf5   :  { %v2464_v47 = vadd.f32 1.0, %v5215_v27 }
0x1cf6   :  { %5216 = vrcp.f32 %v2463_v63 }
0x1cf7   :  { %5218 = vrcp.f32 %v2464_v47 }
0x1d00   :  { %v5217_v44 = vpop.eup %5216 }
0x1d01   :  { %v5219_v1 = vpop.eup %5218  ;;  %v2471_v48 = vmul.f32 %v5217_v44, %v6194_v54 }
0x1d02   :  { %v2472_v38 = vmul.f32 %v5219_v1, %v6198_v13 }
0x1d63   :  { %v2476_v0 = vpop.permute.xlu0 %2475 }
0x1d64   :  { %v2481_v8 = vmul.f32 %v5217_v44, %v2476_v0 }
0x1d65   :  { %v2478_v61 = vpop.permute.xlu1 %2477 }
0x1d66   :  { %2485 = vrot.lane.b32.xlu0 %v2481_v8, %s5452_s16  ;;  %v2482_v29 = vmul.f32 %v5219_v1, %v2478_v61  ;;  %v4158_v8 = vmul.f32 -1.442695, %v1904_v33  ;;  %v4167_v61 = vmul.f32 -1.442695, %v2232_v45 }
0x1d68   :  { %2487 = vrot.lane.b32.xlu1 %v2482_v29, %s5452_s16  ;;  %v4168_v29 = vmul.f32 -1.442695, %v2235_v6 }
0x1dd8   :  { %v2486_v58 = vpop.permute.xlu0 %2485 }
0x1dd9   :  { %v6344_v5 = vadd.f32 %v2486_v58, %v2471_v48 }
0x1dda   :  { %v2488_v40 = vpop.permute.xlu1 %2487 }
0x1ddb   :  { %5220 = vtanh.f32 %v6344_v5  ;;  %v6348_v42 = vadd.f32 %v2488_v40, %v2472_v38 }
0x1ddd   :  { %5222 = vtanh.f32 %v6348_v42 }
0x1dde   :  { %5224 = vtanh.f32 %v1907_v35 }
0x1ddf   :  { %5226 = vtanh.f32 %v2235_v6 }
0x1de0   :  { %5228 = vtanh.f32 %v1904_v33 }
0x1de1   :  { %5230 = vtanh.f32 %v2232_v45 }
0x1de2   :  { %5232 = vpow2.f32 %v4158_v8 }
0x1de5   :  { %v5221_v49 = vpop.eup %5220 }
0x1de6   :  { %2497 = vrot.lane.b32.xlu0 %v5221_v49, %s5453_s25 }
0x1de7   :  { %v5223_v54 = vpop.eup %5222 }
0x1de8   :  { %2499 = vrot.lane.b32.xlu1 %v5223_v54, %s5453_s25  ;;  %v5225_v13 = vpop.eup %5224 }
0x1de9   :  { %v5227_v23 = vpop.eup %5226 }
0x1dea   :  { %v5229_v46 = vpop.eup %5228 }
0x1deb   :  { %v5231_v55 = vpop.eup %5230 }
0x1dec   :  { %4842 = vrot.lane.b32.xlu1 %v6302_v19, %s5451_s15  ;;  %v5233_v48 = vpop.eup %5232 }
0x1ded   :  { %v1916_v40 = vadd.f32 1.0, %v5233_v48 }
0x1df0   :  { %1930 = vrot.lane.b32.xlu1 %v5225_v13, %s5451_s15 }
0x1df4   :  { %2258 = vrot.lane.b32.xlu1 %v5227_v23, %s5451_s15 }
0x1e58   :  { %v2498_v16 = vpop.permute.xlu0 %2497 }
0x1e59   :  { %v6361_v18 = vmul.f32 %v5217_v44, %v2498_v16 }
0x1e5a   :  { %v2500_v41 = vpop.permute.xlu1 %2499 }
0x1e5b   :  { %v6363_v57 = vmul.f32 %v5219_v1, %v2500_v41  ;;  %v4159_v1 = vmul.f32 -1.442695, %v1907_v35 }
0x1e5d   :  { %v4836_v19 = vpack.i.bf16 %v6363_v57, %v6361_v18  ;;  %v2844_v51 = vpack.c.bf16 %v6363_v57, %v6361_v18  ;;  %5234 = vpow2.f32 %v4159_v1 }
0x1e5e   :  { %v4843_v15 = vpop.permute.xlu1 %4842  ;;  %5236 = vpow2.f32 %v4167_v61 }
0x1e5f   :  { %4837 = vrot.lane.b32.xlu0 %v4836_v19, %s5454_s28  ;;  %v4845_v24 = vunpack.i.h.bf16 %v4843_v15  ;;  %v4844_v59 = vunpack.i.l.bf16 %v4843_v15  ;;  %5238 = vpow2.f32 %v4168_v29 }
0x1e63   :  { %1928 = vrot.lane.b32.xlu0 %v5229_v46, %s5451_s15 }
0x1e67   :  { %2256 = vrot.lane.b32.xlu0 %v5231_v55, %s5451_s15  ;;  %v5235_v38 = vpop.eup %5234  ;;  %v1931_v55 = vpop.permute.xlu1 %1930 }
0x1e68   :  { %v5237_v13 = vpop.eup %5236  ;;  %v1917_v35 = vadd.f32 1.0, %v5235_v38 }
0x1e69   :  { %v5239_v41 = vpop.eup %5238  ;;  %v2244_v45 = vadd.f32 1.0, %v5237_v13 }
0x1e6a   :  { %v2245_v6 = vadd.f32 1.0, %v5239_v41 }
0x1ed1   :  { %v4838_v4 = vpop.permute.xlu0 %4837 }
0x1ed2   :  { %v4840_v27 = vunpack.i.h.bf16 %v4838_v4  ;;  %v4839_v63 = vunpack.i.l.bf16 %v4838_v4 }
0x1ed4   :  { %v2519_v47 = vsel %vm217_vm5, %v4839_v63, %v4844_v59  ;;  %v2520_v44 = vsel %vm217_vm5, %v4840_v27, %v4845_v24 }
0x1ed5   :  { %v2521_v0 = vpack.c.bf16 %v2520_v44, %v2519_v47  ;;  %v1929_v19 = vpop.permute.xlu0 %1928  ;;  %v2259_v44 = vpop.permute.xlu1 %2258 }
0x1ed7   :  { %4578 = vmatmul.mubr.msk.bf16.vlgmr.msra.gmra.mrb[56].mxu1 %vm330_vm6, %v2521_v0 }
0x1ed8   :  { %4592 = vmatpush3.bf16.msra.mxu1 %v5758_v3  ;;  %4597 = vmatprep.mubr.msk.bf16.mxu1 %vm5449_vm2, %v5448_v20 }
0x1ed9   :  { %4593 = vmatprep.subr.bf16.mxu1 %v5448_v20  ;;  %v2257_v59 = vpop.permute.xlu0 %2256 }
0x1edc   :  { %4594 = vmatpush3.bf16.msra.mxu1 %v5776_v11 }
0x1edd   :  { %4595 = vmatprep.subr.bf16.mxu1 %v5448_v20 }
0x1ee0   :  { %4596 = vmatpush3.bf16.msra.mxu1 %v5791_v21 }
0x1ee1   :  { %4619 = vmatprep.subr.bf16.mxu1 %v5448_v20 }
0x1faa   :  { %v2559_v58 = vpop.f32.mrb[56].mxu1 }
0x1fab   :  { %v2560_v49 = vadd.f32 %v2559_v58, %v5637_v53  ;;  %v4579_v54 = vpop.f32.mrb[57].mxu1 }
0x1fac   :  { %v2562_v23 = vpop.f32.mrb[58].mxu1 }
0x1fad   :  { %5240 = vtanh.f32 %v2560_v49  ;;  %v2563_v16 = vadd.f32 %v2562_v23, %v5637_v53  ;;  %v4580_v33 = vpop.f32.mrb[59].mxu1  ;;  %v4176_v61 = vmul.f32 -1.442695, %v2560_v49 }
0x1fae   :  { %5242 = vrcp.f32 %v1916_v40 }
0x1faf   :  { %5244 = vtanh.f32 %v2563_v16  ;;  %v4177_v29 = vmul.f32 -1.442695, %v2563_v16 }
0x1fb0   :  { %5246 = vrcp.f32 %v1917_v35 }
0x1fb1   :  { %5248 = vrcp.f32 %v2244_v45 }
0x1fb2   :  { %5250 = vrcp.f32 %v2245_v6 }
0x1fb3   :  { %5252 = vpow2.f32 %v4176_v61 }
0x1fb4   :  { %5254 = vpow2.f32 %v4177_v29 }
0x1fb7   :  { %v5241_v46 = vpop.eup %5240 }
0x1fb8   :  { %2584 = vrot.lane.b32.xlu0 %v5241_v46, %s5451_s15  ;;  %v6386_v15 = vpop.eup %5242 }
0x1fb9   :  { %v5245_v4 = vpop.eup %5244  ;;  %v1934_v24 = vmul.f32 %v6386_v15, %v1929_v19  ;;  %v1924_v41 = vmul.f32 %v6386_v15, %v6256_v62 }
0x1fba   :  { %2586 = vrot.lane.b32.xlu1 %v5245_v4, %s5451_s15  ;;  %v6390_v27 = vpop.eup %5246 }
0x1fbb   :  { %v6393_v63 = vpop.eup %5248  ;;  %v1935_v47 = vmul.f32 %v6390_v27, %v1931_v55  ;;  %v1925_v6 = vmul.f32 %v6390_v27, %v6264_v50 }
0x1fbc   :  { %1938 = vrot.lane.b32.xlu0 %v1934_v24, %s5452_s16  ;;  %v2262_v0 = vmul.f32 %v6393_v63, %v2257_v59  ;;  %v6398_v8 = vpop.eup %5250  ;;  %v2252_v46 = vmul.f32 %v6393_v63, %v6266_v14 }
0x1fbd   :  { %v2263_v1 = vmul.f32 %v6398_v8, %v2259_v44  ;;  %v5253_v48 = vpop.eup %5252  ;;  %v2253_v62 = vmul.f32 %v6398_v8, %v6272_v9 }
0x1fbe   :  { %1940 = vrot.lane.b32.xlu1 %v1935_v47, %s5452_s16  ;;  %v5255_v58 = vpop.eup %5254  ;;  %v2572_v38 = vadd.f32 1.0, %v5253_v48 }
0x1fbf   :  { %v2573_v40 = vadd.f32 1.0, %v5255_v58 }
0x1fc0   :  { %2266 = vrot.lane.b32.xlu0 %v2262_v0, %s5452_s16  ;;  %5256 = vrcp.f32 %v2572_v38 }
0x1fc1   :  { %5258 = vrcp.f32 %v2573_v40 }
0x1fc2   :  { %2268 = vrot.lane.b32.xlu1 %v2263_v1, %s5452_s16 }
0x1fca   :  { %v5257_v54 = vpop.eup %5256 }
0x1fcb   :  { %v5259_v33 = vpop.eup %5258  ;;  %v2580_v9 = vmul.f32 %v5257_v54, %v6280_v32 }
0x1fcc   :  { %v2581_v29 = vmul.f32 %v5259_v33, %v6284_v56 }
0x202a   :  { %v2585_v13 = vpop.permute.xlu0 %2584 }
0x202b   :  { %v2590_v23 = vmul.f32 %v5257_v54, %v2585_v13 }
0x202c   :  { %v2587_v35 = vpop.permute.xlu1 %2586 }
0x202d   :  { %2594 = vrot.lane.b32.xlu0 %v2590_v23, %s5452_s16  ;;  %v2591_v49 = vmul.f32 %v5259_v33, %v2587_v35 }
0x202e   :  { %v1939_v16 = vpop.permute.xlu0 %1938 }
0x202f   :  { %v6406_v45 = vadd.f32 %v1939_v16, %v1924_v41  ;;  %2596 = vrot.lane.b32.xlu1 %v2591_v49, %s5452_s16 }
0x2030   :  { %v1941_v19 = vpop.permute.xlu1 %1940 }
0x2031   :  { %5260 = vtanh.f32 %v6406_v45  ;;  %v6414_v55 = vadd.f32 %v1941_v19, %v1925_v6 }
0x2032   :  { %v2267_v4 = vpop.permute.xlu0 %2266 }
0x2033   :  { %v6416_v24 = vadd.f32 %v2267_v4, %v2252_v46  ;;  %5262 = vtanh.f32 %v6414_v55 }
0x2034   :  { %v2269_v59 = vpop.permute.xlu1 %2268 }
0x2035   :  { %5264 = vtanh.f32 %v6416_v24  ;;  %v6422_v50 = vadd.f32 %v2269_v59, %v2253_v62 }
0x2037   :  { %5266 = vtanh.f32 %v6422_v50 }
0x203b   :  { %v5261_v47 = vpop.eup %5260 }
0x203c   :  { %1950 = vrot.lane.b32.xlu0 %v5261_v47, %s5453_s25 }
0x203d   :  { %v5263_v14 = vpop.eup %5262 }
0x203e   :  { %1952 = vrot.lane.b32.xlu1 %v5263_v14, %s5453_s25 }
0x203f   :  { %v5265_v44 = vpop.eup %5264 }
0x2040   :  { %2278 = vrot.lane.b32.xlu0 %v5265_v44, %s5453_s25 }
0x2041   :  { %v5267_v0 = vpop.eup %5266 }
0x2042   :  { %2280 = vrot.lane.b32.xlu1 %v5267_v0, %s5453_s25 }
0x209f   :  { %v2595_v1 = vpop.permute.xlu0 %2594 }
0x20a0   :  { %v6430_v61 = vadd.f32 %v2595_v1, %v2580_v9 }
0x20a1   :  { %v2597_v48 = vpop.permute.xlu1 %2596 }
0x20a2   :  { %5268 = vtanh.f32 %v6430_v61  ;;  %v6434_v58 = vadd.f32 %v2597_v48, %v2581_v29 }
0x20a4   :  { %5270 = vtanh.f32 %v6434_v58 }
0x20ac   :  { %v5269_v38 = vpop.eup %5268 }
0x20ad   :  { %2606 = vrot.lane.b32.xlu0 %v5269_v38, %s5453_s25 }
0x20ae   :  { %v1951_v40 = vpop.permute.xlu0 %1950  ;;  %v5271_v13 = vpop.eup %5270 }
0x20af   :  { %2608 = vrot.lane.b32.xlu1 %v5271_v13, %s5453_s25  ;;  %v6440_v23 = vmul.f32 %v6386_v15, %v1951_v40 }
0x20b0   :  { %v1953_v32 = vpop.permute.xlu1 %1952 }
0x20b1   :  { %v6443_v56 = vmul.f32 %v6390_v27, %v1953_v32 }
0x20b2   :  { %v2279_v35 = vpop.permute.xlu0 %2278 }
0x20b3   :  { %v4851_v41 = vpack.i.bf16 %v6443_v56, %v6440_v23  ;;  %v2284_v16 = vmul.f32 %v6393_v63, %v2279_v35 }
0x20b4   :  { %v2281_v49 = vpop.permute.xlu1 %2280 }
0x20b5   :  { %v2285_v6 = vmul.f32 %v6398_v8, %v2281_v49  ;;  %4852 = vrot.lane.b32.xlu1 %v4851_v41, %s5451_s15 }
0x20b7   :  { %v4861_v19 = vpack.i.bf16 %v2285_v6, %v2284_v16 }
0x20b9   :  { %4847 = vrot.lane.b32.xlu0 %v4861_v19, %s5454_s28  ;;  %4862 = vrot.lane.b32.xlu1 %v4861_v19, %s5451_s15 }
0x211f   :  { %v2607_v15 = vpop.permute.xlu0 %2606 }
0x2120   :  { %v2612_v27 = vmul.f32 %v5257_v54, %v2607_v15 }
0x2121   :  { %v2609_v46 = vpop.permute.xlu1 %2608 }
0x2122   :  { %v2613_v4 = vmul.f32 %v5259_v33, %v2609_v46  ;;  %v2842_v46 = vld [vmem:[#allocation2 + $0x60] sm:$0xff] }
0x2124   :  { %v6452_v62 = vpack.i.bf16 %v2613_v4, %v2612_v27 }
0x2126   :  { %4857 = vrot.lane.b32.xlu0 %v6452_v62, %s5454_s28 }
0x2127   :  { %v4853_v59 = vpop.permute.xlu1 %4852 }
0x2128   :  { %v4855_v8 = vunpack.i.h.bf16 %v4853_v59  ;;  %v4854_v47 = vunpack.i.l.bf16 %v4853_v59 }
0x212a   :  { %2846 = vrot.lane.b32.xlu0 %v2844_v51, %s5454_s28 }
0x212b   :  { %v4848_v63 = vpop.permute.xlu0 %4847  ;;  %v4863_v18 = vpop.permute.xlu1 %4862 }
0x212c   :  { %v4850_v14 = vunpack.i.h.bf16 %v4848_v63  ;;  %v4849_v44 = vunpack.i.l.bf16 %v4848_v63  ;;  %v4865_v51 = vunpack.i.h.bf16 %v4863_v18  ;;  %v4864_v9 = vunpack.i.l.bf16 %v4863_v18  ;;  %v2843_v63 = vld [vmem:[#allocation2 + $0x68] sm:$0xff] }
0x212e   :  { %v2300_v0 = vsel %vm217_vm5, %v4849_v44, %v4854_v47  ;;  %v2301_v54 = vsel %vm217_vm5, %v4850_v14, %v4855_v8 }
0x212f   :  { %v2302_v33 = vpack.c.bf16 %v2301_v54, %v2300_v0 }
0x2131   :  { %4560 = vmatmul.mubr.msk.bf16.vlgmr.msra.gmra.mrb[40].mxu0 %vm330_vm6, %v2302_v33 }
0x2132   :  { %4582 = vmatpush3.bf16.msra.mxu0 %v5660_v22  ;;  %4587 = vmatprep.mubr.msk.bf16.mxu0 %vm5449_vm2, %v5448_v20 }
0x2133   :  { %4583 = vmatprep.subr.bf16.mxu0 %v5448_v20 }
0x2136   :  { %4584 = vmatpush3.bf16.msra.mxu0 %v5666_v25 }
0x2137   :  { %4585 = vmatprep.subr.bf16.mxu0 %v5448_v20 }
0x213a   :  { %4586 = vmatpush3.bf16.msra.mxu0 %v5681_v37 }
0x213b   :  { %4601 = vmatprep.subr.bf16.mxu0 %v5448_v20 }
0x2198   :  { %v4858_v57 = vpop.permute.xlu0 %4857 }
0x2199   :  { %v4860_v1 = vunpack.i.h.bf16 %v4858_v57  ;;  %v4859_v29 = vunpack.i.l.bf16 %v4858_v57 }
0x219b   :  { %v2628_v48 = vsel %vm217_vm5, %v4859_v29, %v4864_v9  ;;  %v2629_v38 = vsel %vm217_vm5, %v4860_v1, %v4865_v51 }
0x219c   :  { %v2630_v40 = vpack.c.bf16 %v2629_v38, %v2628_v48  ;;  %v2847_v13 = vpop.permute.xlu0 %2846 }
0x219e   :  { %4588 = vmatmul.mubr.msk.bf16.vlgmr.msra.gmra.mrb[44].mxu0 %vm330_vm6, %v2630_v40 }
0x219f   :  { %4602 = vmatpush3.bf16.msra.mxu0 %v5512_v17  ;;  %4605 = vmatprep.mubr.msk.bf16.mxu0 %vm5449_vm2, %v5448_v20 }
0x21a0   :  { %4603 = vmatprep.subr.bf16.mxu0 %v5448_v20 }
0x21a3   :  { %4604 = vmatpush3.bf16.msra.mxu0 %v5535_v26 }
0x21a4   :  { %4609 = vmatprep.subr.bf16.mxu0 %v5448_v20 }
0x21a6   :  { %4606 = vmatmul.mubr.msk.bf16.vlgmr.msra.gmra.mrb[48].mxu0 %vm217_vm5, %v2847_v13 }
0x21a7   :  { %4610 = vmatpush3.bf16.msra.mxu0 %v5600_v28  ;;  %4615 = vmatprep.mubr.msk.bf16.mxu0 %vm5449_vm2, %v5448_v20 }
0x21a8   :  { %4611 = vmatprep.subr.bf16.mxu0 %v5448_v20 }
0x21ab   :  { %4612 = vmatpush3.bf16.msra.mxu0 %v5606_v34 }
0x21ac   :  { %4613 = vmatprep.subr.bf16.mxu0 %v5448_v20 }
0x21af   :  { %4614 = vmatpush3.bf16.msra.mxu0 %v5617_v39 }
0x21b0   :  { %4629 = vmatprep.subr.bf16.mxu0 %v5448_v20 }
0x2204   :  { %v2340_v32 = vpop.f32.mrb[40].mxu0 }
0x2205   :  { %v4561_v35 = vpop.f32.mrb[41].mxu0 }
0x2206   :  { %v2343_v41 = vpop.f32.mrb[42].mxu0 }
0x2207   :  { %v4562_v49 = vpop.f32.mrb[43].mxu0 }
0x2271   :  { %v2668_v16 = vpop.f32.mrb[44].mxu0 }
0x2272   :  { %v4589_v6 = vpop.f32.mrb[45].mxu0 }
0x2273   :  { %v2671_v19 = vpop.f32.mrb[46].mxu0 }
0x2274   :  { %v4590_v15 = vpop.f32.mrb[47].mxu0 }
0x2279   :  { %v2885_v27 = vpop.f32.mrb[48].mxu0 }
0x227a   :  { %v2892_v4 = vadd.f32 %v2885_v27, %v2842_v46  ;;  %v4607_v59 = vpop.f32.mrb[49].mxu0 }
0x227b   :  { %v2888_v8 = vpop.f32.mrb[50].mxu0 }
0x227c   :  { %5272 = vtanh.f32 %v2892_v4  ;;  %v2893_v47 = vadd.f32 %v2888_v8, %v2843_v63  ;;  %v4608_v14 = vpop.f32.mrb[51].mxu0  ;;  %v4185_v54 = vmul.f32 -1.442695, %v2892_v4  ;;  %v2344_v4 = vadd.f32 %v2343_v41, %v5858_v2 }
0x227d   :  { %v2672_v63 = vadd.f32 %v2671_v19, %v5709_v52  ;;  %v2341_v41 = vadd.f32 %v2340_v32, %v5858_v2  ;;  %v2669_v19 = vadd.f32 %v2668_v16, %v5709_v52 }
0x227e   :  { %5274 = vtanh.f32 %v2893_v47  ;;  %v4186_v33 = vmul.f32 -1.442695, %v2893_v47 }
0x227f   :  { %5276 = vpow2.f32 %v4185_v54 }
0x2280   :  { %5278 = vpow2.f32 %v4186_v33 }
0x2286   :  { %v5273_v44 = vpop.eup %5272 }
0x2287   :  { %2912 = vrot.lane.b32.xlu1 %v5273_v44, %s5451_s15 }
0x2288   :  { %v5275_v0 = vpop.eup %5274 }
0x2289   :  { %2914 = vrot.lane.b32.xlu0 %v5275_v0, %s5451_s15  ;;  %v5277_v18 = vpop.eup %5276 }
0x228a   :  { %v5279_v57 = vpop.eup %5278  ;;  %v2900_v51 = vadd.f32 1.0, %v5277_v18 }
0x228b   :  { %v2901_v9 = vadd.f32 1.0, %v5279_v57 }
0x228c   :  { %5280 = vrcp.f32 %v2900_v51 }
0x228d   :  { %5282 = vrcp.f32 %v2901_v9 }
0x2296   :  { %v5281_v1 = vpop.eup %5280 }
0x2297   :  { %v5283_v38 = vpop.eup %5282  ;;  %v2908_v35 = vmul.f32 %v5281_v1, %v6344_v5 }
0x2298   :  { %v2909_v15 = vmul.f32 %v5283_v38, %v6348_v42 }
0x22f9   :  { %v2913_v29 = vpop.permute.xlu1 %2912 }
0x22fa   :  { %v2918_v48 = vmul.f32 %v5281_v1, %v2913_v29 }
0x22fb   :  { %v2915_v40 = vpop.permute.xlu0 %2914 }
0x22fc   :  { %2922 = vrot.lane.b32.xlu1 %v2918_v48, %s5452_s16  ;;  %v2919_v13 = vmul.f32 %v5283_v38, %v2915_v40  ;;  %v4170_v40 = vmul.f32 -1.442695, %v2341_v41 }
0x22fe   :  { %2924 = vrot.lane.b32.xlu0 %v2919_v13, %s5452_s16  ;;  %v4171_v13 = vmul.f32 -1.442695, %v2344_v4 }
0x236e   :  { %v2923_v49 = vpop.permute.xlu1 %2922 }
0x236f   :  { %v6494_v6 = vadd.f32 %v2923_v49, %v2908_v35  ;;  %v4179_v35 = vmul.f32 -1.442695, %v2669_v19  ;;  %v4180_v49 = vmul.f32 -1.442695, %v2672_v63 }
0x2370   :  { %v2925_v46 = vpop.permute.xlu0 %2924 }
0x2371   :  { %5284 = vtanh.f32 %v6494_v6  ;;  %v6498_v27 = vadd.f32 %v2925_v46, %v2909_v15 }
0x2373   :  { %5286 = vtanh.f32 %v6498_v27 }
0x2374   :  { %5288 = vtanh.f32 %v2344_v4 }
0x2375   :  { %5290 = vtanh.f32 %v2672_v63 }
0x2376   :  { %5292 = vtanh.f32 %v2341_v41 }
0x2377   :  { %5294 = vtanh.f32 %v2669_v19 }
0x2378   :  { %5296 = vpow2.f32 %v4170_v40 }
0x2379   :  { %5298 = vpow2.f32 %v4171_v13 }
0x237a   :  { %5300 = vpow2.f32 %v4179_v35 }
0x237b   :  { %v5285_v59 = vpop.eup %5284  ;;  %5302 = vpow2.f32 %v4180_v49 }
0x237c   :  { %2934 = vrot.lane.b32.xlu1 %v5285_v59, %s5453_s25 }
0x237d   :  { %v5287_v5 = vpop.eup %5286 }
0x237e   :  { %2936 = vrot.lane.b32.xlu0 %v5287_v5, %s5453_s25  ;;  %v5289_v42 = vpop.eup %5288 }
0x237f   :  { %v5291_v8 = vpop.eup %5290 }
0x2380   :  { %v5293_v33 = vpop.eup %5292 }
0x2381   :  { %v5295_v32 = vpop.eup %5294 }
0x2382   :  { %4872 = vrot.lane.b32.xlu0 %v6452_v62, %s5451_s15  ;;  %v5297_v15 = vpop.eup %5296 }
0x2383   :  { %v5299_v59 = vpop.eup %5298  ;;  %v2353_v5 = vadd.f32 1.0, %v5297_v15 }
0x2384   :  { %v2354_v4 = vadd.f32 1.0, %v5299_v59 }
0x2386   :  { %2367 = vrot.lane.b32.xlu0 %v5289_v42, %s5451_s15 }
0x238a   :  { %2695 = vrot.lane.b32.xlu0 %v5291_v8, %s5451_s15 }
0x23ee   :  { %v2935_v47 = vpop.permute.xlu1 %2934 }
0x23ef   :  { %v6511_v44 = vmul.f32 %v5281_v1, %v2935_v47  ;;  %v5301_v47 = vpop.eup %5300 }
0x23f0   :  { %v2937_v14 = vpop.permute.xlu0 %2936  ;;  %v2681_v19 = vadd.f32 1.0, %v5301_v47 }
0x23f1   :  { %v6513_v0 = vmul.f32 %v5283_v38, %v2937_v14 }
0x23f3   :  { %v4866_v62 = vpack.i.bf16 %v6513_v0, %v6511_v44  ;;  %v3281_v54 = vpack.c.bf16 %v6513_v0, %v6511_v44 }
0x23f4   :  { %v4873_v16 = vpop.permute.xlu0 %4872 }
0x23f5   :  { %4867 = vrot.lane.b32.xlu1 %v4866_v62, %s5454_s28  ;;  %v4875_v57 = vunpack.i.h.bf16 %v4873_v16  ;;  %v4874_v51 = vunpack.i.l.bf16 %v4873_v16 }
0x23f9   :  { %2365 = vrot.lane.b32.xlu1 %v5293_v33, %s5451_s15  ;;  %v5303_v33 = vpop.eup %5302 }
0x23fa   :  { %v2682_v63 = vadd.f32 1.0, %v5303_v33 }
0x23fd   :  { %2693 = vrot.lane.b32.xlu1 %v5295_v32, %s5451_s15 }
0x2467   :  { %v4868_v18 = vpop.permute.xlu1 %4867 }
0x2468   :  { %v4870_v9 = vunpack.i.h.bf16 %v4868_v18  ;;  %v4869_v1 = vunpack.i.l.bf16 %v4868_v18  ;;  %v2368_v18 = vpop.permute.xlu0 %2367 }
0x246a   :  { %v2956_v29 = vsel %vm217_vm5, %v4869_v1, %v4874_v51  ;;  %v2957_v48 = vsel %vm217_vm5, %v4870_v9, %v4875_v57 }
0x246b   :  { %v2958_v38 = vpack.c.bf16 %v2957_v48, %v2956_v29  ;;  %v2366_v32 = vpop.permute.xlu1 %2365 }
0x246c   :  { %v2696_v40 = vpop.permute.xlu0 %2695 }
0x246d   :  { %4616 = vmatmul.mubr.msk.bf16.vlgmr.msra.gmra.mrb[52].mxu0 %vm330_vm6, %v2958_v38 }
0x246e   :  { %4630 = vmatpush3.bf16.msra.mxu0 %v5758_v3  ;;  %4635 = vmatprep.mubr.msk.bf16.mxu0 %vm5449_vm2, %v5448_v20 }
0x246f   :  { %4631 = vmatprep.subr.bf16.mxu0 %v5448_v20  ;;  %v2694_v1 = vpop.permute.xlu1 %2693 }
0x2472   :  { %4632 = vmatpush3.bf16.msra.mxu0 %v5776_v11 }
0x2473   :  { %4633 = vmatprep.subr.bf16.mxu0 %v5448_v20 }
0x2476   :  { %4634 = vmatpush3.bf16.msra.mxu0 %v5791_v21 }
0x2477   :  { %4657 = vmatprep.subr.bf16.mxu0 %v5448_v20 }
0x2540   :  { %v2996_v46 = vpop.f32.mrb[52].mxu0 }
0x2541   :  { %v2997_v42 = vadd.f32 %v2996_v46, %v5637_v53  ;;  %v4617_v8 = vpop.f32.mrb[53].mxu0 }
0x2542   :  { %v2999_v14 = vpop.f32.mrb[54].mxu0 }
0x2543   :  { %5304 = vtanh.f32 %v2997_v42  ;;  %v3000_v62 = vadd.f32 %v2999_v14, %v5637_v53  ;;  %v4618_v41 = vpop.f32.mrb[55].mxu0  ;;  %v4188_v15 = vmul.f32 -1.442695, %v2997_v42 }
0x2544   :  { %5306 = vrcp.f32 %v2353_v5 }
0x2545   :  { %5308 = vtanh.f32 %v3000_v62  ;;  %v4189_v46 = vmul.f32 -1.442695, %v3000_v62 }
0x2546   :  { %5310 = vrcp.f32 %v2354_v4 }
0x2547   :  { %5312 = vrcp.f32 %v2681_v19 }
0x2548   :  { %5314 = vrcp.f32 %v2682_v63 }
0x2549   :  { %5316 = vpow2.f32 %v4188_v15 }
0x254a   :  { %5318 = vpow2.f32 %v4189_v46 }
0x254d   :  { %v5305_v16 = vpop.eup %5304 }
0x254e   :  { %3021 = vrot.lane.b32.xlu1 %v5305_v16, %s5451_s15  ;;  %v6536_v57 = vpop.eup %5306 }
0x254f   :  { %v5309_v51 = vpop.eup %5308  ;;  %v2371_v9 = vmul.f32 %v6536_v57, %v2366_v32  ;;  %v2361_v63 = vmul.f32 %v6536_v57, %v6406_v45 }
0x2550   :  { %3023 = vrot.lane.b32.xlu0 %v5309_v51, %s5451_s15  ;;  %v6540_v29 = vpop.eup %5310 }
0x2551   :  { %v6543_v48 = vpop.eup %5312  ;;  %v2372_v38 = vmul.f32 %v6540_v29, %v2368_v18  ;;  %v2362_v16 = vmul.f32 %v6540_v29, %v6414_v55 }
0x2552   :  { %2375 = vrot.lane.b32.xlu1 %v2371_v9, %s5452_s16  ;;  %v2699_v13 = vmul.f32 %v6543_v48, %v2694_v1  ;;  %v6548_v35 = vpop.eup %5314  ;;  %v2689_v51 = vmul.f32 %v6543_v48, %v6416_v24 }
0x2553   :  { %v2700_v49 = vmul.f32 %v6548_v35, %v2696_v40  ;;  %v5317_v59 = vpop.eup %5316  ;;  %v2690_v45 = vmul.f32 %v6548_v35, %v6422_v50 }
0x2554   :  { %2377 = vrot.lane.b32.xlu0 %v2372_v38, %s5452_s16  ;;  %v5319_v5 = vpop.eup %5318  ;;  %v3009_v8 = vadd.f32 1.0, %v5317_v59 }
0x2555   :  { %v3010_v47 = vadd.f32 1.0, %v5319_v5 }
0x2556   :  { %2703 = vrot.lane.b32.xlu1 %v2699_v13, %s5452_s16  ;;  %5320 = vrcp.f32 %v3009_v8 }
0x2557   :  { %5322 = vrcp.f32 %v3010_v47 }
0x2558   :  { %2705 = vrot.lane.b32.xlu0 %v2700_v49, %s5452_s16 }
0x2560   :  { %v5321_v14 = vpop.eup %5320 }
0x2561   :  { %v5323_v33 = vpop.eup %5322  ;;  %v3017_v50 = vmul.f32 %v5321_v14, %v6430_v61 }
0x2562   :  { %v3018_v5 = vmul.f32 %v5323_v33, %v6434_v58 }
0x25c0   :  { %v3022_v41 = vpop.permute.xlu1 %3021 }
0x25c1   :  { %v3027_v4 = vmul.f32 %v5321_v14, %v3022_v41 }
0x25c2   :  { %v3024_v19 = vpop.permute.xlu0 %3023 }
0x25c3   :  { %3031 = vrot.lane.b32.xlu1 %v3027_v4, %s5452_s16  ;;  %v3028_v42 = vmul.f32 %v5323_v33, %v3024_v19 }
0x25c4   :  { %v2376_v62 = vpop.permute.xlu1 %2375 }
0x25c5   :  { %v6556_v32 = vadd.f32 %v2376_v62, %v2361_v63  ;;  %3033 = vrot.lane.b32.xlu0 %v3028_v42, %s5452_s16 }
0x25c6   :  { %v2378_v18 = vpop.permute.xlu0 %2377 }
0x25c7   :  { %5324 = vtanh.f32 %v6556_v32  ;;  %v6564_v9 = vadd.f32 %v2378_v18, %v2362_v16 }
0x25c8   :  { %v2704_v1 = vpop.permute.xlu1 %2703 }
0x25c9   :  { %v6566_v38 = vadd.f32 %v2704_v1, %v2689_v51  ;;  %5326 = vtanh.f32 %v6564_v9 }
0x25ca   :  { %v2706_v40 = vpop.permute.xlu0 %2705 }
0x25cb   :  { %5328 = vtanh.f32 %v6566_v38  ;;  %v6572_v55 = vadd.f32 %v2706_v40, %v2690_v45 }
0x25cd   :  { %5330 = vtanh.f32 %v6572_v55 }
0x25d1   :  { %v5325_v13 = vpop.eup %5324 }
0x25d2   :  { %2387 = vrot.lane.b32.xlu1 %v5325_v13, %s5453_s25 }
0x25d3   :  { %v5327_v24 = vpop.eup %5326 }
0x25d4   :  { %2389 = vrot.lane.b32.xlu0 %v5327_v24, %s5453_s25 }
0x25d5   :  { %v5329_v49 = vpop.eup %5328 }
0x25d6   :  { %2715 = vrot.lane.b32.xlu1 %v5329_v49, %s5453_s25 }
0x25d7   :  { %v5331_v15 = vpop.eup %5330 }
0x25d8   :  { %2717 = vrot.lane.b32.xlu0 %v5331_v15, %s5453_s25 }
0x2635   :  { %v3032_v46 = vpop.permute.xlu1 %3031 }
0x2636   :  { %v6580_v59 = vadd.f32 %v3032_v46, %v3017_v50 }
0x2637   :  { %v3034_v8 = vpop.permute.xlu0 %3033 }
0x2638   :  { %5332 = vtanh.f32 %v6580_v59  ;;  %v6584_v47 = vadd.f32 %v3034_v8, %v3018_v5 }
0x263a   :  { %5334 = vtanh.f32 %v6584_v47 }
0x2642   :  { %v5333_v41 = vpop.eup %5332 }
0x2643   :  { %3043 = vrot.lane.b32.xlu1 %v5333_v41, %s5453_s25 }
0x2644   :  { %v2388_v4 = vpop.permute.xlu1 %2387  ;;  %v5335_v19 = vpop.eup %5334 }
0x2645   :  { %3045 = vrot.lane.b32.xlu0 %v5335_v19, %s5453_s25  ;;  %v6590_v63 = vmul.f32 %v6536_v57, %v2388_v4 }
0x2646   :  { %v2390_v61 = vpop.permute.xlu0 %2389 }
0x2647   :  { %v6593_v58 = vmul.f32 %v6540_v29, %v2390_v61 }
0x2648   :  { %v2716_v42 = vpop.permute.xlu1 %2715 }
0x2649   :  { %v4881_v62 = vpack.i.bf16 %v6593_v58, %v6590_v63  ;;  %v2721_v18 = vmul.f32 %v6543_v48, %v2716_v42 }
0x264a   :  { %v2718_v16 = vpop.permute.xlu0 %2717 }
0x264b   :  { %v2722_v51 = vmul.f32 %v6548_v35, %v2718_v16  ;;  %4882 = vrot.lane.b32.xlu0 %v4881_v62, %s5451_s15 }
0x264d   :  { %v4891_v1 = vpack.i.bf16 %v2722_v51, %v2721_v18 }
0x264f   :  { %4877 = vrot.lane.b32.xlu1 %v4891_v1, %s5454_s28  ;;  %4892 = vrot.lane.b32.xlu0 %v4891_v1, %s5451_s15 }
0x26b5   :  { %v3044_v57 = vpop.permute.xlu1 %3043 }
0x26b6   :  { %v3049_v29 = vmul.f32 %v5321_v14, %v3044_v57  ;;  %v3279_v57 = vld [vmem:[#allocation2 + $0x70] sm:$0xff] }
0x26b7   :  { %v3046_v45 = vpop.permute.xlu0 %3045 }
0x26b8   :  { %v3050_v40 = vmul.f32 %v5323_v33, %v3046_v45 }
0x26ba   :  { %v6602_v13 = vpack.i.bf16 %v3050_v40, %v3049_v29 }
0x26bc   :  { %4887 = vrot.lane.b32.xlu1 %v6602_v13, %s5454_s28 }
0x26bd   :  { %v4883_v24 = vpop.permute.xlu0 %4882 }
0x26be   :  { %v4885_v35 = vunpack.i.h.bf16 %v4883_v24  ;;  %v4884_v49 = vunpack.i.l.bf16 %v4883_v24  ;;  %v3280_v24 = vld [vmem:[#allocation2 + $0x78] sm:$0xff] }
0x26c0   :  { %3283 = vrot.lane.b32.xlu1 %v3281_v54, %s5454_s28 }
0x26c1   :  { %v4878_v48 = vpop.permute.xlu1 %4877  ;;  %v4893_v44 = vpop.permute.xlu0 %4892 }
0x26c2   :  { %v4880_v15 = vunpack.i.h.bf16 %v4878_v48  ;;  %v4879_v50 = vunpack.i.l.bf16 %v4878_v48  ;;  %v4895_v54 = vunpack.i.h.bf16 %v4893_v44  ;;  %v4894_v5 = vunpack.i.l.bf16 %v4893_v44 }
0x26c4   :  { %v2737_v46 = vsel %vm217_vm5, %v4879_v50, %v4884_v49  ;;  %v2738_v14 = vsel %vm217_vm5, %v4880_v15, %v4885_v35 }
0x26c5   :  { %v2739_v33 = vpack.c.bf16 %v2738_v14, %v2737_v46 }
0x26c7   :  { %4598 = vmatmul.mubr.msk.bf16.vlgmr.msra.gmra.mrb[60].mxu1 %vm330_vm6, %v2739_v33 }
0x26c8   :  { %4620 = vmatpush3.bf16.msra.mxu1 %v5660_v22  ;;  %4625 = vmatprep.mubr.msk.bf16.mxu1 %vm5449_vm2, %v5448_v20 }
0x26c9   :  { %4621 = vmatprep.subr.bf16.mxu1 %v5448_v20 }
0x26cc   :  { %4622 = vmatpush3.bf16.msra.mxu1 %v5666_v25 }
0x26cd   :  { %4623 = vmatprep.subr.bf16.mxu1 %v5448_v20 }
0x26d0   :  { %4624 = vmatpush3.bf16.msra.mxu1 %v5681_v37 }
0x26d1   :  { %4639 = vmatprep.subr.bf16.mxu1 %v5448_v20 }
0x272e   :  { %v4888_v0 = vpop.permute.xlu1 %4887 }
0x272f   :  { %v4890_v8 = vunpack.i.h.bf16 %v4888_v0  ;;  %v4889_v41 = vunpack.i.l.bf16 %v4888_v0 }
0x2731   :  { %v3065_v4 = vsel %vm217_vm5, %v4889_v41, %v4894_v5  ;;  %v3066_v19 = vsel %vm217_vm5, %v4890_v8, %v4895_v54 }
0x2732   :  { %v3067_v61 = vpack.c.bf16 %v3066_v19, %v3065_v4  ;;  %v3284_v42 = vpop.permute.xlu1 %3283 }
0x2734   :  { %4626 = vmatmul.mubr.msk.bf16.vlgmr.msra.gmra.mrb[64].mxu1 %vm330_vm6, %v3067_v61 }
0x2735   :  { %4640 = vmatpush3.bf16.msra.mxu1 %v5512_v17  ;;  %4643 = vmatprep.mubr.msk.bf16.mxu1 %vm5449_vm2, %v5448_v20 }
0x2736   :  { %4641 = vmatprep.subr.bf16.mxu1 %v5448_v20 }
0x2739   :  { %4642 = vmatpush3.bf16.msra.mxu1 %v5535_v26 }
0x273a   :  { %4647 = vmatprep.subr.bf16.mxu1 %v5448_v20 }
0x273c   :  { %4644 = vmatmul.mubr.msk.bf16.vlgmr.msra.gmra.mrb[68].mxu1 %vm217_vm5, %v3284_v42 }
0x273d   :  { %4648 = vmatpush3.bf16.msra.mxu1 %v5600_v28  ;;  %4653 = vmatprep.mubr.msk.bf16.mxu1 %vm5449_vm2, %v5448_v20 }
0x273e   :  { %4649 = vmatprep.subr.bf16.mxu1 %v5448_v20 }
0x2741   :  { %4650 = vmatpush3.bf16.msra.mxu1 %v5606_v34 }
0x2742   :  { %4651 = vmatprep.subr.bf16.mxu1 %v5448_v20 }
0x2745   :  { %4652 = vmatpush3.bf16.msra.mxu1 %v5617_v39 }
0x2746   :  { %4667 = vmatprep.subr.bf16.mxu1 %v5448_v20 }
0x279a   :  { %v2777_v17 = vpop.f32.mrb[60].mxu1 }
0x279b   :  { %v4599_v26 = vpop.f32.mrb[61].mxu1 }
0x279c   :  { %v2780_v62 = vpop.f32.mrb[62].mxu1 }
0x279d   :  { %v4600_v16 = vpop.f32.mrb[63].mxu1 }
0x2807   :  { %v3105_v18 = vpop.f32.mrb[64].mxu1 }
0x2808   :  { %v4627_v51 = vpop.f32.mrb[65].mxu1 }
0x2809   :  { %v3108_v28 = vpop.f32.mrb[66].mxu1 }
0x280a   :  { %v4628_v1 = vpop.f32.mrb[67].mxu1 }
0x280b   :  { %v2781_v1 = vadd.f32 %v2780_v62, %v5858_v2  ;;  %v2778_v62 = vadd.f32 %v2777_v17, %v5858_v2 }
0x280f   :  { %v3322_v45 = vpop.f32.mrb[68].mxu1 }
0x2810   :  { %v3329_v29 = vadd.f32 %v3322_v45, %v3279_v57  ;;  %v4645_v40 = vpop.f32.mrb[69].mxu1  ;;  %v3109_v45 = vadd.f32 %v3108_v28, %v5709_v52  ;;  %v3106_v28 = vadd.f32 %v3105_v18, %v5709_v52 }
0x2811   :  { %v3325_v34 = vpop.f32.mrb[70].mxu1 }
0x2812   :  { %5336 = vtanh.f32 %v3329_v29  ;;  %v3330_v48 = vadd.f32 %v3325_v34, %v3280_v24  ;;  %v4646_v35 = vpop.f32.mrb[71].mxu1  ;;  %v4197_v15 = vmul.f32 -1.442695, %v3329_v29 }
0x2814   :  { %5338 = vtanh.f32 %v3330_v48  ;;  %v4198_v50 = vmul.f32 -1.442695, %v3330_v48 }
0x2815   :  { %5340 = vpow2.f32 %v4197_v15 }
0x2816   :  { %5342 = vpow2.f32 %v4198_v50 }
0x281c   :  { %v5337_v39 = vpop.eup %5336 }
0x281d   :  { %3349 = vrot.lane.b32.xlu0 %v5337_v39, %s5451_s15 }
0x281e   :  { %v5339_v49 = vpop.eup %5338 }
0x281f   :  { %3351 = vrot.lane.b32.xlu1 %v5339_v49, %s5451_s15  ;;  %v5341_v46 = vpop.eup %5340 }
0x2820   :  { %v5343_v14 = vpop.eup %5342  ;;  %v3337_v33 = vadd.f32 1.0, %v5341_v46 }
0x2821   :  { %v3338_v44 = vadd.f32 1.0, %v5343_v14 }
0x2822   :  { %5344 = vrcp.f32 %v3337_v33 }
0x2823   :  { %5346 = vrcp.f32 %v3338_v44 }
0x282c   :  { %v5345_v0 = vpop.eup %5344 }
0x282d   :  { %v5347_v8 = vpop.eup %5346  ;;  %v3345_v19 = vmul.f32 %v5345_v0, %v6494_v6 }
0x282e   :  { %v3346_v26 = vmul.f32 %v5347_v8, %v6498_v27 }
0x288f   :  { %v3350_v54 = vpop.permute.xlu0 %3349 }
0x2890   :  { %v3355_v5 = vmul.f32 %v5345_v0, %v3350_v54  ;;  %v4183_v54 = vmul.f32 -1.442695, %v2781_v1 }
0x2891   :  { %v3352_v41 = vpop.permute.xlu1 %3351 }
0x2892   :  { %3359 = vrot.lane.b32.xlu0 %v3355_v5, %s5452_s16  ;;  %v3356_v4 = vmul.f32 %v5347_v8, %v3352_v41  ;;  %v4191_v5 = vmul.f32 -1.442695, %v3106_v28 }
0x2894   :  { %3361 = vrot.lane.b32.xlu1 %v3356_v4, %s5452_s16 }
0x2904   :  { %v3360_v61 = vpop.permute.xlu0 %3359 }
0x2905   :  { %v3365_v42 = vadd.f32 %v3360_v61, %v3345_v19 }
0x2906   :  { %v3362_v16 = vpop.permute.xlu1 %3361 }
0x2907   :  { %5348 = vtanh.f32 %v3365_v42  ;;  %v3366_v51 = vadd.f32 %v3362_v16, %v3346_v26 }
0x2909   :  { %5350 = vtanh.f32 %v3366_v51 }
0x290a   :  { %5352 = vtanh.f32 %v2781_v1 }
0x290b   :  { %5354 = vtanh.f32 %v3109_v45 }
0x290c   :  { %5356 = vtanh.f32 %v2778_v62 }
0x290d   :  { %5358 = vtanh.f32 %v3106_v28 }
0x2911   :  { %v5349_v57 = vpop.eup %5348 }
0x2912   :  { %3371 = vrot.lane.b32.xlu0 %v5349_v57, %s5453_s25 }
0x2913   :  { %v5351_v29 = vpop.eup %5350 }
0x2914   :  { %3373 = vrot.lane.b32.xlu1 %v5351_v29, %s5453_s25  ;;  %v5353_v6 = vpop.eup %5352 }
0x2915   :  { %v5355_v27 = vpop.eup %5354 }
0x2918   :  { %4902 = vrot.lane.b32.xlu1 %v6602_v13, %s5451_s15  ;;  %v5357_v13 = vpop.eup %5356 }
0x2919   :  { %v5359_v39 = vpop.eup %5358 }
0x291c   :  { %2804 = vrot.lane.b32.xlu1 %v5353_v6, %s5451_s15 }
0x2920   :  { %3132 = vrot.lane.b32.xlu1 %v5355_v27, %s5451_s15 }
0x2984   :  { %v3372_v40 = vpop.permute.xlu0 %3371 }
0x2985   :  { %v3377_v34 = vmul.f32 %v5345_v0, %v3372_v40  ;;  %v4182_v0 = vmul.f32 -1.442695, %v2778_v62 }
0x2986   :  { %v3374_v24 = vpop.permute.xlu1 %3373 }
0x2987   :  { %v3378_v48 = vmul.f32 %v5347_v8, %v3374_v24  ;;  %5360 = vpow2.f32 %v4182_v0  ;;  %v4192_v8 = vmul.f32 -1.442695, %v3109_v45 }
0x2988   :  { %5362 = vpow2.f32 %v4183_v54 }
0x2989   :  { %v4896_v35 = vpack.i.bf16 %v3378_v48, %v3377_v34  ;;  %5364 = vpow2.f32 %v4191_v5 }
0x298a   :  { %v4903_v49 = vpop.permute.xlu1 %4902  ;;  %5366 = vpow2.f32 %v4192_v8 }
0x298b   :  { %4897 = vrot.lane.b32.xlu0 %v4896_v35, %s5454_s28  ;;  %v4905_v17 = vunpack.i.h.bf16 %v4903_v49  ;;  %v4904_v50 = vunpack.i.l.bf16 %v4903_v49 }
0x298e   :  { %v2805_v27 = vpop.permute.xlu1 %2804 }
0x298f   :  { %2802 = vrot.lane.b32.xlu0 %v5357_v13, %s5451_s15 }
0x2992   :  { %v3133_v35 = vpop.permute.xlu1 %3132 }
0x2993   :  { %3130 = vrot.lane.b32.xlu0 %v5359_v39, %s5451_s15 }
0x29fd   :  { %v4898_v15 = vpop.permute.xlu0 %4897 }
0x29fe   :  { %v4900_v46 = vunpack.i.h.bf16 %v4898_v15  ;;  %v4899_v18 = vunpack.i.l.bf16 %v4898_v15 }
0x2a00   :  { %v3393_v14 = vsel %vm217_vm5, %v4899_v18, %v4904_v50  ;;  %v3394_v33 = vsel %vm217_vm5, %v4900_v46, %v4905_v17 }
0x2a01   :  { %v3395_v44 = vpack.c.bf16 %v3394_v33, %v3393_v14  ;;  %v2803_v29 = vpop.permute.xlu0 %2802 }
0x2a03   :  { %4654 = vmatmul.mubr.msk.bf16.vlgmr.msra.gmra.mrb[72].mxu1 %vm330_vm6, %v3395_v44 }
0x2a04   :  { %4668 = vmatpush3.bf16.msra.mxu1 %v5758_v3  ;;  %4673 = vmatprep.mubr.msk.bf16.mxu1 %vm5449_vm2, %v5448_v20  ;;  %v5361_v3 = vpop.eup %5360 }
0x2a05   :  { %4669 = vmatprep.subr.bf16.mxu1 %v5448_v20  ;;  %v5363_v4 = vpop.eup %5362  ;;  %v2790_v19 = vadd.f32 1.0, %v5361_v3  ;;  %v3131_v40 = vpop.permute.xlu0 %3130 }
0x2a06   :  { %v2791_v51 = vadd.f32 1.0, %v5363_v4 }
0x2a08   :  { %4670 = vmatpush3.bf16.msra.mxu1 %v5776_v11  ;;  %v5365_v11 = vpop.eup %5364 }
0x2a09   :  { %4671 = vmatprep.subr.bf16.mxu1 %v5448_v20  ;;  %v5367_v1 = vpop.eup %5366  ;;  %v3118_v57 = vadd.f32 1.0, %v5365_v11 }
0x2a0a   :  { %v3119_v45 = vadd.f32 1.0, %v5367_v1 }
0x2a0c   :  { %4672 = vmatpush3.bf16.msra.mxu1 %v5791_v21 }
0x2ad6   :  { %v3433_v41 = vpop.f32.mrb[72].mxu1 }
0x2ad7   :  { %v3434_v61 = vadd.f32 %v3433_v41, %v5637_v53  ;;  %v4655_v42 = vpop.f32.mrb[73].mxu1 }
0x2ad8   :  { %v3436_v26 = vpop.f32.mrb[74].mxu1 }
0x2ad9   :  { %5368 = vtanh.f32 %v3434_v61  ;;  %v3437_v21 = vadd.f32 %v3436_v26, %v5637_v53  ;;  %v4656_v16 = vpop.f32.mrb[75].mxu1  ;;  %v4200_v15 = vmul.f32 -1.442695, %v3434_v61 }
0x2ada   :  { %5370 = vrcp.f32 %v2790_v19 }
0x2adb   :  { %5372 = vtanh.f32 %v3437_v21  ;;  %v4201_v17 = vmul.f32 -1.442695, %v3437_v21 }
0x2adc   :  { %5374 = vrcp.f32 %v2791_v51 }
0x2add   :  { %5376 = vrcp.f32 %v3118_v57 }
0x2ade   :  { %5378 = vrcp.f32 %v3119_v45 }
0x2adf   :  { %5380 = vpow2.f32 %v4200_v15 }
0x2ae0   :  { %5382 = vpow2.f32 %v4201_v17 }
0x2ae3   :  { %v5369_v6 = vpop.eup %5368 }
0x2ae4   :  { %3458 = vrot.lane.b32.xlu0 %v5369_v6, %s5451_s15  ;;  %v6671_v62 = vpop.eup %5370 }
0x2ae5   :  { %v5373_v28 = vpop.eup %5372  ;;  %v2808_v53 = vmul.f32 %v6671_v62, %v2803_v29  ;;  %v2798_v8 = vmul.f32 %v6671_v62, %v6556_v32 }
0x2ae6   :  { %3460 = vrot.lane.b32.xlu1 %v5373_v28, %s5451_s15  ;;  %v6675_v24 = vpop.eup %5374 }
0x2ae7   :  { %v6678_v34 = vpop.eup %5376  ;;  %v2809_v48 = vmul.f32 %v6675_v24, %v2805_v27  ;;  %v2799_v19 = vmul.f32 %v6675_v24, %v6564_v9 }
0x2ae8   :  { %2812 = vrot.lane.b32.xlu0 %v2808_v53, %s5452_s16  ;;  %v3136_v13 = vmul.f32 %v6678_v34, %v3131_v40  ;;  %v6683_v39 = vpop.eup %5378  ;;  %v3126_v42 = vmul.f32 %v6678_v34, %v6566_v38 }
0x2ae9   :  { %v3137_v49 = vmul.f32 %v6683_v39, %v3133_v35  ;;  %v5381_v50 = vpop.eup %5380  ;;  %v3127_v32 = vmul.f32 %v6683_v39, %v6572_v55 }
0x2aea   :  { %2814 = vrot.lane.b32.xlu1 %v2809_v48, %s5452_s16  ;;  %v5383_v46 = vpop.eup %5382  ;;  %v3446_v18 = vadd.f32 1.0, %v5381_v50 }
0x2aeb   :  { %v3447_v14 = vadd.f32 1.0, %v5383_v46 }
0x2aec   :  { %3140 = vrot.lane.b32.xlu0 %v3136_v13, %s5452_s16  ;;  %5384 = vrcp.f32 %v3446_v18 }
0x2aed   :  { %5386 = vrcp.f32 %v3447_v14 }
0x2aee   :  { %3142 = vrot.lane.b32.xlu1 %v3137_v49, %s5452_s16 }
0x2af6   :  { %v5385_v33 = vpop.eup %5384 }
0x2af7   :  { %v5387_v54 = vpop.eup %5386  ;;  %v3454_v55 = vmul.f32 %v5385_v33, %v6580_v59 }
0x2af8   :  { %v3455_v6 = vmul.f32 %v5387_v54, %v6584_v47 }
0x2b56   :  { %v3459_v44 = vpop.permute.xlu0 %3458 }
0x2b57   :  { %v3464_v0 = vmul.f32 %v5385_v33, %v3459_v44 }
0x2b58   :  { %v3461_v5 = vpop.permute.xlu1 %3460 }
0x2b59   :  { %3468 = vrot.lane.b32.xlu0 %v3464_v0, %s5452_s16  ;;  %v3465_v3 = vmul.f32 %v5387_v54, %v3461_v5 }
0x2b5a   :  { %v2813_v41 = vpop.permute.xlu0 %2812 }
0x2b5b   :  { %v6691_v4 = vadd.f32 %v2813_v41, %v2798_v8  ;;  %3470 = vrot.lane.b32.xlu1 %v3465_v3, %s5452_s16 }
0x2b5c   :  { %v2815_v61 = vpop.permute.xlu1 %2814 }
0x2b5d   :  { %5388 = vtanh.f32 %v6691_v4  ;;  %v6699_v11 = vadd.f32 %v2815_v61, %v2799_v19 }
0x2b5e   :  { %v3141_v26 = vpop.permute.xlu0 %3140 }
0x2b5f   :  { %v6701_v21 = vadd.f32 %v3141_v26, %v3126_v42  ;;  %5390 = vtanh.f32 %v6699_v11 }
0x2b60   :  { %v3143_v16 = vpop.permute.xlu1 %3142 }
0x2b61   :  { %5392 = vtanh.f32 %v6701_v21  ;;  %v6707_v9 = vadd.f32 %v3143_v16, %v3127_v32 }
0x2b63   :  { %5394 = vtanh.f32 %v6707_v9 }
0x2b67   :  { %v5389_v51 = vpop.eup %5388 }
0x2b68   :  { %2824 = vrot.lane.b32.xlu0 %v5389_v51, %s5453_s25 }
0x2b69   :  { %v5391_v38 = vpop.eup %5390 }
0x2b6a   :  { %2826 = vrot.lane.b32.xlu1 %v5391_v38, %s5453_s25 }
0x2b6b   :  { %v5393_v1 = vpop.eup %5392 }
0x2b6c   :  { %3152 = vrot.lane.b32.xlu0 %v5393_v1, %s5453_s25 }
0x2b6d   :  { %v5395_v57 = vpop.eup %5394 }
0x2b6e   :  { %3154 = vrot.lane.b32.xlu1 %v5395_v57, %s5453_s25 }
0x2bcb   :  { %v3469_v45 = vpop.permute.xlu0 %3468 }
0x2bcc   :  { %v3474_v29 = vadd.f32 %v3469_v45, %v3454_v55 }
0x2bcd   :  { %v3471_v27 = vpop.permute.xlu1 %3470 }
0x2bce   :  { %5396 = vtanh.f32 %v3474_v29  ;;  %v3475_v28 = vadd.f32 %v3471_v27, %v3455_v6 }
0x2bd0   :  { %5398 = vtanh.f32 %v3475_v28 }
0x2bd8   :  { %v5397_v53 = vpop.eup %5396 }
0x2bd9   :  { %3480 = vrot.lane.b32.xlu0 %v5397_v53, %s5453_s25 }
0x2bda   :  { %v2825_v40 = vpop.permute.xlu0 %2824  ;;  %v5399_v48 = vpop.eup %5398 }
0x2bdb   :  { %3482 = vrot.lane.b32.xlu1 %v5399_v48, %s5453_s25  ;;  %v6719_v13 = vmul.f32 %v6671_v62, %v2825_v40 }
0x2bdc   :  { %v2827_v35 = vpop.permute.xlu1 %2826 }
0x2bdd   :  { %v6722_v59 = vmul.f32 %v6675_v24, %v2827_v35 }
0x2bde   :  { %v3153_v49 = vpop.permute.xlu0 %3152 }
0x2bdf   :  { %v4911_v47 = vpack.i.bf16 %v6722_v59, %v6719_v13  ;;  %v3158_v17 = vmul.f32 %v6678_v34, %v3153_v49 }
0x2be0   :  { %v3155_v15 = vpop.permute.xlu1 %3154 }
0x2be1   :  { %v3159_v50 = vmul.f32 %v6683_v39, %v3155_v15  ;;  %4912 = vrot.lane.b32.xlu1 %v4911_v47, %s5451_s15 }
0x2be3   :  { %v4921_v46 = vpack.i.bf16 %v3159_v50, %v3158_v17 }
0x2be5   :  { %4907 = vrot.lane.b32.xlu0 %v4921_v46, %s5454_s28  ;;  %4922 = vrot.lane.b32.xlu1 %v4921_v46, %s5451_s15 }
0x2c4b   :  { %v3481_v62 = vpop.permute.xlu0 %3480 }
0x2c4c   :  { %v3486_v24 = vmul.f32 %v5385_v33, %v3481_v62 }
0x2c4d   :  { %v3483_v18 = vpop.permute.xlu1 %3482 }
0x2c4e   :  { %v3487_v14 = vmul.f32 %v5387_v54, %v3483_v18 }
0x2c50   :  { %v4916_v44 = vpack.i.bf16 %v3487_v14, %v3486_v24 }
0x2c52   :  { %4917 = vrot.lane.b32.xlu0 %v4916_v44, %s5454_s28 }
0x2c53   :  { %v4913_v0 = vpop.permute.xlu1 %4912 }
0x2c54   :  { %v4915_v8 = vunpack.i.h.bf16 %v4913_v0  ;;  %v4914_v34 = vunpack.i.l.bf16 %v4913_v0 }
0x2c57   :  { %v4908_v5 = vpop.permute.xlu0 %4907  ;;  %v4923_v33 = vpop.permute.xlu1 %4922 }
0x2c58   :  { %v4910_v3 = vunpack.i.h.bf16 %v4908_v5  ;;  %v4909_v39 = vunpack.i.l.bf16 %v4908_v5  ;;  %v4925_v42 = vunpack.i.h.bf16 %v4923_v33  ;;  %v4924_v26 = vunpack.i.l.bf16 %v4923_v33 }
0x2c5a   :  { %v3174_v41 = vsel %vm217_vm5, %v4909_v39, %v4914_v34  ;;  %v3175_v19 = vsel %vm217_vm5, %v4910_v3, %v4915_v8 }
0x2c5b   :  { %v3176_v61 = vpack.c.bf16 %v3175_v19, %v3174_v41 }
0x2c5d   :  { %4636 = vmatmul.mubr.msk.bf16.vlgmr.msra.gmra.mrb[56].mxu0 %vm330_vm6, %v3176_v61 }
0x2c5e   :  { %4658 = vmatpush3.bf16.msra.mxu0 %v5660_v22  ;;  %4663 = vmatprep.mubr.msk.bf16.mxu0 %vm5449_vm2, %v5448_v20 }
0x2c5f   :  { %4659 = vmatprep.subr.bf16.mxu0 %v5448_v20 }
0x2c62   :  { %4660 = vmatpush3.bf16.msra.mxu0 %v5666_v25 }
0x2c63   :  { %4661 = vmatprep.subr.bf16.mxu0 %v5448_v20 }
0x2c66   :  { %4662 = vmatpush3.bf16.msra.mxu0 %v5681_v37 }
0x2cc4   :  { %v4918_v54 = vpop.permute.xlu0 %4917 }
0x2cc5   :  { %v4920_v32 = vunpack.i.h.bf16 %v4918_v54  ;;  %v4919_v16 = vunpack.i.l.bf16 %v4918_v54 }
0x2cc7   :  { %v3502_v51 = vsel %vm217_vm5, %v4919_v16, %v4924_v26  ;;  %v3503_v22 = vsel %vm217_vm5, %v4920_v32, %v4925_v42 }
0x2cc8   :  { %v3504_v38 = vpack.c.bf16 %v3503_v22, %v3502_v51 }
0x2cca   :  { %4664 = vmatmul.mubr.msk.bf16.vlgmr.msra.gmra.mrb[60].mxu0 %vm330_vm6, %v3504_v38 }
0x2d30   :  { %v3214_v1 = vpop.f32.mrb[56].mxu0 }
0x2d31   :  { %v3215_v25 = vadd.f32 %v3214_v1, %v5858_v2  ;;  %v4637_v57 = vpop.f32.mrb[57].mxu0 }
0x2d32   :  { %v3217_v20 = vpop.f32.mrb[58].mxu0 }
0x2d33   :  { %5400 = vtanh.f32 %v3215_v25  ;;  %v3218_v37 = vadd.f32 %v3217_v20, %v5858_v2  ;;  %v4638_v55 = vpop.f32.mrb[59].mxu0  ;;  %v4194_v6 = vmul.f32 -1.442695, %v3215_v25 }
0x2d35   :  { %5402 = vtanh.f32 %v3218_v37  ;;  %v4195_v27 = vmul.f32 -1.442695, %v3218_v37 }
0x2d36   :  { %5404 = vpow2.f32 %v4194_v6 }
0x2d37   :  { %5406 = vpow2.f32 %v4195_v27 }
0x2d3d   :  { %v5401_v45 = vpop.eup %5400 }
0x2d3e   :  { %3239 = vrot.lane.b32.xlu0 %v5401_v45, %s5451_s15 }
0x2d3f   :  { %v5403_v29 = vpop.eup %5402 }
0x2d40   :  { %3241 = vrot.lane.b32.xlu1 %v5403_v29, %s5451_s15  ;;  %v5405_v48 = vpop.eup %5404 }
0x2d41   :  { %v5407_v15 = vpop.eup %5406  ;;  %v3227_v17 = vadd.f32 1.0, %v5405_v48 }
0x2d42   :  { %v3228_v50 = vadd.f32 1.0, %v5407_v15 }
0x2d9d   :  { %v3542_v28 = vpop.f32.mrb[60].mxu0 }
0x2d9e   :  { %v3543_v53 = vadd.f32 %v3542_v28, %v5709_v52  ;;  %v4665_v40 = vpop.f32.mrb[61].mxu0 }
0x2d9f   :  { %v3545_v35 = vpop.f32.mrb[62].mxu0 }
0x2da0   :  { %5408 = vtanh.f32 %v3543_v53  ;;  %v3546_v49 = vadd.f32 %v3545_v35, %v5709_v52  ;;  %v4666_v47 = vpop.f32.mrb[63].mxu0  ;;  %v4203_v5 = vmul.f32 -1.442695, %v3543_v53 }
0x2da2   :  { %5410 = vtanh.f32 %v3546_v49  ;;  %v4204_v8 = vmul.f32 -1.442695, %v3546_v49 }
0x2da3   :  { %5412 = vrcp.f32 %v3227_v17 }
0x2da4   :  { %5414 = vrcp.f32 %v3228_v50 }
0x2da5   :  { %5416 = vpow2.f32 %v4203_v5 }
0x2da6   :  { %5418 = vpow2.f32 %v4204_v8 }
0x2daa   :  { %v5409_v46 = vpop.eup %5408 }
0x2dab   :  { %3567 = vrot.lane.b32.xlu0 %v5409_v46, %s5451_s15 }
0x2dac   :  { %v5411_v62 = vpop.eup %5410 }
0x2dad   :  { %3569 = vrot.lane.b32.xlu1 %v5411_v62, %s5451_s15  ;;  %v5413_v18 = vpop.eup %5412 }
0x2dae   :  { %v5415_v44 = vpop.eup %5414  ;;  %v3235_v32 = vmul.f32 %v5413_v18, %v6691_v4 }
0x2daf   :  { %v5417_v34 = vpop.eup %5416  ;;  %v3236_v22 = vmul.f32 %v5415_v44, %v6699_v11 }
0x2db0   :  { %v3240_v24 = vpop.permute.xlu0 %3239  ;;  %v5419_v3 = vpop.eup %5418  ;;  %v3555_v39 = vadd.f32 1.0, %v5417_v34 }
0x2db1   :  { %v3245_v14 = vmul.f32 %v5413_v18, %v3240_v24  ;;  %v3556_v41 = vadd.f32 1.0, %v5419_v3 }
0x2db2   :  { %v3242_v0 = vpop.permute.xlu1 %3241  ;;  %5420 = vrcp.f32 %v3555_v39 }
0x2db3   :  { %3249 = vrot.lane.b32.xlu0 %v3245_v14, %s5452_s16  ;;  %v3246_v52 = vmul.f32 %v5415_v44, %v3242_v0  ;;  %5422 = vrcp.f32 %v3556_v41 }
0x2db5   :  { %3251 = vrot.lane.b32.xlu1 %v3246_v52, %s5452_s16 }
0x2dbc   :  { %v5421_v19 = vpop.eup %5420 }
0x2dbd   :  { %v5423_v54 = vpop.eup %5422  ;;  %v3563_v4 = vmul.f32 %v5421_v19, %v6701_v21 }
0x2dbe   :  { %v3564_v55 = vmul.f32 %v5423_v54, %v6707_v9 }
0x2e1d   :  { %v3568_v61 = vpop.permute.xlu0 %3567 }
0x2e1e   :  { %v3573_v33 = vmul.f32 %v5421_v19, %v3568_v61 }
0x2e1f   :  { %v3570_v42 = vpop.permute.xlu1 %3569 }
0x2e20   :  { %3577 = vrot.lane.b32.xlu0 %v3573_v33, %s5452_s16  ;;  %v3574_v26 = vmul.f32 %v5423_v54, %v3570_v42 }
0x2e22   :  { %3579 = vrot.lane.b32.xlu1 %v3574_v26, %s5452_s16 }
0x2e25   :  { %v3250_v16 = vpop.permute.xlu0 %3249 }
0x2e26   :  { %v6758_v51 = vadd.f32 %v3250_v16, %v3235_v32 }
0x2e27   :  { %v3252_v38 = vpop.permute.xlu1 %3251 }
0x2e28   :  { %5424 = vtanh.f32 %v6758_v51  ;;  %v6762_v1 = vadd.f32 %v3252_v38, %v3236_v22 }
0x2e2a   :  { %5426 = vtanh.f32 %v6762_v1 }
0x2e32   :  { %v5425_v25 = vpop.eup %5424 }
0x2e33   :  { %3261 = vrot.lane.b32.xlu0 %v5425_v25, %s5453_s25 }
0x2e34   :  { %v5427_v57 = vpop.eup %5426 }
0x2e35   :  { %3263 = vrot.lane.b32.xlu1 %v5427_v57, %s5453_s25 }
0x2e92   :  { %v3578_v20 = vpop.permute.xlu0 %3577 }
0x2e93   :  { %v3583_v37 = vadd.f32 %v3578_v20, %v3563_v4 }
0x2e94   :  { %v3580_v11 = vpop.permute.xlu1 %3579 }
0x2e95   :  { %5428 = vtanh.f32 %v3583_v37  ;;  %v3584_v45 = vadd.f32 %v3580_v11, %v3564_v55 }
0x2e97   :  { %5430 = vtanh.f32 %v3584_v45  ;;  %v3716_v45 = vld [vmem:[%s7072_s1 + $0xa0] sm:$0xff] }
0x2e9f   :  { %v5429_v29 = vpop.eup %5428 }
0x2ea0   :  { %3589 = vrot.lane.b32.xlu0 %v5429_v29, %s5453_s25  ;;  %v3717_v29 = vld [vmem:[%s7072_s1 + $0xa8] sm:$0xff] }
0x2ea1   :  { %v5431_v6 = vpop.eup %5430 }
0x2ea2   :  { %3591 = vrot.lane.b32.xlu1 %v5431_v6, %s5453_s25  ;;  %v3719_v6 = vpack.c.bf16 %v3717_v29, %v3716_v45 }
0x2ea4   :  { %4677 = vmatprep.subr.bf16.mxu0 %v3719_v6 }
0x2ea5   :  { %v3262_v27 = vpop.permute.xlu0 %3261  ;;  %4678 = vmatpush3.bf16.msra.mxu0 %v3719_v6 }
0x2ea6   :  { %v6771_v53 = vmul.f32 %v5413_v18, %v3262_v27 }
0x2ea7   :  { %v3264_v28 = vpop.permute.xlu1 %3263 }
0x2ea8   :  { %v6773_v40 = vmul.f32 %v5415_v44, %v3264_v28 }
0x2eaa   :  { %v4931_v21 = vpack.i.bf16 %v6773_v40, %v6771_v53 }
0x2eac   :  { %4932 = vrot.lane.b32.xlu1 %v4931_v21, %s5451_s15 }
0x2f12   :  { %v3590_v9 = vpop.permute.xlu0 %3589 }
0x2f13   :  { %v3595_v35 = vmul.f32 %v5421_v19, %v3590_v9 }
0x2f14   :  { %v3592_v48 = vpop.permute.xlu1 %3591 }
0x2f15   :  { %v3596_v49 = vmul.f32 %v5423_v54, %v3592_v48 }
0x2f17   :  { %v4926_v47 = vpack.i.bf16 %v3596_v49, %v3595_v35 }
0x2f19   :  { %4927 = vrot.lane.b32.xlu0 %v4926_v47, %s5454_s28 }
0x2f1e   :  { %v4933_v15 = vpop.permute.xlu1 %4932 }
0x2f1f   :  { %v4935_v50 = vunpack.i.h.bf16 %v4933_v15  ;;  %v4934_v46 = vunpack.i.l.bf16 %v4933_v15 }
0x2f8b   :  { %v4928_v17 = vpop.permute.xlu0 %4927 }
0x2f8c   :  { %v4930_v62 = vunpack.i.h.bf16 %v4928_v17  ;;  %v4929_v18 = vunpack.i.l.bf16 %v4928_v17 }
0x2f8e   :  { %v3611_v24 = vsel %vm217_vm5, %v4929_v18, %v4934_v46  ;;  %v3612_v14 = vsel %vm217_vm5, %v4930_v62, %v4935_v50 }
0x2f8f   :  { %v3613_v44 = vpack.c.bf16 %v3612_v14, %v3611_v24 }
0x2f91   :  { %4674 = vmatmul.mubr.msk.bf16.vlgmr.msra.gmra.mrb[76].mxu1 %vm330_vm6, %v3613_v44 }
0x3064   :  { %v3651_v0 = vpop.f32.mrb[76].mxu1 }
0x3065   :  { %v3652_v52 = vadd.f32 %v3651_v0, %v5858_v2  ;;  %v4675_v5 = vpop.f32.mrb[77].mxu1 }
0x3066   :  { %v3654_v8 = vpop.f32.mrb[78].mxu1 }
0x3067   :  { %5432 = vtanh.f32 %v3652_v52  ;;  %v3655_v34 = vadd.f32 %v3654_v8, %v5858_v2  ;;  %v4676_v3 = vpop.f32.mrb[79].mxu1  ;;  %v4206_v19 = vmul.f32 -1.442695, %v3652_v52 }
0x3069   :  { %5434 = vtanh.f32 %v3655_v34  ;;  %v4207_v61 = vmul.f32 -1.442695, %v3655_v34 }
0x306a   :  { %5436 = vpow2.f32 %v4206_v19 }
0x306b   :  { %5438 = vpow2.f32 %v4207_v61 }
0x3071   :  { %v5433_v39 = vpop.eup %5432 }
0x3072   :  { %3676 = vrot.lane.b32.xlu0 %v5433_v39, %s5451_s15 }
0x3073   :  { %v5435_v41 = vpop.eup %5434 }
0x3074   :  { %3678 = vrot.lane.b32.xlu1 %v5435_v41, %s5451_s15  ;;  %v5437_v33 = vpop.eup %5436 }
0x3075   :  { %v5439_v54 = vpop.eup %5438  ;;  %v3664_v42 = vadd.f32 1.0, %v5437_v33 }
0x3076   :  { %v3665_v26 = vadd.f32 1.0, %v5439_v54 }
0x3077   :  { %5440 = vrcp.f32 %v3664_v42 }
0x3078   :  { %5442 = vrcp.f32 %v3665_v26 }
0x3081   :  { %v5441_v32 = vpop.eup %5440 }
0x3082   :  { %v5443_v22 = vpop.eup %5442  ;;  %v3672_v57 = vmul.f32 %v5441_v32, %v6758_v51  ;;  %v3718_v51 = vld [vmem:[%s7072_s1 + $0xb0] sm:$0xff] }
0x3083   :  { %v3673_v37 = vmul.f32 %v5443_v22, %v6762_v1  ;;  %v3720_v28 = vpack.c.bf16 %v3718_v51, %v3718_v51 }
0x3085   :  { %4701 = vmatprep.subr.msk.bf16.mxu0 %vm68_vm0, %v3720_v28  ;;  %v3771_v21 = vsel %vm68_vm0, %v3720_v28, 0 }
0x3086   :  { %4680 = vmatpush3.bf16.msra.mxu0 %v3771_v21 }
0x30e4   :  { %v3677_v2 = vpop.permute.xlu0 %3676 }
0x30e5   :  { %v3682_v16 = vmul.f32 %v5441_v32, %v3677_v2 }
0x30e6   :  { %v3679_v38 = vpop.permute.xlu1 %3678 }
0x30e7   :  { %3686 = vrot.lane.b32.xlu0 %v3682_v16, %s5452_s16  ;;  %v3683_v25 = vmul.f32 %v5443_v22, %v3679_v38 }
0x30e9   :  { %3688 = vrot.lane.b32.xlu1 %v3683_v25, %s5452_s16 }
0x3159   :  { %v3687_v4 = vpop.permute.xlu0 %3686 }
0x315a   :  { %v3692_v20 = vadd.f32 %v3687_v4, %v3672_v57 }
0x315b   :  { %v3689_v55 = vpop.permute.xlu1 %3688 }
0x315c   :  { %5444 = vtanh.f32 %v3692_v20  ;;  %v3693_v11 = vadd.f32 %v3689_v55, %v3673_v37 }
0x315e   :  { %5446 = vtanh.f32 %v3693_v11 }
0x3166   :  { %v5445_v27 = vpop.eup %5444 }
0x3167   :  { %3698 = vrot.lane.b32.xlu0 %v5445_v27, %s5453_s25 }
0x3168   :  { %v5447_v1 = vpop.eup %5446 }
0x3169   :  { %3700 = vrot.lane.b32.xlu1 %v5447_v1, %s5453_s25  ;;  %s5455_s25 = smov 124  }
0x316b   :  { %649 = vrot.lane.b32.xlu0 %v5944_v36, %s5454_s28 }
0x316d   :  { %651 = vrot.lane.b32.xlu1 %v5947_v43, %s5454_s28 }
0x316f   :  { %1086 = vrot.lane.b32.xlu0 %v6140_v10, %s5454_s28 }
0x3171   :  { %1088 = vrot.lane.b32.xlu1 %v6143_v7, %s5454_s28 }
0x3173   :  { %1523 = vrot.lane.b32.xlu0 %v6290_v60, %s5454_s28 }
0x3175   :  { %1525 = vrot.lane.b32.xlu1 %v6293_v12, %s5454_s28 }
0x3177   :  { %1960 = vrot.lane.b32.xlu0 %v6440_v23, %s5454_s28 }
0x3179   :  { %1962 = vrot.lane.b32.xlu1 %v6443_v56, %s5454_s28 }
0x317b   :  { %2397 = vrot.lane.b32.xlu0 %v6590_v63, %s5454_s28 }
0x317d   :  { %2399 = vrot.lane.b32.xlu1 %v6593_v58, %s5454_s28 }
0x317f   :  { %2834 = vrot.lane.b32.xlu0 %v6719_v13, %s5454_s28 }
0x3181   :  { %2836 = vrot.lane.b32.xlu1 %v6722_v59, %s5454_s28 }
0x3183   :  { %3271 = vrot.lane.b32.xlu0 %v6771_v53, %s5454_s28 }
0x3185   :  { %3273 = vrot.lane.b32.xlu1 %v6773_v40, %s5454_s28 }
0x31d9   :  { %v3699_v36 = vpop.permute.xlu0 %3698 }
0x31da   :  { %v3704_v43 = vmul.f32 %v5441_v32, %v3699_v36 }
0x31db   :  { %v3701_v10 = vpop.permute.xlu1 %3700 }
0x31dc   :  { %3708 = vrot.lane.b32.xlu0 %v3704_v43, %s5454_s28  ;;  %v3705_v7 = vmul.f32 %v5443_v22, %v3701_v10 }
0x31dd   :  { %v650_v60 = vpop.permute.xlu0 %649 }
0x31de   :  { %655 = vst.msk [vmem:[#allocation3] sm:$0xff] %vm217_vm5, %v650_v60  ;;  %3710 = vrot.lane.b32.xlu1 %v3705_v7, %s5454_s28  ;;  %s5456_s28 = smov 120  }
0x31df   :  { %v652_v12 = vpop.permute.xlu1 %651 }
0x31e0   :  { %656 = vst.msk [vmem:[#allocation3 + $0x8] sm:$0xff] %vm217_vm5, %v652_v12 }
0x31e1   :  { %v1087_v23 = vpop.permute.xlu0 %1086 }
0x31e2   :  { %1092 = vst.msk [vmem:[#allocation3 + $0x10] sm:$0xff] %vm217_vm5, %v1087_v23 }
0x31e3   :  { %v1089_v56 = vpop.permute.xlu1 %1088 }
0x31e4   :  { %1093 = vst.msk [vmem:[#allocation3 + $0x18] sm:$0xff] %vm217_vm5, %v1089_v56 }
0x31e5   :  { %v1524_v63 = vpop.permute.xlu0 %1523  ;;  %v3722_v13 = vld [vmem:[#allocation3] sm:$0xff] }
0x31e6   :  { %1529 = vst.msk [vmem:[#allocation3 + $0x20] sm:$0xff] %vm217_vm5, %v1524_v63 }
0x31e7   :  { %v1526_v58 = vpop.permute.xlu1 %1525  ;;  %v3723_v59 = vld [vmem:[#allocation3 + $0x8] sm:$0xff] }
0x31e8   :  { %1530 = vst.msk [vmem:[#allocation3 + $0x28] sm:$0xff] %vm217_vm5, %v1526_v58  ;;  %v3738_v40 = vpack.c.bf16 %v3723_v59, %v3722_v13 }
0x31e9   :  { %v1961_v53 = vpop.permute.xlu0 %1960  ;;  %v3724_v48 = vld [vmem:[#allocation3 + $0x10] sm:$0xff] }
0x31ea   :  { %1966 = vst.msk [vmem:[#allocation3 + $0x30] sm:$0xff] %vm217_vm5, %v1961_v53  ;;  %4681 = vmatprep.mubr.msk.bf16.mxu0 %vm217_vm5, %v3738_v40 }
0x31eb   :  { %v1963_v9 = vpop.permute.xlu1 %1962  ;;  %v3725_v35 = vld [vmem:[#allocation3 + $0x18] sm:$0xff] }
0x31ec   :  { %1967 = vst.msk [vmem:[#allocation3 + $0x38] sm:$0xff] %vm217_vm5, %v1963_v9  ;;  %v3739_v47 = vpack.c.bf16 %v3725_v35, %v3724_v48 }
0x31ed   :  { %v2398_v49 = vpop.permute.xlu0 %2397  ;;  %v3726_v17 = vld [vmem:[#allocation3 + $0x20] sm:$0xff] }
0x31ee   :  { %2403 = vst.msk [vmem:[#allocation3 + $0x40] sm:$0xff] %vm217_vm5, %v2398_v49  ;;  %4682 = vmatmul.mubr.msk.bf16.vlgmr.msra.gmra.mrb[64].mxu0 %vm217_vm5, %v3739_v47 }
0x31ef   :  { %v2400_v15 = vpop.permute.xlu1 %2399  ;;  %v3727_v50 = vld [vmem:[#allocation3 + $0x28] sm:$0xff] }
0x31f0   :  { %2404 = vst.msk [vmem:[#allocation3 + $0x48] sm:$0xff] %vm217_vm5, %v2400_v15  ;;  %v3740_v62 = vpack.c.bf16 %v3727_v50, %v3726_v17 }
0x31f1   :  { %v2835_v46 = vpop.permute.xlu0 %2834  ;;  %v3728_v24 = vld [vmem:[#allocation3 + $0x30] sm:$0xff] }
0x31f2   :  { %2840 = vst.msk [vmem:[#allocation3 + $0x50] sm:$0xff] %vm217_vm5, %v2835_v46  ;;  %4685 = vmatprep.mubr.msk.bf16.mxu0 %vm217_vm5, %v3740_v62 }
0x31f3   :  { %v2837_v18 = vpop.permute.xlu1 %2836  ;;  %v3729_v14 = vld [vmem:[#allocation3 + $0x38] sm:$0xff] }
0x31f4   :  { %2841 = vst.msk [vmem:[#allocation3 + $0x58] sm:$0xff] %vm217_vm5, %v2837_v18  ;;  %v3741_v0 = vpack.c.bf16 %v3729_v14, %v3728_v24 }
0x31f5   :  { %v3272_v44 = vpop.permute.xlu0 %3271  ;;  %v3730_v5 = vld [vmem:[#allocation3 + $0x40] sm:$0xff] }
0x31f6   :  { %3277 = vst.msk [vmem:[#allocation3 + $0x60] sm:$0xff] %vm217_vm5, %v3272_v44  ;;  %4686 = vmatmul.mubr.msk.bf16.gmra.mrb[68].mxu0 %vm217_vm5, %v3741_v0 }
0x31f7   :  { %v3274_v52 = vpop.permute.xlu1 %3273  ;;  %v3731_v8 = vld [vmem:[#allocation3 + $0x48] sm:$0xff] }
0x31f8   :  { %3278 = vst.msk [vmem:[#allocation3 + $0x68] sm:$0xff] %vm217_vm5, %v3274_v52  ;;  %v3742_v34 = vpack.c.bf16 %v3731_v8, %v3730_v5 }
0x31f9   :  { %v3732_v3 = vld [vmem:[#allocation3 + $0x50] sm:$0xff] }
0x31fa   :  { %4689 = vmatprep.mubr.msk.bf16.mxu0 %vm217_vm5, %v3742_v34 }
0x31fb   :  { %v3733_v39 = vld [vmem:[#allocation3 + $0x58] sm:$0xff] }
0x31fc   :  { %v3743_v41 = vpack.c.bf16 %v3733_v39, %v3732_v3 }
0x31fd   :  { %v3734_v19 = vld [vmem:[#allocation3 + $0x60] sm:$0xff] }
0x31fe   :  { %4690 = vmatmul.mubr.msk.bf16.gmra.mrb[72].mxu0 %vm217_vm5, %v3743_v41 }
0x31ff   :  { %v3735_v61 = vld [vmem:[#allocation3 + $0x68] sm:$0xff] }
0x3200   :  { %v3744_v33 = vpack.c.bf16 %v3735_v61, %v3734_v19 }
0x3202   :  { %4693 = vmatprep.mubr.msk.bf16.mxu0 %vm217_vm5, %v3744_v33 }
0x324e   :  { %v3709_v54 = vpop.permute.xlu0 %3708 }
0x324f   :  { %3714 = vst.msk [vmem:[#allocation3 + $0x70] sm:$0xff] %vm217_vm5, %v3709_v54 }
0x3250   :  { %v3711_v42 = vpop.permute.xlu1 %3710 }
0x3251   :  { %3715 = vst.msk [vmem:[#allocation3 + $0x78] sm:$0xff] %vm217_vm5, %v3711_v42 }
0x3256   :  { %v3736_v26 = vld [vmem:[#allocation3 + $0x70] sm:$0xff] }
0x3258   :  { %v3737_v32 = vld [vmem:[#allocation3 + $0x78] sm:$0xff] }
0x3259   :  { %v3745_v2 = vpack.c.bf16 %v3737_v32, %v3736_v26 }
0x325b   :  { %4694 = vmatmul.mubr.msk.bf16.gmra.mrb[76].mxu0 %vm217_vm5, %v3745_v2 }
0x32c1   :  { %v6857_v16 = vpop.f32.mrb[64].mxu0 }
0x32c2   :  { %v6859_v22 = vpop.f32.mrb[65].mxu0  ;;  %v3910_v25 = vrot.slane %v6857_v16, 1  ;;  %v3999_v57 = vrot.slane %v6857_v16, 2 }
0x32c3   :  { %v6861_v38 = vpop.f32.mrb[66].mxu0  ;;  %v3907_v55 = vrot.slane %v6859_v22, 1  ;;  %v3996_v11 = vrot.slane %v6859_v22, 2 }
0x32c4   :  { %v3911_v4 = vrot.slane %v6861_v38, 1  ;;  %v4000_v20 = vrot.slane %v6861_v38, 2  ;;  %v6867_v37 = vpop.f32.mrb[67].mxu0 }
0x32c5   :  { %v3908_v45 = vrot.slane %v6867_v37, 1  ;;  %v3997_v29 = vrot.slane %v6867_v37, 2 }
0x32c6   :  { %v3912_v6 = vsel %vm3906_vm7, %v3910_v25, %v3911_v4  ;;  %v4001_v27 = vsel %vm3995_vm8, %v3999_v57, %v4000_v20 }
0x32c7   :  { %3933 = vrot.lane.b32.xlu1 %v3908_v45, %s5455_s25  ;;  %v3909_v51 = vsel %vm3906_vm7, %v3907_v55, %v3908_v45  ;;  %v3998_v1 = vsel %vm3995_vm8, %v3996_v11, %v3997_v29 }
0x32c8   :  { %3931 = vrot.lane.b32.xlu0 %v3909_v51, %s5455_s25  ;;  %v3721_v51 = vld [vmem:[%s7072_s1 + $0xb8] sm:$0xff] }
0x32c9   :  { %v6879_v28 = vpop.f32.mrb[68].mxu0 }
0x32ca   :  { %v6881_v21 = vpop.f32.mrb[69].mxu0  ;;  %v3916_v43 = vrot.slane %v6879_v28, 1  ;;  %v4005_v10 = vrot.slane %v6879_v28, 2 }
0x32cb   :  { %3937 = vrot.lane.b32.xlu1 %v3911_v4, %s5455_s25  ;;  %v6884_v36 = vpop.f32.mrb[70].mxu0  ;;  %v3913_v23 = vrot.slane %v6881_v21, 1  ;;  %v4002_v56 = vrot.slane %v6881_v21, 2 }
0x32cc   :  { %v3917_v7 = vrot.slane %v6884_v36, 1  ;;  %v4006_v60 = vrot.slane %v6884_v36, 2  ;;  %3935 = vrot.lane.b32.xlu0 %v3912_v6, %s5455_s25  ;;  %v6891_v12 = vpop.f32.mrb[71].mxu0 }
0x32cd   :  { %v3914_v63 = vrot.slane %v6891_v12, 1  ;;  %v4003_v58 = vrot.slane %v6891_v12, 2 }
0x32ce   :  { %v3918_v13 = vsel %vm3906_vm7, %v3916_v43, %v3917_v7  ;;  %v4007_v59 = vsel %vm3995_vm8, %v4005_v10, %v4006_v60  ;;  %v6974_v10 = vrot.slane %v3721_v51, %v41_v31 }
0x32cf   :  { %3941 = vrot.lane.b32.xlu1 %v3914_v63, %s5455_s25  ;;  %v3915_v53 = vsel %vm3906_vm7, %v3913_v23, %v3914_v63  ;;  %v4004_v40 = vsel %vm3995_vm8, %v4002_v56, %v4003_v58 }
0x32d0   :  { %3939 = vrot.lane.b32.xlu0 %v3915_v53, %s5455_s25  ;;  %v3874_v56 = vadd.f32 %v6974_v10, %v6859_v22  ;;  %v3876_v30 = vadd.f32 %v6857_v16, %v6974_v10  ;;  %v3878_v16 = vadd.f32 %v6974_v10, %v6881_v21  ;;  %v3880_v21 = vadd.f32 %v6879_v28, %v6974_v10 }
0x32d1   :  { %v6903_v9 = vpop.f32.mrb[72].mxu0 }
0x32d2   :  { %v6905_v48 = vpop.f32.mrb[73].mxu0  ;;  %v3922_v49 = vrot.slane %v6903_v9, 1  ;;  %v4011_v47 = vrot.slane %v6903_v9, 2 }
0x32d3   :  { %3945 = vrot.lane.b32.xlu1 %v3917_v7, %s5455_s25  ;;  %v6908_v35 = vpop.f32.mrb[74].mxu0  ;;  %v3919_v46 = vrot.slane %v6905_v48, 1  ;;  %v4008_v62 = vrot.slane %v6905_v48, 2  ;;  %v3882_v28 = vadd.f32 %v6974_v10, %v6905_v48  ;;  %v3884_v48 = vadd.f32 %v6903_v9, %v6974_v10 }
0x32d4   :  { %v3923_v15 = vrot.slane %v6908_v35, 1  ;;  %v4012_v17 = vrot.slane %v6908_v35, 2  ;;  %3943 = vrot.lane.b32.xlu0 %v3918_v13, %s5455_s25  ;;  %v6915_v50 = vpop.f32.mrb[75].mxu0 }
0x32d5   :  { %v3920_v18 = vrot.slane %v6915_v50, 1  ;;  %v4009_v24 = vrot.slane %v6915_v50, 2 }
0x32d6   :  { %v3924_v14 = vsel %vm3906_vm7, %v3922_v49, %v3923_v15  ;;  %v4013_v44 = vsel %vm3995_vm8, %v4011_v47, %v4012_v17 }
0x32d7   :  { %3949 = vrot.lane.b32.xlu1 %v3920_v18, %s5455_s25  ;;  %v3921_v0 = vsel %vm3906_vm7, %v3919_v46, %v3920_v18  ;;  %v4010_v52 = vsel %vm3995_vm8, %v4008_v62, %v4009_v24 }
0x32d8   :  { %3947 = vrot.lane.b32.xlu0 %v3921_v0, %s5455_s25 }
0x32db   :  { %3953 = vrot.lane.b32.xlu1 %v3923_v15, %s5455_s25 }
0x32dc   :  { %3951 = vrot.lane.b32.xlu0 %v3924_v14, %s5455_s25 }
0x32df   :  { %4022 = vrot.lane.b32.xlu1 %v3997_v29, %s5456_s28 }
0x32e0   :  { %4020 = vrot.lane.b32.xlu0 %v3998_v1, %s5456_s28 }
0x32e3   :  { %4026 = vrot.lane.b32.xlu1 %v4000_v20, %s5456_s28 }
0x32e4   :  { %4024 = vrot.lane.b32.xlu0 %v4001_v27, %s5456_s28 }
0x32e7   :  { %4030 = vrot.lane.b32.xlu1 %v4003_v58, %s5456_s28 }
0x32e8   :  { %4028 = vrot.lane.b32.xlu0 %v4004_v40, %s5456_s28 }
0x32eb   :  { %4034 = vrot.lane.b32.xlu1 %v4006_v60, %s5456_s28  ;;  %v3875_v60 = vadd.f32 %v6974_v10, %v6867_v37 }
0x32ec   :  { %4032 = vrot.lane.b32.xlu0 %v4007_v59, %s5456_s28  ;;  %v3877_v59 = vadd.f32 %v6861_v38, %v6974_v10  ;;  %v3879_v38 = vadd.f32 %v6974_v10, %v6891_v12  ;;  %v3881_v12 = vadd.f32 %v6884_v36, %v6974_v10  ;;  %v3883_v36 = vadd.f32 %v6974_v10, %v6915_v50 }
0x32ed   :  { %v3885_v50 = vadd.f32 %v6908_v35, %v6974_v10 }
0x32ef   :  { %4038 = vrot.lane.b32.xlu1 %v4009_v24, %s5456_s28 }
0x32f0   :  { %4036 = vrot.lane.b32.xlu0 %v4010_v52, %s5456_s28 }
0x32f3   :  { %4042 = vrot.lane.b32.xlu1 %v4012_v17, %s5456_s28 }
0x32f4   :  { %4040 = vrot.lane.b32.xlu0 %v4013_v44, %s5456_s28 }
0x332e   :  { %v6941_v5 = vpop.f32.mrb[76].mxu0 }
0x332f   :  { %v6943_v8 = vpop.f32.mrb[77].mxu0  ;;  %v3928_v3 = vrot.slane %v6941_v5, 1  ;;  %v4017_v39 = vrot.slane %v6941_v5, 2 }
0x3330   :  { %v6945_v34 = vpop.f32.mrb[78].mxu0  ;;  %v3925_v33 = vrot.slane %v6943_v8, 1  ;;  %v4014_v54 = vrot.slane %v6943_v8, 2 }
0x3331   :  { %v3929_v41 = vrot.slane %v6945_v34, 1  ;;  %v4018_v19 = vrot.slane %v6945_v34, 2  ;;  %v6951_v61 = vpop.f32.mrb[79].mxu0 }
0x3332   :  { %v3926_v42 = vrot.slane %v6951_v61, 1  ;;  %v4015_v26 = vrot.slane %v6951_v61, 2 }
0x3333   :  { %3961 = vrot.lane.b32.xlu1 %v3929_v41, %s5455_s25  ;;  %v3930_v32 = vsel %vm3906_vm7, %v3928_v3, %v3929_v41  ;;  %v4019_v2 = vsel %vm3995_vm8, %v4017_v39, %v4018_v19 }
0x3334   :  { %3959 = vrot.lane.b32.xlu0 %v3930_v32, %s5455_s25  ;;  %v3927_v25 = vsel %vm3906_vm7, %v3925_v33, %v3926_v42  ;;  %v4016_v57 = vsel %vm3995_vm8, %v4014_v54, %v4015_v26 }
0x3337   :  { %3957 = vrot.lane.b32.xlu1 %v3926_v42, %s5455_s25 }
0x3338   :  { %3955 = vrot.lane.b32.xlu0 %v3927_v25, %s5455_s25 }
0x3339   :  { %v3934_v4 = vpop.permute.xlu1 %3933 }
0x333a   :  { %v3932_v20 = vpop.permute.xlu0 %3931  ;;  %v3980_v63 = vadd.f32 %v3934_v4, %v3875_v60 }
0x333b   :  { %4046 = vrot.lane.b32.xlu1 %v4015_v26, %s5456_s28  ;;  %v3979_v58 = vadd.f32 %v3932_v20, %v3874_v56  ;;  %v3888_v56 = vadd.f32 %v6941_v5, %v6974_v10 }
0x333c   :  { %4044 = vrot.lane.b32.xlu0 %v4016_v57, %s5456_s28 }
0x333d   :  { %v3938_v55 = vpop.permute.xlu1 %3937 }
0x333e   :  { %v3936_v11 = vpop.permute.xlu0 %3935  ;;  %v3982_v49 = vadd.f32 %v3938_v55, %v3877_v59 }
0x333f   :  { %4050 = vrot.lane.b32.xlu1 %v4018_v19, %s5456_s28  ;;  %v3981_v22 = vadd.f32 %v3936_v11, %v3876_v30 }
0x3340   :  { %4048 = vrot.lane.b32.xlu0 %v4019_v2, %s5456_s28 }
0x3341   :  { %v3942_v45 = vpop.permute.xlu1 %3941 }
0x3342   :  { %v3940_v29 = vpop.permute.xlu0 %3939  ;;  %v3984_v46 = vadd.f32 %v3942_v45, %v3879_v38 }
0x3343   :  { %v3983_v62 = vadd.f32 %v3940_v29, %v3878_v16  ;;  %v3887_v29 = vadd.f32 %v6974_v10, %v6951_v61 }
0x3345   :  { %v3946_v6 = vpop.permute.xlu1 %3945 }
0x3346   :  { %v3944_v27 = vpop.permute.xlu0 %3943  ;;  %v3986_v0 = vadd.f32 %v3946_v6, %v3881_v12 }
0x3347   :  { %v3985_v52 = vadd.f32 %v3944_v27, %v3880_v21  ;;  %v3886_v27 = vadd.f32 %v6974_v10, %v6943_v8 }
0x3349   :  { %v3950_v1 = vpop.permute.xlu1 %3949 }
0x334a   :  { %v3948_v43 = vpop.permute.xlu0 %3947  ;;  %v3988_v33 = vadd.f32 %v3950_v1, %v3883_v36 }
0x334b   :  { %v3987_v54 = vadd.f32 %v3948_v43, %v3882_v28 }
0x334d   :  { %v3954_v7 = vpop.permute.xlu1 %3953 }
0x334e   :  { %v3952_v23 = vpop.permute.xlu0 %3951  ;;  %v3990_v25 = vadd.f32 %v3954_v7, %v3885_v50  ;;  %v3889_v7 = vadd.f32 %v6945_v34, %v6974_v10 }
0x334f   :  { %v3989_v57 = vadd.f32 %v3952_v23, %v3884_v48 }
0x3351   :  { %v4023_v13 = vpop.permute.xlu1 %4022 }
0x3352   :  { %v4069_v53 = vadd.f32 %v4023_v13, %v3980_v63  ;;  %v4021_v40 = vpop.permute.xlu0 %4020 }
0x3353   :  { %v4068_v31 = vadd.f32 %v4021_v40, %v3979_v58 }
0x3354   :  { %4086 = vst.msk [vmem:[%s7074_s2 + $0x8] sm:$0x3f] %vm4085_vm9, %v4069_v53 }
0x3355   :  { %4084 = vst.msk [vmem:[%s7074_s2] sm:$0xff] %vm43_vm1, %v4068_v31  ;;  %v4027_v37 = vpop.permute.xlu1 %4026 }
0x3356   :  { %v4071_v47 = vadd.f32 %v4027_v37, %v3982_v49  ;;  %v4025_v15 = vpop.permute.xlu0 %4024 }
0x3357   :  { %v4070_v17 = vadd.f32 %v4025_v15, %v3981_v22 }
0x3358   :  { %4088 = vst.msk [vmem:[%s7074_s2 + $0x18] sm:$0x3f] %vm4085_vm9, %v4071_v47 }
0x3359   :  { %4087 = vst.msk [vmem:[%s7074_s2 + $0x10] sm:$0xff] %vm43_vm1, %v4070_v17  ;;  %v4031_v18 = vpop.permute.xlu1 %4030 }
0x335a   :  { %v4073_v24 = vadd.f32 %v4031_v18, %v3984_v46  ;;  %v4029_v14 = vpop.permute.xlu0 %4028 }
0x335b   :  { %v4072_v44 = vadd.f32 %v4029_v14, %v3983_v62 }
0x335c   :  { %4090 = vst.msk [vmem:[%s7074_s2 + $0x28] sm:$0x3f] %vm4085_vm9, %v4073_v24 }
0x335d   :  { %4089 = vst.msk [vmem:[%s7074_s2 + $0x20] sm:$0xff] %vm43_vm1, %v4072_v44  ;;  %v4035_v3 = vpop.permute.xlu1 %4034 }
0x335e   :  { %v4075_v39 = vadd.f32 %v4035_v3, %v3986_v0  ;;  %v4033_v41 = vpop.permute.xlu0 %4032 }
0x335f   :  { %v4074_v19 = vadd.f32 %v4033_v41, %v3985_v52 }
0x3360   :  { %4092 = vst.msk [vmem:[%s7074_s2 + $0x38] sm:$0x3f] %vm4085_vm9, %v4075_v39 }
0x3361   :  { %4091 = vst.msk [vmem:[%s7074_s2 + $0x30] sm:$0xff] %vm43_vm1, %v4074_v19  ;;  %v4039_v42 = vpop.permute.xlu1 %4038 }
0x3362   :  { %v4077_v26 = vadd.f32 %v4039_v42, %v3988_v33  ;;  %v4037_v32 = vpop.permute.xlu0 %4036 }
0x3363   :  { %v4076_v2 = vadd.f32 %v4037_v32, %v3987_v54 }
0x3364   :  { %4094 = vst.msk [vmem:[%s7074_s2 + $0x48] sm:$0x3f] %vm4085_vm9, %v4077_v26 }
0x3365   :  { %4093 = vst.msk [vmem:[%s7074_s2 + $0x40] sm:$0xff] %vm43_vm1, %v4076_v2  ;;  %v4043_v4 = vpop.permute.xlu1 %4042 }
0x3366   :  { %v4079_v35 = vadd.f32 %v4043_v4, %v3990_v25  ;;  %v4041_v20 = vpop.permute.xlu0 %4040 }
0x3367   :  { %v4078_v55 = vadd.f32 %v4041_v20, %v3989_v57 }
0x3368   :  { %4096 = vst.msk [vmem:[%s7074_s2 + $0x58] sm:$0x3f] %vm4085_vm9, %v4079_v35 }
0x3369   :  { %4095 = vst.msk [vmem:[%s7074_s2 + $0x50] sm:$0xff] %vm43_vm1, %v4078_v55 }
0x33a5   :  { %v3962_v9 = vpop.permute.xlu1 %3961 }
0x33a6   :  { %v3960_v11 = vpop.permute.xlu0 %3959  ;;  %v3994_v58 = vadd.f32 %v3962_v9, %v3889_v7 }
0x33a7   :  { %v3993_v61 = vadd.f32 %v3960_v11, %v3888_v56 }
0x33a9   :  { %v3958_v45 = vpop.permute.xlu1 %3957 }
0x33aa   :  { %v3956_v6 = vpop.permute.xlu0 %3955  ;;  %v3992_v51 = vadd.f32 %v3958_v45, %v3887_v29 }
0x33ab   :  { %v3991_v1 = vadd.f32 %v3956_v6, %v3886_v27 }
0x33ad   :  { %v4047_v43 = vpop.permute.xlu1 %4046 }
0x33ae   :  { %v4081_v60 = vadd.f32 %v4047_v43, %v3992_v51  ;;  %v4045_v23 = vpop.permute.xlu0 %4044 }
0x33af   :  { %v4080_v63 = vadd.f32 %v4045_v23, %v3991_v1 }
0x33b0   :  { %4098 = vst.msk [vmem:[%s7074_s2 + $0x68] sm:$0x3f] %vm4085_vm9, %v4081_v60 }
0x33b1   :  { %4097 = vst.msk [vmem:[%s7074_s2 + $0x60] sm:$0xff] %vm43_vm1, %v4080_v63  ;;  %v4051_v8 = vpop.permute.xlu1 %4050 }
0x33b2   :  { %v4083_v34 = vadd.f32 %v4051_v8, %v3994_v58  ;;  %v4049_v13 = vpop.permute.xlu0 %4048 }
0x33b3   :  { %v4082_v59 = vadd.f32 %v4049_v13, %v3993_v61 }
0x33b4   :  { %4100 = vst.msk [vmem:[%s7074_s2 + $0x78] sm:$0x3f] %vm4085_vm9, %v4083_v34 }
0x33b5   :  { %4099 = vst.msk [vmem:[%s7074_s2 + $0x70] sm:$0xff] %vm43_vm1, %v4082_v59 }

</bundles_post_ra>
